<compile_context>
chip_gen: v7x
topology: tpu7x:2x2x1
jax: 0.10.0
libtpu: 0.0.40
codegen_flags: <defaults>
</compile_context>

<pallas_src>
import math

import jax
import jax.numpy as jnp
from jax.experimental import pallas as pl
from jax.experimental.pallas import tpu as pltpu

IN_FEATURES = 9216     # 1 * 96 * 96
HIDDEN = 512
OUT_FEATURES = 2
TK = 3072              # 9216 / 3072 = 3 grid steps along the reduction axis


def actor_kernel(x_ref, w1_ref, b1_ref, w2_ref, out_ref, acc_ref):
    """Fused MLP: accumulate fc1 over the K grid axis (bf16 inputs, f32 acc),
    finalize with bias + ReLU + fc2 on the last K step.  The leading grid
    axis splits the HIDDEN columns (one slice per TensorCore on v7x); the
    fc2 partial of this slice is written to out_ref[0] and combined in the
    wrapper."""
    k = pl.program_id(1)

    @pl.when(k == 0)
    def _():
        acc_ref[...] = jnp.zeros_like(acc_ref)

    # fc1 partial product for this (hidden-slice, K-tile) block (MXU, f32 acc).
    acc_ref[...] += jnp.dot(
        x_ref[...], w1_ref[...], preferred_element_type=jnp.float32
    )

    @pl.when(k == pl.num_programs(1) - 1)
    def _():
        h = jnp.maximum(acc_ref[...] + b1_ref[...], 0.0)           # bias + ReLU
        y = jnp.dot(h, w2_ref[...], preferred_element_type=jnp.float32)
        out_ref[0] = y.astype(out_ref.dtype)                       # fc2 partial


def _default_hidden_splits():
    """Split HIDDEN across both TensorCores on v7x; single slice elsewhere."""
    try:
        kind = jax.devices()[0].device_kind.lower()
    except Exception:
        return 1
    return 2 if ("v7" in kind or "tpu7" in kind) else 1


def actor_forward(x, w1, b1, w2, b2, *, hidden_splits=None):
    """x: any shape whose trailing dims flatten to 9216 (e.g. (B,1,96,96))."""
    if hidden_splits is None:
        hidden_splits = _default_hidden_splits()
    assert HIDDEN % hidden_splits == 0
    hs = HIDDEN // hidden_splits                  # 512 or 256 (both mult. of 128)

    x2 = x.reshape(-1, IN_FEATURES).astype(jnp.bfloat16)
    batch = x2.shape[0]
    w1_bf16 = w1.astype(jnp.bfloat16)
    b1_2d = b1.reshape(1, HIDDEN).astype(jnp.float32)
    w2_f32 = w2.astype(jnp.float32)

    k_steps = IN_FEATURES // TK
    grid = (hidden_splits, k_steps)

    cost = pl.CostEstimate(
        flops=2 * batch * IN_FEATURES * HIDDEN + 2 * batch * HIDDEN * OUT_FEATURES,
        transcendentals=0,
        bytes_accessed=(IN_FEATURES * HIDDEN * 2          # W1 (bf16)
                        + batch * IN_FEATURES * 2          # X (bf16)
                        + HIDDEN * 4                       # b1
                        + HIDDEN * OUT_FEATURES * 4        # W2
                        + hidden_splits * batch * OUT_FEATURES * 4),
    )

    partials = pl.pallas_call(
        actor_kernel,
        out_shape=jax.ShapeDtypeStruct(
            (hidden_splits, batch, OUT_FEATURES), jnp.float32
        ),
        grid_spec=pltpu.PrefetchScalarGridSpec(
            num_scalar_prefetch=0,
            grid=grid,
            in_specs=[
                pl.BlockSpec((batch, TK), lambda s, k: (0, k)),        # X tile
                pl.BlockSpec((TK, hs), lambda s, k: (k, s)),           # W1 tile
                pl.BlockSpec((1, hs), lambda s, k: (0, s)),            # b1 slice
                pl.BlockSpec((hs, OUT_FEATURES), lambda s, k: (s, 0)), # W2 slice
            ],
            out_specs=pl.BlockSpec(
                (1, batch, OUT_FEATURES), lambda s, k: (s, 0, 0)
            ),
            scratch_shapes=[pltpu.VMEM((batch, hs), jnp.float32)],
        ),
        compiler_params=pltpu.CompilerParams(
            dimension_semantics=("parallel", "arbitrary"),
        ),
        cost_estimate=cost,
    )(x2, w1_bf16, b1_2d, w2_f32)

    # Combine per-slice fc2 partials; add b2 exactly once.
    return partials.sum(axis=0) + b2.reshape(1, OUT_FEATURES).astype(jnp.float32)


def init_params(key):
    """Deterministic init mimicking nn.Linear's U(-1/sqrt(fan_in), +1/sqrt(fan_in))."""
    k1, k2, k3, k4 = jax.random.split(key, 4)
    bound1 = 1.0 / math.sqrt(IN_FEATURES)
    bound2 = 1.0 / math.sqrt(HIDDEN)
    w1 = jax.random.uniform(k1, (IN_FEATURES, HIDDEN), jnp.float32, -bound1, bound1)
    b1 = jax.random.uniform(k2, (HIDDEN,), jnp.float32, -bound1, bound1)
    w2 = jax.random.uniform(k3, (HIDDEN, OUT_FEATURES), jnp.float32, -bound2, bound2)
    b2 = jax.random.uniform(k4, (OUT_FEATURES,), jnp.float32, -bound2, bound2)
    return w1, b1, w2, b2


if __name__ == "__main__":
    key = jax.random.PRNGKey(0)
    pkey, xkey = jax.random.split(key)
    w1, b1, w2, b2 = init_params(pkey)

    # Example input: batch=2 "state images" of shape (1, 96, 96) -> 9216 flat.
    x = jax.random.normal(xkey, (2, 1, 96, 96), dtype=jnp.float32)

    # Reference uses the same bf16 rounding of the streamed operands with
    # f32 accumulation (kernel keeps preferred_element_type=f32).
    x2 = x.reshape(-1, IN_FEATURES).astype(jnp.bfloat16).astype(jnp.float32)
    w1r = w1.astype(jnp.bfloat16).astype(jnp.float32)
    ref = jnp.maximum(x2 @ w1r + b1, 0.0) @ w2 + b2

    # Validate both the single-slice path (v5e/v6e) and the 2-way hidden
    # split used on v7x, then the auto-detected default.
    for splits in (1, 2):
        out = jax.block_until_ready(
            actor_forward(x, w1, b1, w2, b2, hidden_splits=splits)
        )
        assert out.shape == (2, OUT_FEATURES), out.shape
        assert jnp.allclose(out, ref, atol=1e-2, rtol=1e-2), (splits, out, ref)

    out = jax.block_until_ready(actor_forward(x, w1, b1, w2, b2))
    assert out.shape == (2, OUT_FEATURES), out.shape
    assert jnp.allclose(out, ref, atol=1e-2, rtol=1e-2), (out, ref)

    print("KERNEL_OK")
</pallas_src>

<mosaic_0001>
module attributes {stable_mosaic.version = 11 : i64} {
  func.func @actor_kernel(%arg0: i32, %arg1: i32, %arg2: memref<2x3072xbf16, #tpu.memory_space<vmem>>, %arg3: memref<3072x512xbf16, #tpu.memory_space<vmem>>, %arg4: memref<1x512xf32, #tpu.memory_space<vmem>>, %arg5: memref<512x2xf32, #tpu.memory_space<vmem>>, %arg6: memref<1x2x2xf32, #tpu.memory_space<vmem>>, %arg7: memref<2x512xf32, #tpu.memory_space<vmem>>) attributes {dimension_semantics = [#tpu.dimension_semantics<parallel>, #tpu.dimension_semantics<arbitrary>], iteration_bounds = array<i64: 1, 3>, scalar_prefetch = 0 : i64, scratch_operands = 1 : i64, tpu.core_type = #tpu.core_type<tc>, window_params = [{transform_indices = @transform_0, window_bounds = array<i64: 2, 3072>}, {transform_indices = @transform_1, window_bounds = array<i64: 3072, 512>}, {transform_indices = @transform_2, window_bounds = array<i64: 1, 512>}, {transform_indices = @transform_3, window_bounds = array<i64: 512, 2>}, {transform_indices = @transform_4, window_bounds = array<i64: 1, 2, 2>}]} {
    %c0_i32 = arith.constant 0 : i32
    %0 = arith.cmpi eq, %arg1, %c0_i32 : i32
    %1 = arith.extui %0 : i1 to i32
    %c0_i32_0 = arith.constant 0 : i32
    %2 = arith.cmpi ne, %1, %c0_i32_0 : i32
    scf.if %2 {
      %cst_9 = arith.constant 0.000000e+00 : f32
      %12 = vector.broadcast %cst_9 : f32 to vector<2x512xf32>
      %c0_10 = arith.constant 0 : index
      %c0_11 = arith.constant 0 : index
      %13 = vector.load %arg7[%c0_10, %c0_11] : memref<2x512xf32, #tpu.memory_space<vmem>>, vector<2x512xf32>
      tpu.vector_store %arg7[%c0_10, %c0_11], %12 {strides = array<i32>} : memref<2x512xf32, #tpu.memory_space<vmem>>, vector<2x512xf32>,
    } else {
    }
    %c0 = arith.constant 0 : index
    %c0_1 = arith.constant 0 : index
    %3 = vector.load %arg7[%c0, %c0_1] : memref<2x512xf32, #tpu.memory_space<vmem>>, vector<2x512xf32>
    %c0_2 = arith.constant 0 : index
    %c0_3 = arith.constant 0 : index
    %4 = vector.load %arg2[%c0_2, %c0_3] : memref<2x3072xbf16, #tpu.memory_space<vmem>>, vector<2x3072xbf16>
    %c0_4 = arith.constant 0 : index
    %c0_5 = arith.constant 0 : index
    %5 = vector.load %arg3[%c0_4, %c0_5] : memref<3072x512xbf16, #tpu.memory_space<vmem>>, vector<3072x512xbf16>
    %cst = arith.constant dense<0.000000e+00> : vector<2x512xf32>
    %6 = tpu.matmul %4, %5, %cst {dimension_numbers = #tpu.dot_dimension_numbers<[1], [0], [0], [1], [0, 0, 1, 1], [], []>} : vector<2x3072xbf16>, vector<3072x512xbf16>, vector<2x512xf32> -> vector<2x512xf32>
    %7 = arith.addf %3, %6 : vector<2x512xf32>
    %c0_6 = arith.constant 0 : index
    %c0_7 = arith.constant 0 : index
    %8 = vector.load %arg7[%c0_6, %c0_7] : memref<2x512xf32, #tpu.memory_space<vmem>>, vector<2x512xf32>
    tpu.vector_store %arg7[%c0_6, %c0_7], %7 {strides = array<i32>} : memref<2x512xf32, #tpu.memory_space<vmem>>, vector<2x512xf32>,
    %c2_i32 = arith.constant 2 : i32
    %9 = arith.cmpi eq, %arg1, %c2_i32 : i32
    %10 = arith.extui %9 : i1 to i32
    %c0_i32_8 = arith.constant 0 : i32
    %11 = arith.cmpi ne, %10, %c0_i32_8 : i32
    scf.if %11 {
      %c0_9 = arith.constant 0 : index
      %c0_10 = arith.constant 0 : index
      %12 = vector.load %arg7[%c0_9, %c0_10] : memref<2x512xf32, #tpu.memory_space<vmem>>, vector<2x512xf32>
      %c0_11 = arith.constant 0 : index
      %c0_12 = arith.constant 0 : index
      %13 = vector.load %arg4[%c0_11, %c0_12] : memref<1x512xf32, #tpu.memory_space<vmem>>, vector<1x512xf32>
      %14 = vector.broadcast %13 : vector<1x512xf32> to vector<2x512xf32>
      %15 = arith.addf %12, %14 : vector<2x512xf32>
      %cst_13 = arith.constant 0.000000e+00 : f32
      %16 = vector.broadcast %cst_13 : f32 to vector<2x512xf32>
      %17 = arith.maximumf %15, %16 : vector<2x512xf32>
      %c0_14 = arith.constant 0 : index
      %c0_15 = arith.constant 0 : index
      %18 = vector.load %arg5[%c0_14, %c0_15] : memref<512x2xf32, #tpu.memory_space<vmem>>, vector<512x2xf32>
      %cst_16 = arith.constant dense<0.000000e+00> : vector<2x2xf32>
      %19 = tpu.matmul %17, %18, %cst_16 {dimension_numbers = #tpu.dot_dimension_numbers<[1], [0], [0], [1], [0, 0, 1, 1], [], []>} : vector<2x512xf32>, vector<512x2xf32>, vector<2x2xf32> -> vector<2x2xf32>
      %c0_17 = arith.constant 0 : index
      %c0_18 = arith.constant 0 : index
      %c0_19 = arith.constant 0 : index
      %20 = vector.load %arg6[%c0_17, %c0_18, %c0_19] : memref<1x2x2xf32, #tpu.memory_space<vmem>>, vector<1x2x2xf32>
      %21 = vector.shape_cast %20 : vector<1x2x2xf32> to vector<2x2xf32>
      %22 = vector.shape_cast %19 : vector<2x2xf32> to vector<1x2x2xf32>
      tpu.vector_store %arg6[%c0_17, %c0_18, %c0_19], %22 {strides = array<i32>} : memref<1x2x2xf32, #tpu.memory_space<vmem>>, vector<1x2x2xf32>,
    } else {
    }
    return
  }
  func.func @transform_0(%arg0: i32, %arg1: i32) -> (i32, i32) {
    %c0_i32 = arith.constant 0 : i32
    %c0_i32_0 = arith.constant 0 : i32
    return %c0_i32, %arg1 : i32, i32
  }
  func.func @transform_1(%arg0: i32, %arg1: i32) -> (i32, i32) {
    %c0_i32 = arith.constant 0 : i32
    return %arg1, %arg0 : i32, i32
  }
  func.func @transform_2(%arg0: i32, %arg1: i32) -> (i32, i32) {
    %c0_i32 = arith.constant 0 : i32
    %c0_i32_0 = arith.constant 0 : i32
    return %c0_i32, %arg0 : i32, i32
  }
  func.func @transform_3(%arg0: i32, %arg1: i32) -> (i32, i32) {
    %c0_i32 = arith.constant 0 : i32
    %c0_i32_0 = arith.constant 0 : i32
    return %arg0, %c0_i32 : i32, i32
  }
  func.func @transform_4(%arg0: i32, %arg1: i32) -> (i32, i32, i32) {
    %c0_i32 = arith.constant 0 : i32
    %c0_i32_0 = arith.constant 0 : i32
    %c0_i32_1 = arith.constant 0 : i32
    return %arg0, %c0_i32, %c0_i32_0 : i32, i32, i32
  }
}

</mosaic_0001>

<bundles_post_ra>
// kernel: tpu_custom_call.1
= control target key start
LH: loop header
LB: loop body
LE: loop exit
PB: predicated region body
PF: predicated region fallthrough
CT: control target
= control target key end

     0   :  { %9 = vsyncpa [#allocation4], 0  ;;  %s10314_s0 = inlined_call_operand.hbm [shape: bf16[2,9216], index: 0, kind: input, shape index: {}]   ;;  %s10315_s1 = inlined_call_operand.hbm [shape: bf16[9216,512], index: 1, kind: input, shape index: {}]   ;;  %s10316_s2 = inlined_call_operand.hbm [shape: f32[1,512], index: 2, kind: input, shape index: {}]   ;;  %s10317_s3 = inlined_call_operand.vmem [shape: f32[512,2], index: 3, kind: input, shape index: {}]   ;;  %s10318_s4 = inlined_call_operand.hbm [shape: f32[1,2,2], index: 4, kind: output, shape index: {}]  }
   0x1   :  { %11 = vsyncpa [#allocation4 + $0x1], 0 }
   0x2   :  { %12 = vsyncpa [#allocation7], 0 }
   0x3   :  { %14 = vsyncpa [#allocation7 + $0x1], 0 }
   0x4   :  { %15 = vsyncpa [#allocation5], 0  ;;  %s8968_s15 = smov 0   ;;  %s8970_s16 = smov 0  }
   0x5   :  { %s8972_s17 = smov 0   ;;  %s8974_s18 = smov 0  }
   0x6   :  { %s8976_s19 = smov 0   ;;  %s8978_s20 = smov 0  }
   0x7 LB: > { %s8997_s21 = sadd.s32 4294967295, %s8932_s20   ;;  %s40_s22 = sadd.s32 1, %s8920_s17  ;;  %s8932_s20 = sphi %s8978_s20, %s21_s20   ;;  %s8928_s19 = sphi %s8976_s19, %s10339_s19   ;;  %s8924_s18 = sphi %s8974_s18, %s10338_s18   ;;  %s8920_s17 = sphi %s8972_s17, %s10337_s17   ;;  %s8916_s16 = sphi %s8970_s16, %s10336_s16   ;;  %s8912_s15 = sphi %s8968_s15, %s10335_s15  }
   0x8   : > { %p47_p0 = scmp.ne.s32.totalorder %s8920_s17, %s8916_s16  ;;  %p53_p1 = scmp.ne.s32.totalorder %s8916_s16, %s8912_s15 }
   0x9   : > { %p10319_p2 = scmp.eq.s32.totalorder %s8997_s21, 0  ;;  %p6503_p3 = scmp.ge.s32.totalorder %s8932_s20, 1 }
   0xa   : > { %p170_p4 = scmp.lt.s32.totalorder %s8932_s20, 4  ;;  %s8934_s25 = smov [#allocation8]  }
   0xb   : > { %p9008_p5 = por %p10319_p2, %p53_p1  ;;  %s186_s26 = sshll.u32 %s8934_s25, 4  ;;  %s187_s26 = int_to_ptr.vmem [resolvable:$true] %s186_s26 }
   0xc   : > { %p9012_p6 = pnand %p6503_p3, %p170_p4  ;;  %p48_p8 = scmp.eq.s32.totalorder %s8932_s20, 0 }
   0xd   : > { %s10322_s23 = scalar_select %p9008_p5, 1, 0 }
   0xe   : > { %s10323_s24 = scalar_select %p9012_p6, 1, 0 }
   0xf   : > { %p7528_p7 = pneg %p9012_p6  ;;  %s30_s28 = sadd.s32 1, %s8928_s19 }
  0x10   : > { %p9026_p10 = scmp.ge.s32.totalorder %s30_s28, 3  ;;  %p9033_p11 = por %p48_p8, %p47_p0 }
  0x11   : > { %p9021_p9 = pnand %p7528_p7, %p10319_p2  ;;  %s8756_s7 = scalar_lea.hbm %s10316_s2, 64 }
  0x12   : > { %s10325_s29 = scalar_select %p9026_p10, 1, 0 }
  0x13   : > { %s10326_s30 = scalar_select %p9033_p11, 1, 0 }
  0x14   : > { %p8757_p13 = scmp.ne.s32.totalorder %s10316_s2, %s8756_s7  ;;  %p8758_p1 = pneg %p9021_p9 }
  0x15   : > { %p8763_p0 = scmp.lt.u32.totalorder %s8756_s7, %s10316_s2 }
  0x16   : > { %p8759_p3 = pnand %p8758_p1, %p8757_p13 }
  0x18   : > { %p8760_p4 = pneg %p8759_p3 }
  0x1a   : > { %p8765_p7 = pnand %p8763_p0, %p8760_p4 }
  0x1c   : > { %8768 = shalt.err (!%p8765_p7)
}
  0x1d   : > { %s8769_s12 = scalar_lea.vmem %s187_s26, 64  ;;  %p8777_p5 = scmp.lt.s32.totalorder %s187_s26, %s187_s26 }
  0x1e   : > { %p8770_p8 = scmp.ne.s32.totalorder %s187_s26, %s8769_s12  ;;  %p8778_p6 = scmp.lt.s32.totalorder %s8769_s12, %s8769_s12 }
  0x20   : > { %p8772_p2 = pnand %p8770_p8, %p8758_p1  ;;  %p8779_p11 = por %p8778_p6, %p8777_p5 }
  0x22   : > { %p8773_p12 = pneg %p8772_p2 }
  0x24   : > { %p8780_p10 = pnand %p8779_p11, %p8773_p12 }
  0x26   : > { %8783 = shalt.err (!%p8780_p10)
}
  0x27   : > { %7531 = dma.hbm_to_vmem [thread:$0]  (!%p9021_p9), %s10316_s2, 64, %s187_s26, [#allocation7]  }
  0x28   : > { %p10327_p2 = scmp.ne.s32.totalorder %s10325_s29, 0  ;;  %s9059_s15 = sand.u32 1, %s8920_s17  }
  0x29   : > { %s7286_s25 = smul.u32 384, %s8928_s19  ;;  %p10328_p6 = scmp.ne.s32.totalorder %s10326_s30, 0 }
  0x2a   : > { %s10341_s28 = smov (%p10327_p2, %s30_s28), 0  ;;  %s7512_s5 = smul.u32 24, %s9059_s15 }
  0x2b   : > { %s37_s27 = ssub.s32 %s8928_s19, %s10341_s28  ;;  %s9068_s8 = scalar_lea.hbm %s10314_s0, %s7286_s25 }
  0x2c   : > { %p38_p5 = scmp.eq.s32.totalorder %s37_s27, 0  ;;  %p10329_p9 = scmp.lt.s32.totalorder %s8932_s20, 3 }
  0x2d   : > { %s210_s9 = scalar_lea.vmem [#allocation3], %s7512_s5  ;;  %s7513_s11 = smul.u32 6144, %s9059_s15 }
  0x2e   : > { %p9074_p10 = pnand %p10329_p9, %p10328_p6  ;;  %s218_s10 = sshll.u32 %s210_s9, 4  ;;  %s9084_s10 = int_to_ptr.vmem [resolvable:$true] %s218_s10 }
  0x2f   : > { %s9081_s29 = scalar_select %p38_p5, %s8920_s17, %s40_s22  }
  0x30   : > { %s7289_s30 = smul.u32 98304, %s8928_s19  ;;  %s207_s12 = scalar_lea.sflag [#allocation4], %s9059_s15 }
  0x31   : > { %s8784_s13 = scalar_lea.hbm %s9068_s8, 384  ;;  %p8786_p12 = pneg %p9074_p10 }
  0x32   : > { %p8785_p11 = scmp.ne.s32.totalorder %s9068_s8, %s8784_s13  ;;  %s8789_s22 = scalar_lea.hbm %s10314_s0, 1152 }
  0x33   : > { %p8790_p3 = scmp.lt.u32.totalorder %s9068_s8, %s10314_s0  ;;  %p8791_p4 = scmp.lt.u32.totalorder %s8789_s22, %s8784_s13 }
  0x34   : > { %p8787_p13 = pnand %p8786_p12, %p8785_p11  ;;  %p8793_p7 = scmp.lt.u32.totalorder %s8784_s13, %s9068_s8 }
  0x35   : > { %p8792_p0 = por %p8791_p4, %p8790_p3 }
  0x36   : > { %p8788_p1 = pneg %p8787_p13 }
  0x37   : > { %p8794_p8 = por %p8793_p7, %p8792_p0 }
  0x39   : > { %p8795_p2 = pnand %p8794_p8, %p8788_p1 }
  0x3b   : > { %8798 = shalt.err (!%p8795_p2)
}
  0x3c   : > { %s8799_s6 = scalar_lea.vmem %s9084_s10, 384  ;;  %s8935_s7 = smov [#allocation3]  }
  0x3d   : > { %p8800_p5 = scmp.ne.s32.totalorder %s9084_s10, %s8799_s6  ;;  %s8804_s9 = sshll.u32 %s8935_s7, 4  ;;  %s8805_s9 = int_to_ptr.vmem [resolvable:$false] %s8804_s9 }
  0x3e   : > { %s8806_s14 = scalar_lea.vmem %s8805_s9, 768  ;;  %p8807_p11 = scmp.lt.s32.totalorder %s9084_s10, %s8805_s9 }
  0x3f   : > { %p8802_p6 = pnand %p8800_p5, %p8786_p12  ;;  %p8808_p13 = scmp.lt.s32.totalorder %s8806_s14, %s8799_s6 }
  0x41   : > { %p8803_p9 = pneg %p8802_p6  ;;  %p8809_p3 = por %p8808_p13, %p8807_p11 }
  0x43   : > { %p8810_p4 = pnand %p8809_p3, %p8803_p9 }
  0x45   : > { %8813 = shalt.err (!%p8810_p4)
}
  0x46   : > { %7535 = dma.hbm_to_vmem [thread:$0]  (!%p9074_p10), %s9068_s8, 384, %s9084_s10, %s207_s12  }
  0x47   : > { %s225_s13 = sand.u32 1, %s8932_s20   ;;  %s229_s25 = scalar_lea.vmem [#allocation6], %s7513_s11 }
  0x48   : > { %s239_s22 = sshll.u32 %s229_s25, 4  ;;  %s9123_s6 = scalar_lea.hbm %s10315_s1, %s7289_s30  ;;  %s9116_s22 = int_to_ptr.vmem [resolvable:$true] %s239_s22 }
  0x49   : > { %s9125_s7 = scalar_lea.sflag [#allocation7], %s225_s13  ;;  %s8814_s9 = scalar_lea.hbm %s9123_s6, 98304 }
  0x4a   : > { %p8815_p1 = scmp.ne.s32.totalorder %s9123_s6, %s8814_s9  ;;  %s8819_s10 = scalar_lea.hbm %s10315_s1, 294912 }
  0x4b   : > { %p8820_p8 = scmp.lt.u32.totalorder %s9123_s6, %s10315_s1  ;;  %p8821_p2 = scmp.lt.u32.totalorder %s8819_s10, %s8814_s9 }
  0x4c   : > { %p8817_p0 = pnand %p8815_p1, %p8786_p12  ;;  %p8823_p6 = scmp.lt.u32.totalorder %s8814_s9, %s9123_s6 }
  0x4d   : > { %p8822_p5 = por %p8821_p2, %p8820_p8 }
  0x4e   : > { %p8818_p7 = pneg %p8817_p0 }
  0x4f   : > { %p8824_p9 = por %p8823_p6, %p8822_p5 }
  0x51   : > { %p8825_p11 = pnand %p8824_p9, %p8818_p7 }
  0x53   : > { %8828 = shalt.err (!%p8825_p11)
}
  0x54   : > { %s8829_s30 = scalar_lea.vmem %s9116_s22, 98304  ;;  %s8936_s14 = smov [#allocation6]  }
  0x55   : > { %p8830_p13 = scmp.ne.s32.totalorder %s9116_s22, %s8829_s30  ;;  %s8834_s13 = sshll.u32 %s8936_s14, 4  ;;  %s8835_s13 = int_to_ptr.vmem [resolvable:$false] %s8834_s13 }
  0x56   : > { %s8836_s25 = scalar_lea.vmem %s8835_s13, 196608  ;;  %p8837_p1 = scmp.lt.s32.totalorder %s9116_s22, %s8835_s13 }
  0x57   : > { %p8832_p3 = pnand %p8830_p13, %p8786_p12  ;;  %p8838_p0 = scmp.lt.s32.totalorder %s8836_s25, %s8829_s30 }
  0x59   : > { %p8833_p4 = pneg %p8832_p3  ;;  %p8839_p8 = por %p8838_p0, %p8837_p1 }
  0x5b   : > { %p8840_p2 = pnand %p8839_p8, %p8833_p4 }
  0x5d   : > { %8843 = shalt.err (!%p8840_p2)
}
  0x5e   : > { %s8937_s27 = smov 256   ;;  %s8938_s5 = smov 16  }
  0x5f   : > { %7538 = dma.hbm_to_vmem [thread:$0]  (!%p9074_p10), %s9123_s6, 98304, %s9116_s22, %s9125_s7, %s8937_s27, %s8937_s27, %s8938_s5  }
  0x60   : > { %p10331_p12 = scmp.ne.s32.totalorder %s10323_s24, 0 }
  0x61   : > { %s253_s9 = sand.u32 (!%p10331_p12), 1, %s8916_s16   ;;  %p10332_p7 = scmp.ne.s32.totalorder (!%p10331_p12), %s10322_s23, 0 }
  0x62   : > { %251 = sbr.rel (%p10331_p12) target bundleno = 1374 (0x55e), region = 36  ;;  %s254_s8 = scalar_lea.sflag (!%p10331_p12), [#allocation4], %s253_s9 }
  0x63   : > { %s7514_s15 = smul.u32 (!%p10331_p12), 24, %s253_s9 }
  0x65   : > { %s9154_s10 = scalar_lea.vmem (!%p10331_p12), [#allocation3], %s7514_s15 }
  0x69   : > { %8895 = dma.done.wait (%p10332_p7), %s254_s8, 384  }
  0x6a   : > { %8897 = vsyncadd (%p10332_p7), %s254_s8, 4294966912  ;;  %s262_s11 = sand.u32 1, %s8997_s21   ;;  %s7515_s26 = smul.u32 6144, %s253_s9 }
  0x6b   : > { %s263_s22 = scalar_lea.sflag [#allocation7], %s262_s11 }
  0x6c   : > { %s9161_s6 = scalar_lea.vmem [#allocation6], %s7515_s26 }
  0x6d   : > { %8899 = dma.done.wait (%p10332_p7), %s263_s22, 98304  }
  0x6e   : > { %8901 = vsyncadd (%p10332_p7), %s263_s22, 4294868992  ;;  %p10333_p10 = scmp.eq.s32.totalorder %s8997_s21, 0 }
  0x70   : > { %8903 = dma.done.wait (%p10333_p10), [#allocation7], 64   ;;  %p10334_p5 = pmov %p10333_p10 }
  0x71   : > { %p6512_p6 = scmp.ne.s32.totalorder %s8924_s18, 0 }
  0x72   : > { %8905 = vsyncadd (%p10334_p5), [#allocation7], 4294967232  ;;  %v8939_v0 = vmov (!%p6512_p6), 0.0  }
  0x73   : > { %313 = sbr.rel (%p6512_p6) target bundleno = 122 (0x7a), region = 52  ;;  %314 = vst [vmem:[#allocation2] sm:$0xff] (!%p6512_p6), %v8939_v0 }
  0x7a PF: > { %v7599_v1 = vld [vmem:[%s9161_s6 + $0x4] ss:$16 sps:$4 sm:$0xff]   ;;  %v7601_v2 = vld [vmem:[%s9161_s6 + $0xc] ss:$16 sps:$4 sm:$0xff]   ;;  %v7603_v3 = vld [vmem:[%s9161_s6] ss:$16 sps:$4 sm:$0xff]   ;;  %v1094_v39 = vlaneseq }
  0x7b   : > { %5101 = vmatprep.subr.bf16.mxu0 %v7599_v1  ;;  %v7604_v4 = vld [vmem:[%s9161_s6 + $0x8] ss:$16 sps:$4 sm:$0xff]   ;;  %5593 = vmatprep.subr.bf16.mxu1 %v7601_v2  ;;  %v7605_v5 = vld [vmem:[%s9161_s6 + $0x24] ss:$16 sps:$4 sm:$0xff]   ;;  %v7607_v6 = vld [vmem:[%s9161_s6 + $0x2c] ss:$16 sps:$4 sm:$0xff]  }
  0x7c   : > { %5102 = vmatpush1.bf16.msra.mxu0 %v7603_v3  ;;  %5594 = vmatpush1.bf16.msra.mxu1 %v7604_v4  ;;  %v7609_v7 = vld [vmem:[%s9161_s6 + $0x20] ss:$16 sps:$4 sm:$0xff]   ;;  %v7610_v8 = vld [vmem:[%s9161_s6 + $0x28] ss:$16 sps:$4 sm:$0xff]   ;;  %v7611_v9 = vld [vmem:[%s9161_s6 + $0x44] ss:$16 sps:$4 sm:$0xff]  }
  0x7d   : > { %5103 = vmatprep.subr.bf16.mxu0 %v7605_v5  ;;  %5595 = vmatprep.subr.bf16.mxu1 %v7607_v6  ;;  %v7613_v10 = vld [vmem:[%s9161_s6 + $0x4c] ss:$16 sps:$4 sm:$0xff]   ;;  %v7615_v11 = vld [vmem:[%s9161_s6 + $0x40] ss:$16 sps:$4 sm:$0xff]   ;;  %v7616_v12 = vld [vmem:[%s9161_s6 + $0x48] ss:$16 sps:$4 sm:$0xff]  }
  0x7e   : > { %v7617_v13 = vld [vmem:[%s9161_s6 + $0x64] ss:$16 sps:$4 sm:$0xff]   ;;  %v7619_v14 = vld [vmem:[%s9161_s6 + $0x6c] ss:$16 sps:$4 sm:$0xff]   ;;  %v7621_v15 = vld [vmem:[%s9161_s6 + $0x60] ss:$16 sps:$4 sm:$0xff]  }
  0x7f   : > { %v7622_v16 = vld [vmem:[%s9161_s6 + $0x68] ss:$16 sps:$4 sm:$0xff]   ;;  %v7623_v17 = vld [vmem:[%s9161_s6 + $0x84] ss:$16 sps:$4 sm:$0xff]   ;;  %v7625_v18 = vld [vmem:[%s9161_s6 + $0x8c] ss:$16 sps:$4 sm:$0xff]  }
  0x80   : > { %5104 = vmatpush1.bf16.msra.mxu0 %v7609_v7  ;;  %5596 = vmatpush1.bf16.msra.mxu1 %v7610_v8  ;;  %v7627_v19 = vld [vmem:[%s9161_s6 + $0x80] ss:$16 sps:$4 sm:$0xff]   ;;  %v7628_v20 = vld [vmem:[%s9161_s6 + $0x88] ss:$16 sps:$4 sm:$0xff]   ;;  %v7629_v21 = vld [vmem:[%s9161_s6 + $0xa4] ss:$16 sps:$4 sm:$0xff]  }
  0x81   : > { %5105 = vmatprep.subr.bf16.mxu0 %v7611_v9  ;;  %5597 = vmatprep.subr.bf16.mxu1 %v7613_v10  ;;  %v7631_v22 = vld [vmem:[%s9161_s6 + $0xac] ss:$16 sps:$4 sm:$0xff]   ;;  %v7633_v23 = vld [vmem:[%s9161_s6 + $0xa0] ss:$16 sps:$4 sm:$0xff]   ;;  %v7634_v24 = vld [vmem:[%s9161_s6 + $0xa8] ss:$16 sps:$4 sm:$0xff]  }
  0x82   : > { %v7635_v25 = vld [vmem:[%s9161_s6 + $0xc4] ss:$16 sps:$4 sm:$0xff]   ;;  %v7637_v26 = vld [vmem:[%s9161_s6 + $0xcc] ss:$16 sps:$4 sm:$0xff]   ;;  %v7639_v27 = vld [vmem:[%s9161_s6 + $0xc0] ss:$16 sps:$4 sm:$0xff]  }
  0x83   : > { %v7640_v28 = vld [vmem:[%s9161_s6 + $0xc8] ss:$16 sps:$4 sm:$0xff]   ;;  %v7641_v29 = vld [vmem:[%s9161_s6 + $0xe4] ss:$16 sps:$4 sm:$0xff]   ;;  %v7643_v30 = vld [vmem:[%s9161_s6 + $0xec] ss:$16 sps:$4 sm:$0xff]  }
  0x84   : > { %5106 = vmatpush1.bf16.msra.mxu0 %v7615_v11  ;;  %5598 = vmatpush1.bf16.msra.mxu1 %v7616_v12  ;;  %v7645_v31 = vld [vmem:[%s9161_s6 + $0xe0] ss:$16 sps:$4 sm:$0xff]   ;;  %v7646_v32 = vld [vmem:[%s9161_s6 + $0xe8] ss:$16 sps:$4 sm:$0xff]   ;;  %v7647_v33 = vld [vmem:[%s9161_s6 + $0x104] ss:$16 sps:$4 sm:$0xff]  }
  0x85   : > { %5107 = vmatprep.subr.bf16.mxu0 %v7617_v13  ;;  %5599 = vmatprep.subr.bf16.mxu1 %v7619_v14  ;;  %v7649_v34 = vld [vmem:[%s9161_s6 + $0x10c] ss:$16 sps:$4 sm:$0xff]   ;;  %v7651_v35 = vld [vmem:[%s9161_s6 + $0x100] ss:$16 sps:$4 sm:$0xff]   ;;  %v7652_v36 = vld [vmem:[%s9161_s6 + $0x108] ss:$16 sps:$4 sm:$0xff]  }
  0x86   : > { %v8940_v37 = vmov 1966171168   ;;  %v7653_v40 = vld [vmem:[%s9161_s6 + $0x124] ss:$16 sps:$4 sm:$0xff]   ;;  %v7655_v41 = vld [vmem:[%s9161_s6 + $0x12c] ss:$16 sps:$4 sm:$0xff]  }
  0x87   : > { %v1092_v38 = vunpack.c.l.s4 %v8940_v37  ;;  %v7657_v42 = vld [vmem:[%s9161_s6 + $0x120] ss:$16 sps:$4 sm:$0xff]   ;;  %v9211_v44 = vshrl.u32 %v1094_v39, 7  ;;  %v7658_v45 = vld [vmem:[%s9161_s6 + $0x128] ss:$16 sps:$4 sm:$0xff]   ;;  %p7281_p9 = scmp.ne.s32.totalorder %s8924_s18, 2 }
  0x88   : > { %5108 = vmatpush1.bf16.msra.mxu0 %v7621_v15  ;;  %5600 = vmatpush1.bf16.msra.mxu1 %v7622_v16  ;;  %v7659_v46 = vld [vmem:[%s9161_s6 + $0x144] ss:$16 sps:$4 sm:$0xff]   ;;  %v7661_v47 = vld [vmem:[%s9161_s6 + $0x14c] ss:$16 sps:$4 sm:$0xff]   ;;  %v7663_v48 = vld [vmem:[%s9161_s6 + $0x140] ss:$16 sps:$4 sm:$0xff]  }
  0x89   : > { %5109 = vmatprep.subr.bf16.mxu0 %v7623_v17  ;;  %5601 = vmatprep.subr.bf16.mxu1 %v7625_v18  ;;  %v1093_v43 = vunpack.c.0.s8 %v1092_v38  ;;  %v7664_v49 = vld [vmem:[%s9161_s6 + $0x148] ss:$16 sps:$4 sm:$0xff]   ;;  %v7665_v51 = vld [vmem:[%s9161_s6 + $0x164] ss:$16 sps:$4 sm:$0xff]   ;;  %v7667_v52 = vld [vmem:[%s9161_s6 + $0x16c] ss:$16 sps:$4 sm:$0xff]  }
  0x8a   : > { %v9224_v53 = vld [vmem:[%s9154_s10] sm:$0xff]  ;;  %vm6378_vm0 = vcmask (!%p7281_p9), 9216  }
  0x8b   : > { %v9219_v50 = vsub.s32 %v1093_v43, %v9211_v44  ;;  %v7669_v54 = vld [vmem:[%s9161_s6 + $0x160] ss:$16 sps:$4 sm:$0xff]   ;;  %v7670_v56 = vld [vmem:[%s9161_s6 + $0x168] ss:$16 sps:$4 sm:$0xff]   ;;  %v7671_v57 = vld [vmem:[%s9161_s6 + $0x184] ss:$16 sps:$4 sm:$0xff]  }
  0x8c   : > { %5110 = vmatpush1.bf16.msra.mxu0 %v7627_v19  ;;  %5602 = vmatpush1.bf16.msra.mxu1 %v7628_v20  ;;  %v7673_v58 = vld [vmem:[%s9161_s6 + $0x18c] ss:$16 sps:$4 sm:$0xff]   ;;  %v7675_v60 = vld [vmem:[%s9161_s6 + $0x180] ss:$16 sps:$4 sm:$0xff]   ;;  %v7676_v62 = vld [vmem:[%s9161_s6 + $0x188] ss:$16 sps:$4 sm:$0xff]  }
  0x8d   : > { %5111 = vmatprep.subr.bf16.mxu0 %v7629_v21  ;;  %5603 = vmatprep.subr.bf16.mxu1 %v7631_v22  ;;  %v1097_v55 = vrot.slane %v9224_v53, %v9219_v50  ;;  %v7677_v63 = vld [vmem:[%s9161_s6 + $0x1a4] ss:$16 sps:$4 sm:$0xff]   ;;  %v7679_v0 = vld [vmem:[%s9161_s6 + $0x1ac] ss:$16 sps:$4 sm:$0xff]   ;;  %v7681_v1 = vld [vmem:[%s9161_s6 + $0x1a0] ss:$16 sps:$4 sm:$0xff]  }
  0x8e   : > { %v7682_v2 = vld [vmem:[%s9161_s6 + $0x1a8] ss:$16 sps:$4 sm:$0xff]   ;;  %v7683_v3 = vld [vmem:[%s9161_s6 + $0x1c4] ss:$16 sps:$4 sm:$0xff]   ;;  %v7685_v4 = vld [vmem:[%s9161_s6 + $0x1cc] ss:$16 sps:$4 sm:$0xff]  }
  0x8f   : > { %v1105_v59 = vcombine.high %v1097_v55, %v1097_v55  ;;  %v7687_v5 = vld [vmem:[%s9161_s6 + $0x1c0] ss:$16 sps:$4 sm:$0xff]   ;;  %v7688_v6 = vld [vmem:[%s9161_s6 + $0x1c8] ss:$16 sps:$4 sm:$0xff]   ;;  %v7689_v7 = vld [vmem:[%s9161_s6 + $0x1e4] ss:$16 sps:$4 sm:$0xff]   ;;  %v9251_v14 = vrot.slane %v1097_v55, %v9219_v50 }
  0x90   : > { %5112 = vmatpush1.bf16.msra.mxu0 %v7633_v23  ;;  %5604 = vmatpush1.bf16.msra.mxu1 %v7634_v24  ;;  %v7691_v8 = vld [vmem:[%s9161_s6 + $0x1ec] ss:$16 sps:$4 sm:$0xff]   ;;  %v7693_v9 = vld [vmem:[%s9161_s6 + $0x1e0] ss:$16 sps:$4 sm:$0xff]   ;;  %v7694_v10 = vld [vmem:[%s9161_s6 + $0x1e8] ss:$16 sps:$4 sm:$0xff]  }
  0x91   : > { %5113 = vmatprep.subr.bf16.mxu0 %v7635_v25  ;;  %5605 = vmatprep.subr.bf16.mxu1 %v7637_v26  ;;  %v1127_v61 = vrot.slane %v1105_v59, %v9219_v50  ;;  %v7697_v11 = vld [vmem:[%s9161_s6 + $0x204] ss:$16 sps:$4 sm:$0xff]   ;;  %v7700_v12 = vld [vmem:[%s9161_s6 + $0x20c] ss:$16 sps:$4 sm:$0xff]   ;;  %v7695_v13 = vld [vmem:[%s9161_s6 + $0x200] ss:$16 sps:$4 sm:$0xff]  }
  0x92   : > { %v7698_v15 = vld [vmem:[%s9161_s6 + $0x208] ss:$16 sps:$4 sm:$0xff]   ;;  %v7703_v16 = vld [vmem:[%s9161_s6 + $0x224] ss:$16 sps:$4 sm:$0xff]   ;;  %v7706_v17 = vld [vmem:[%s9161_s6 + $0x22c] ss:$16 sps:$4 sm:$0xff]  }
  0x93   : > { %5133 = vmatprep.mubr.bf16.mxu0 %v1127_v61  ;;  %5625 = vmatprep.mubr.bf16.mxu1 %v1127_v61  ;;  %v1137_v18 = vcombine.high %v1127_v61, %v1127_v61  ;;  %v7701_v19 = vld [vmem:[%s9161_s6 + $0x220] ss:$16 sps:$4 sm:$0xff]   ;;  %v7704_v20 = vld [vmem:[%s9161_s6 + $0x228] ss:$16 sps:$4 sm:$0xff]   ;;  %v7709_v21 = vld [vmem:[%s9161_s6 + $0x244] ss:$16 sps:$4 sm:$0xff]  }
  0x94   : > { %5114 = vmatpush1.bf16.msra.mxu0 %v7639_v27  ;;  %5606 = vmatpush1.bf16.msra.mxu1 %v7640_v28  ;;  %v7712_v22 = vld [vmem:[%s9161_s6 + $0x24c] ss:$16 sps:$4 sm:$0xff]   ;;  %v7707_v23 = vld [vmem:[%s9161_s6 + $0x240] ss:$16 sps:$4 sm:$0xff]   ;;  %v7710_v24 = vld [vmem:[%s9161_s6 + $0x248] ss:$16 sps:$4 sm:$0xff]  }
  0x95   : > { %5115 = vmatprep.subr.bf16.mxu0 %v7641_v29  ;;  %5607 = vmatprep.subr.bf16.mxu1 %v7643_v30  ;;  %v7715_v25 = vld [vmem:[%s9161_s6 + $0x264] ss:$16 sps:$4 sm:$0xff]   ;;  %v7718_v26 = vld [vmem:[%s9161_s6 + $0x26c] ss:$16 sps:$4 sm:$0xff]   ;;  %v7713_v27 = vld [vmem:[%s9161_s6 + $0x260] ss:$16 sps:$4 sm:$0xff]  }
  0x96   : > { %v7716_v28 = vld [vmem:[%s9161_s6 + $0x268] ss:$16 sps:$4 sm:$0xff]   ;;  %v7721_v29 = vld [vmem:[%s9161_s6 + $0x284] ss:$16 sps:$4 sm:$0xff]   ;;  %v7724_v30 = vld [vmem:[%s9161_s6 + $0x28c] ss:$16 sps:$4 sm:$0xff]  }
  0x97   : > { %v7733_v37 = vld [vmem:[%s9161_s6 + $0x2c4] ss:$16 sps:$4 sm:$0xff]   ;;  %v7736_v38 = vld [vmem:[%s9161_s6 + $0x2cc] ss:$16 sps:$4 sm:$0xff]   ;;  %v7731_v39 = vld [vmem:[%s9161_s6 + $0x2c0] ss:$16 sps:$4 sm:$0xff]  }
  0x98   : > { %5116 = vmatpush1.bf16.msra.mxu0 %v7645_v31  ;;  %5608 = vmatpush1.bf16.msra.mxu1 %v7646_v32  ;;  %v7719_v31 = vld [vmem:[%s9161_s6 + $0x280] ss:$16 sps:$4 sm:$0xff]   ;;  %v7722_v32 = vld [vmem:[%s9161_s6 + $0x288] ss:$16 sps:$4 sm:$0xff]   ;;  %v7766_v61 = vld [vmem:[%s9161_s6 + $0x36c] ss:$16 sps:$4 sm:$0xff]  }
  0x99   : > { %5117 = vmatprep.subr.bf16.mxu0 %v7647_v33  ;;  %5609 = vmatprep.subr.bf16.mxu1 %v7649_v34  ;;  %v7727_v33 = vld [vmem:[%s9161_s6 + $0x2a4] ss:$16 sps:$4 sm:$0xff]   ;;  %v7730_v34 = vld [vmem:[%s9161_s6 + $0x2ac] ss:$16 sps:$4 sm:$0xff]   ;;  %v7737_v43 = vld [vmem:[%s9161_s6 + $0x2e0] ss:$16 sps:$4 sm:$0xff]  }
  0x9a   : > { %v7752_v55 = vld [vmem:[%s9161_s6 + $0x328] ss:$16 sps:$4 sm:$0xff]  }
  0x9b   : > { %v7758_v59 = vld [vmem:[%s9161_s6 + $0x348] ss:$16 sps:$4 sm:$0xff]  }
  0x9c   : > { %5118 = vmatpush1.bf16.msra.mxu0 %v7651_v35  ;;  %5610 = vmatpush1.bf16.msra.mxu1 %v7652_v36  ;;  %v7725_v35 = vld [vmem:[%s9161_s6 + $0x2a0] ss:$16 sps:$4 sm:$0xff]   ;;  %v7728_v36 = vld [vmem:[%s9161_s6 + $0x2a8] ss:$16 sps:$4 sm:$0xff]  }
  0x9d   : > { %5119 = vmatprep.subr.bf16.mxu0 %v7653_v40  ;;  %5611 = vmatprep.subr.bf16.mxu1 %v7655_v41  ;;  %v7734_v40 = vld [vmem:[%s9161_s6 + $0x2c8] ss:$16 sps:$4 sm:$0xff]   ;;  %v7739_v41 = vld [vmem:[%s9161_s6 + $0x2e4] ss:$16 sps:$4 sm:$0xff]  }
  0xa0   : > { %5120 = vmatpush1.bf16.msra.mxu0 %v7657_v42  ;;  %5612 = vmatpush1.bf16.msra.mxu1 %v7658_v45  ;;  %v7742_v42 = vld [vmem:[%s9161_s6 + $0x2ec] ss:$16 sps:$4 sm:$0xff]   ;;  %v7740_v45 = vld [vmem:[%s9161_s6 + $0x2e8] ss:$16 sps:$4 sm:$0xff]  }
  0xa1   : > { %5121 = vmatprep.subr.bf16.mxu0 %v7659_v46  ;;  %5613 = vmatprep.subr.bf16.mxu1 %v7661_v47  ;;  %v7745_v46 = vld [vmem:[%s9161_s6 + $0x304] ss:$16 sps:$4 sm:$0xff]   ;;  %v7748_v47 = vld [vmem:[%s9161_s6 + $0x30c] ss:$16 sps:$4 sm:$0xff]  }
  0xa4   : > { %5122 = vmatpush1.bf16.msra.mxu0 %v7663_v48  ;;  %5614 = vmatpush1.bf16.msra.mxu1 %v7664_v49  ;;  %v7743_v48 = vld [vmem:[%s9161_s6 + $0x300] ss:$16 sps:$4 sm:$0xff]   ;;  %v7746_v49 = vld [vmem:[%s9161_s6 + $0x308] ss:$16 sps:$4 sm:$0xff]  }
  0xa5   : > { %5123 = vmatprep.subr.bf16.mxu0 %v7665_v51  ;;  %5615 = vmatprep.subr.bf16.mxu1 %v7667_v52  ;;  %v7751_v51 = vld [vmem:[%s9161_s6 + $0x324] ss:$16 sps:$4 sm:$0xff]   ;;  %v7754_v52 = vld [vmem:[%s9161_s6 + $0x32c] ss:$16 sps:$4 sm:$0xff]  }
  0xa8   : > { %5124 = vmatpush1.bf16.msra.mxu0 %v7669_v54  ;;  %5616 = vmatpush1.bf16.msra.mxu1 %v7670_v56  ;;  %v7749_v54 = vld [vmem:[%s9161_s6 + $0x320] ss:$16 sps:$4 sm:$0xff]   ;;  %v7757_v56 = vld [vmem:[%s9161_s6 + $0x344] ss:$16 sps:$4 sm:$0xff]  }
  0xa9   : > { %5125 = vmatprep.subr.bf16.mxu0 %v7671_v57  ;;  %5617 = vmatprep.subr.bf16.mxu1 %v7673_v58  ;;  %v7760_v57 = vld [vmem:[%s9161_s6 + $0x34c] ss:$16 sps:$4 sm:$0xff]   ;;  %v7755_v58 = vld [vmem:[%s9161_s6 + $0x340] ss:$16 sps:$4 sm:$0xff]  }
  0xac   : > { %5126 = vmatpush1.bf16.msra.mxu0 %v7675_v60  ;;  %5618 = vmatpush1.bf16.msra.mxu1 %v7676_v62  ;;  %v7763_v60 = vld [vmem:[%s9161_s6 + $0x364] ss:$16 sps:$4 sm:$0xff]   ;;  %v7761_v62 = vld [vmem:[%s9161_s6 + $0x360] ss:$16 sps:$4 sm:$0xff]  }
  0xad   : > { %5127 = vmatprep.subr.bf16.mxu0 %v7677_v63  ;;  %5619 = vmatprep.subr.bf16.mxu1 %v7679_v0  ;;  %v7764_v63 = vld [vmem:[%s9161_s6 + $0x368] ss:$16 sps:$4 sm:$0xff]   ;;  %v7769_v0 = vld [vmem:[%s9161_s6 + $0x384] ss:$16 sps:$4 sm:$0xff]  }
  0xb0   : > { %5128 = vmatpush1.bf16.msra.mxu0 %v7681_v1  ;;  %5620 = vmatpush1.bf16.msra.mxu1 %v7682_v2  ;;  %v7772_v1 = vld [vmem:[%s9161_s6 + $0x38c] ss:$16 sps:$4 sm:$0xff]   ;;  %v7767_v2 = vld [vmem:[%s9161_s6 + $0x380] ss:$16 sps:$4 sm:$0xff]  }
  0xb1   : > { %5129 = vmatprep.subr.bf16.mxu0 %v7683_v3  ;;  %5621 = vmatprep.subr.bf16.mxu1 %v7685_v4  ;;  %v7770_v3 = vld [vmem:[%s9161_s6 + $0x388] ss:$16 sps:$4 sm:$0xff]   ;;  %v7775_v4 = vld [vmem:[%s9161_s6 + $0x3a4] ss:$16 sps:$4 sm:$0xff]  }
  0xb4   : > { %5130 = vmatpush1.bf16.msra.mxu0 %v7687_v5  ;;  %5622 = vmatpush1.bf16.msra.mxu1 %v7688_v6  ;;  %v7778_v5 = vld [vmem:[%s9161_s6 + $0x3ac] ss:$16 sps:$4 sm:$0xff]   ;;  %v7773_v6 = vld [vmem:[%s9161_s6 + $0x3a0] ss:$16 sps:$4 sm:$0xff]  }
  0xb5   : > { %5131 = vmatprep.subr.bf16.mxu0 %v7689_v7  ;;  %5623 = vmatprep.subr.bf16.mxu1 %v7691_v8  ;;  %v7776_v7 = vld [vmem:[%s9161_s6 + $0x3a8] ss:$16 sps:$4 sm:$0xff]   ;;  %v7781_v8 = vld [vmem:[%s9161_s6 + $0x3c4] ss:$16 sps:$4 sm:$0xff]  }
  0xb8   : > { %5132 = vmatpush1.bf16.msra.mxu0 %v7693_v9  ;;  %5624 = vmatpush1.bf16.msra.mxu1 %v7694_v10  ;;  %v7784_v9 = vld [vmem:[%s9161_s6 + $0x3cc] ss:$16 sps:$4 sm:$0xff]   ;;  %v1090_v10 = vcombine.high %v9224_v53, %v9224_v53  ;;  %v7788_v53 = vld [vmem:[%s9161_s6 + $0x3e8] ss:$16 sps:$4 sm:$0xff]  }
  0xb9   : > { %5142 = vmatprep.subr.bf16.mxu0 %v7697_v11  ;;  %5634 = vmatprep.subr.bf16.mxu1 %v7700_v12  ;;  %v7779_v11 = vld [vmem:[%s9161_s6 + $0x3c0] ss:$16 sps:$4 sm:$0xff]   ;;  %v7782_v12 = vld [vmem:[%s9161_s6 + $0x3c8] ss:$16 sps:$4 sm:$0xff]  }
  0xbb   : > { %5134 = vmatmul.mubr.bf16.vlgmr.msra.gmra.mrb[0].mxu0 %v9251_v14  ;;  %5626 = vmatmul.mubr.bf16.vlgmr.msra.gmra.mrb[0].mxu1 %v9251_v14 }
  0xbc   : > { %5143 = vmatpush1.bf16.msra.mxu0 %v7695_v13  ;;  %5635 = vmatpush1.bf16.msra.mxu1 %v7698_v15  ;;  %v7787_v13 = vld [vmem:[%s9161_s6 + $0x3e4] ss:$16 sps:$4 sm:$0xff]   ;;  %v7790_v15 = vld [vmem:[%s9161_s6 + $0x3ec] ss:$16 sps:$4 sm:$0xff]  }
  0xbd   : > { %5144 = vmatprep.subr.bf16.mxu0 %v7703_v16  ;;  %5636 = vmatprep.subr.bf16.mxu1 %v7706_v17  ;;  %v9317_v16 = vrot.slane %v1090_v10, %v9219_v50  ;;  %v7785_v17 = vld [vmem:[%s9161_s6 + $0x3e0] ss:$16 sps:$4 sm:$0xff]   ;;  %v7866_v10 = vld [vmem:[%s9161_s6 + $0x588] ss:$16 sps:$4 sm:$0xff]  }
  0xbe   : > { %5174 = vmatprep.mubr.bf16.mxu0 %v1137_v18  ;;  %5666 = vmatprep.mubr.bf16.mxu1 %v1137_v18  ;;  %v7793_v18 = vld [vmem:[%s9161_s6 + $0x404] ss:$16 sps:$4 sm:$0xff]  }
  0xc0   : > { %5145 = vmatpush1.bf16.msra.mxu0 %v7701_v19  ;;  %5637 = vmatpush1.bf16.msra.mxu1 %v7704_v20  ;;  %v7796_v19 = vld [vmem:[%s9161_s6 + $0x40c] ss:$16 sps:$4 sm:$0xff]   ;;  %v1106_v20 = vcombine.high %v9317_v16, %v9317_v16 }
  0xc1   : > { %5146 = vmatprep.subr.bf16.mxu0 %v7709_v21  ;;  %5638 = vmatprep.subr.bf16.mxu1 %v7712_v22  ;;  %v7791_v21 = vld [vmem:[%s9161_s6 + $0x400] ss:$16 sps:$4 sm:$0xff]   ;;  %v1135_v22 = vcombine.high %v9251_v14, %v9251_v14  ;;  %v7800_v14 = vld [vmem:[%s9161_s6 + $0x428] ss:$16 sps:$4 sm:$0xff]  }
  0xc4   : > { %5147 = vmatpush1.bf16.msra.mxu0 %v7707_v23  ;;  %5639 = vmatpush1.bf16.msra.mxu1 %v7710_v24  ;;  %v7794_v23 = vld [vmem:[%s9161_s6 + $0x408] ss:$16 sps:$4 sm:$0xff]   ;;  %v7799_v24 = vld [vmem:[%s9161_s6 + $0x424] ss:$16 sps:$4 sm:$0xff]  }
  0xc5   : > { %5148 = vmatprep.subr.bf16.mxu0 %v7715_v25  ;;  %5640 = vmatprep.subr.bf16.mxu1 %v7718_v26  ;;  %v7802_v25 = vld [vmem:[%s9161_s6 + $0x42c] ss:$16 sps:$4 sm:$0xff]   ;;  %v9332_v26 = vrot.slane %v1106_v20, %v9219_v50  ;;  %v7883_v20 = vld [vmem:[%s9161_s6 + $0x5e4] ss:$16 sps:$4 sm:$0xff]  }
  0xc8   : > { %5149 = vmatpush1.bf16.msra.mxu0 %v7713_v27  ;;  %5641 = vmatpush1.bf16.msra.mxu1 %v7716_v28  ;;  %v7797_v27 = vld [vmem:[%s9161_s6 + $0x420] ss:$16 sps:$4 sm:$0xff]   ;;  %v7805_v28 = vld [vmem:[%s9161_s6 + $0x444] ss:$16 sps:$4 sm:$0xff]  }
  0xc9   : > { %5150 = vmatprep.subr.bf16.mxu0 %v7721_v29  ;;  %5642 = vmatprep.subr.bf16.mxu1 %v7724_v30  ;;  %v7808_v29 = vld [vmem:[%s9161_s6 + $0x44c] ss:$16 sps:$4 sm:$0xff]   ;;  %v7803_v30 = vld [vmem:[%s9161_s6 + $0x440] ss:$16 sps:$4 sm:$0xff]  }
  0xcc   : > { %5151 = vmatpush1.bf16.msra.mxu0 %v7719_v31  ;;  %5643 = vmatpush1.bf16.msra.mxu1 %v7722_v32  ;;  %v7806_v31 = vld [vmem:[%s9161_s6 + $0x448] ss:$16 sps:$4 sm:$0xff]   ;;  %v7811_v32 = vld [vmem:[%s9161_s6 + $0x464] ss:$16 sps:$4 sm:$0xff]  }
  0xcd   : > { %5152 = vmatprep.subr.bf16.mxu0 %v7727_v33  ;;  %5644 = vmatprep.subr.bf16.mxu1 %v7730_v34  ;;  %v7814_v33 = vld [vmem:[%s9161_s6 + $0x46c] ss:$16 sps:$4 sm:$0xff]   ;;  %v7809_v34 = vld [vmem:[%s9161_s6 + $0x460] ss:$16 sps:$4 sm:$0xff]  }
  0xd0   : > { %5153 = vmatpush1.bf16.msra.mxu0 %v7725_v35  ;;  %5645 = vmatpush1.bf16.msra.mxu1 %v7728_v36  ;;  %v7812_v35 = vld [vmem:[%s9161_s6 + $0x468] ss:$16 sps:$4 sm:$0xff]   ;;  %v7817_v36 = vld [vmem:[%s9161_s6 + $0x484] ss:$16 sps:$4 sm:$0xff]  }
  0xd1   : > { %5154 = vmatprep.subr.bf16.mxu0 %v7733_v37  ;;  %5646 = vmatprep.subr.bf16.mxu1 %v7736_v38  ;;  %v7820_v37 = vld [vmem:[%s9161_s6 + $0x48c] ss:$16 sps:$4 sm:$0xff]   ;;  %v7815_v38 = vld [vmem:[%s9161_s6 + $0x480] ss:$16 sps:$4 sm:$0xff]  }
  0xd4   : > { %5155 = vmatpush1.bf16.msra.mxu0 %v7731_v39  ;;  %5647 = vmatpush1.bf16.msra.mxu1 %v7734_v40  ;;  %v7818_v39 = vld [vmem:[%s9161_s6 + $0x488] ss:$16 sps:$4 sm:$0xff]   ;;  %v7823_v40 = vld [vmem:[%s9161_s6 + $0x4a4] ss:$16 sps:$4 sm:$0xff]  }
  0xd5   : > { %5156 = vmatprep.subr.bf16.mxu0 %v7739_v41  ;;  %5648 = vmatprep.subr.bf16.mxu1 %v7742_v42  ;;  %v7826_v41 = vld [vmem:[%s9161_s6 + $0x4ac] ss:$16 sps:$4 sm:$0xff]   ;;  %v7821_v42 = vld [vmem:[%s9161_s6 + $0x4a0] ss:$16 sps:$4 sm:$0xff]  }
  0xd8   : > { %5157 = vmatpush1.bf16.msra.mxu0 %v7737_v43  ;;  %5649 = vmatpush1.bf16.msra.mxu1 %v7740_v45  ;;  %v7824_v43 = vld [vmem:[%s9161_s6 + $0x4a8] ss:$16 sps:$4 sm:$0xff]   ;;  %v7829_v45 = vld [vmem:[%s9161_s6 + $0x4c4] ss:$16 sps:$4 sm:$0xff]  }
  0xd9   : > { %5158 = vmatprep.subr.bf16.mxu0 %v7745_v46  ;;  %5650 = vmatprep.subr.bf16.mxu1 %v7748_v47  ;;  %v7832_v46 = vld [vmem:[%s9161_s6 + $0x4cc] ss:$16 sps:$4 sm:$0xff]   ;;  %v7827_v47 = vld [vmem:[%s9161_s6 + $0x4c0] ss:$16 sps:$4 sm:$0xff]  }
  0xdc   : > { %5159 = vmatpush1.bf16.msra.mxu0 %v7743_v48  ;;  %5651 = vmatpush1.bf16.msra.mxu1 %v7746_v49  ;;  %v7830_v48 = vld [vmem:[%s9161_s6 + $0x4c8] ss:$16 sps:$4 sm:$0xff]   ;;  %v7835_v49 = vld [vmem:[%s9161_s6 + $0x4e4] ss:$16 sps:$4 sm:$0xff]  }
  0xdd   : > { %5160 = vmatprep.subr.bf16.mxu0 %v7751_v51  ;;  %5652 = vmatprep.subr.bf16.mxu1 %v7754_v52  ;;  %v7838_v51 = vld [vmem:[%s9161_s6 + $0x4ec] ss:$16 sps:$4 sm:$0xff]   ;;  %v7833_v52 = vld [vmem:[%s9161_s6 + $0x4e0] ss:$16 sps:$4 sm:$0xff]  }
  0xe0   : > { %5161 = vmatpush1.bf16.msra.mxu0 %v7749_v54  ;;  %5653 = vmatpush1.bf16.msra.mxu1 %v7752_v55  ;;  %v7836_v54 = vld [vmem:[%s9161_s6 + $0x4e8] ss:$16 sps:$4 sm:$0xff]   ;;  %v7841_v55 = vld [vmem:[%s9161_s6 + $0x504] ss:$16 sps:$4 sm:$0xff]  }
  0xe1   : > { %5162 = vmatprep.subr.bf16.mxu0 %v7757_v56  ;;  %5654 = vmatprep.subr.bf16.mxu1 %v7760_v57  ;;  %v7844_v56 = vld [vmem:[%s9161_s6 + $0x50c] ss:$16 sps:$4 sm:$0xff]   ;;  %v7839_v57 = vld [vmem:[%s9161_s6 + $0x500] ss:$16 sps:$4 sm:$0xff]  }
  0xe4   : > { %5163 = vmatpush1.bf16.msra.mxu0 %v7755_v58  ;;  %5655 = vmatpush1.bf16.msra.mxu1 %v7758_v59  ;;  %v7842_v58 = vld [vmem:[%s9161_s6 + $0x508] ss:$16 sps:$4 sm:$0xff]   ;;  %v7847_v59 = vld [vmem:[%s9161_s6 + $0x524] ss:$16 sps:$4 sm:$0xff]  }
  0xe5   : > { %5164 = vmatprep.subr.bf16.mxu0 %v7763_v60  ;;  %5656 = vmatprep.subr.bf16.mxu1 %v7766_v61  ;;  %v7850_v60 = vld [vmem:[%s9161_s6 + $0x52c] ss:$16 sps:$4 sm:$0xff]   ;;  %v7845_v61 = vld [vmem:[%s9161_s6 + $0x520] ss:$16 sps:$4 sm:$0xff]  }
  0xe8   : > { %5165 = vmatpush1.bf16.msra.mxu0 %v7761_v62  ;;  %5657 = vmatpush1.bf16.msra.mxu1 %v7764_v63  ;;  %v7848_v62 = vld [vmem:[%s9161_s6 + $0x528] ss:$16 sps:$4 sm:$0xff]   ;;  %v7853_v63 = vld [vmem:[%s9161_s6 + $0x544] ss:$16 sps:$4 sm:$0xff]  }
  0xe9   : > { %5166 = vmatprep.subr.bf16.mxu0 %v7769_v0  ;;  %5658 = vmatprep.subr.bf16.mxu1 %v7772_v1  ;;  %v7856_v0 = vld [vmem:[%s9161_s6 + $0x54c] ss:$16 sps:$4 sm:$0xff]   ;;  %v7851_v1 = vld [vmem:[%s9161_s6 + $0x540] ss:$16 sps:$4 sm:$0xff]  }
  0xec   : > { %5167 = vmatpush1.bf16.msra.mxu0 %v7767_v2  ;;  %5659 = vmatpush1.bf16.msra.mxu1 %v7770_v3  ;;  %v7854_v2 = vld [vmem:[%s9161_s6 + $0x548] ss:$16 sps:$4 sm:$0xff]   ;;  %v7859_v3 = vld [vmem:[%s9161_s6 + $0x564] ss:$16 sps:$4 sm:$0xff]  }
  0xed   : > { %5168 = vmatprep.subr.bf16.mxu0 %v7775_v4  ;;  %5660 = vmatprep.subr.bf16.mxu1 %v7778_v5  ;;  %v7862_v4 = vld [vmem:[%s9161_s6 + $0x56c] ss:$16 sps:$4 sm:$0xff]   ;;  %v7857_v5 = vld [vmem:[%s9161_s6 + $0x560] ss:$16 sps:$4 sm:$0xff]  }
  0xf0   : > { %5169 = vmatpush1.bf16.msra.mxu0 %v7773_v6  ;;  %5661 = vmatpush1.bf16.msra.mxu1 %v7776_v7  ;;  %v7860_v6 = vld [vmem:[%s9161_s6 + $0x568] ss:$16 sps:$4 sm:$0xff]   ;;  %v7865_v7 = vld [vmem:[%s9161_s6 + $0x584] ss:$16 sps:$4 sm:$0xff]  }
  0xf1   : > { %5170 = vmatprep.subr.bf16.mxu0 %v7781_v8  ;;  %5662 = vmatprep.subr.bf16.mxu1 %v7784_v9  ;;  %v7868_v8 = vld [vmem:[%s9161_s6 + $0x58c] ss:$16 sps:$4 sm:$0xff]   ;;  %v7863_v9 = vld [vmem:[%s9161_s6 + $0x580] ss:$16 sps:$4 sm:$0xff]  }
  0xf4   : > { %5171 = vmatpush1.bf16.msra.mxu0 %v7779_v11  ;;  %5663 = vmatpush1.bf16.msra.mxu1 %v7782_v12  ;;  %v7871_v11 = vld [vmem:[%s9161_s6 + $0x5a4] ss:$16 sps:$4 sm:$0xff]   ;;  %v7874_v12 = vld [vmem:[%s9161_s6 + $0x5ac] ss:$16 sps:$4 sm:$0xff]  }
  0xf5   : > { %5172 = vmatprep.subr.bf16.mxu0 %v7787_v13  ;;  %5664 = vmatprep.subr.bf16.mxu1 %v7790_v15  ;;  %v7869_v13 = vld [vmem:[%s9161_s6 + $0x5a0] ss:$16 sps:$4 sm:$0xff]   ;;  %v7872_v15 = vld [vmem:[%s9161_s6 + $0x5a8] ss:$16 sps:$4 sm:$0xff]  }
  0xf8   : > { %5173 = vmatpush1.bf16.msra.mxu0 %v7785_v17  ;;  %5665 = vmatpush1.bf16.msra.mxu1 %v7788_v53  ;;  %v7877_v17 = vld [vmem:[%s9161_s6 + $0x5c4] ss:$16 sps:$4 sm:$0xff]   ;;  %v7880_v53 = vld [vmem:[%s9161_s6 + $0x5cc] ss:$16 sps:$4 sm:$0xff]  }
  0xf9   : > { %5183 = vmatprep.subr.bf16.mxu0 %v7793_v18  ;;  %5675 = vmatprep.subr.bf16.mxu1 %v7796_v19  ;;  %v7875_v18 = vld [vmem:[%s9161_s6 + $0x5c0] ss:$16 sps:$4 sm:$0xff]   ;;  %v7878_v19 = vld [vmem:[%s9161_s6 + $0x5c8] ss:$16 sps:$4 sm:$0xff]  }
  0xfb   : > { %5175 = vmatmul.mubr.bf16.vlgmr.msra.gmra.mrb[0].mxu0 %v1135_v22  ;;  %5667 = vmatmul.mubr.bf16.vlgmr.msra.gmra.mrb[0].mxu1 %v1135_v22  ;;  %v7881_v22 = vld [vmem:[%s9161_s6 + $0x5e0] ss:$16 sps:$4 sm:$0xff]  }
  0xfc   : > { %5184 = vmatpush1.bf16.msra.mxu0 %v7791_v21  ;;  %5676 = vmatpush1.bf16.msra.mxu1 %v7794_v23  ;;  %v7886_v21 = vld [vmem:[%s9161_s6 + $0x5ec] ss:$16 sps:$4 sm:$0xff]   ;;  %v7884_v23 = vld [vmem:[%s9161_s6 + $0x5e8] ss:$16 sps:$4 sm:$0xff]  }
  0xfd   : > { %5185 = vmatprep.subr.bf16.mxu0 %v7799_v24  ;;  %5677 = vmatprep.subr.bf16.mxu1 %v7802_v25  ;;  %v7890_v24 = vld [vmem:[%s9161_s6 + $0x604] ss:$16 sps:$4 sm:$0xff]   ;;  %v7893_v25 = vld [vmem:[%s9161_s6 + $0x60c] ss:$16 sps:$4 sm:$0xff]  }
  0xfe   : > { %5215 = vmatprep.mubr.bf16.mxu0 %v9332_v26  ;;  %5707 = vmatprep.mubr.bf16.mxu1 %v9332_v26 }
 0x100   : > { %5186 = vmatpush1.bf16.msra.mxu0 %v7797_v27  ;;  %5678 = vmatpush1.bf16.msra.mxu1 %v7800_v14  ;;  %v7888_v27 = vld [vmem:[%s9161_s6 + $0x600] ss:$16 sps:$4 sm:$0xff]   ;;  %v9399_v14 = vrot.slane %v9317_v16, %v9219_v50 }
 0x101   : > { %5187 = vmatprep.subr.bf16.mxu0 %v7805_v28  ;;  %5679 = vmatprep.subr.bf16.mxu1 %v7808_v29  ;;  %v7891_v28 = vld [vmem:[%s9161_s6 + $0x608] ss:$16 sps:$4 sm:$0xff]   ;;  %v7896_v29 = vld [vmem:[%s9161_s6 + $0x624] ss:$16 sps:$4 sm:$0xff]   ;;  %v7894_v16 = vld [vmem:[%s9161_s6 + $0x620] ss:$16 sps:$4 sm:$0xff]  }
 0x104   : > { %5188 = vmatpush1.bf16.msra.mxu0 %v7803_v30  ;;  %5680 = vmatpush1.bf16.msra.mxu1 %v7806_v31  ;;  %v7899_v30 = vld [vmem:[%s9161_s6 + $0x62c] ss:$16 sps:$4 sm:$0xff]   ;;  %v1138_v31 = vcombine.high %v9332_v26, %v9332_v26  ;;  %v7900_v26 = vld [vmem:[%s9161_s6 + $0x640] ss:$16 sps:$4 sm:$0xff]  }
 0x105   : > { %5189 = vmatprep.subr.bf16.mxu0 %v7811_v32  ;;  %5681 = vmatprep.subr.bf16.mxu1 %v7814_v33  ;;  %v7897_v32 = vld [vmem:[%s9161_s6 + $0x628] ss:$16 sps:$4 sm:$0xff]   ;;  %v7902_v33 = vld [vmem:[%s9161_s6 + $0x644] ss:$16 sps:$4 sm:$0xff]  }
 0x108   : > { %5190 = vmatpush1.bf16.msra.mxu0 %v7809_v34  ;;  %5682 = vmatpush1.bf16.msra.mxu1 %v7812_v35  ;;  %v7905_v34 = vld [vmem:[%s9161_s6 + $0x64c] ss:$16 sps:$4 sm:$0xff]   ;;  %v7903_v35 = vld [vmem:[%s9161_s6 + $0x648] ss:$16 sps:$4 sm:$0xff]  }
 0x109   : > { %5191 = vmatprep.subr.bf16.mxu0 %v7817_v36  ;;  %5683 = vmatprep.subr.bf16.mxu1 %v7820_v37  ;;  %v7908_v36 = vld [vmem:[%s9161_s6 + $0x664] ss:$16 sps:$4 sm:$0xff]   ;;  %v7911_v37 = vld [vmem:[%s9161_s6 + $0x66c] ss:$16 sps:$4 sm:$0xff]  }
 0x10c   : > { %5192 = vmatpush1.bf16.msra.mxu0 %v7815_v38  ;;  %5684 = vmatpush1.bf16.msra.mxu1 %v7818_v39  ;;  %v7906_v38 = vld [vmem:[%s9161_s6 + $0x660] ss:$16 sps:$4 sm:$0xff]   ;;  %v7909_v39 = vld [vmem:[%s9161_s6 + $0x668] ss:$16 sps:$4 sm:$0xff]  }
 0x10d   : > { %5193 = vmatprep.subr.bf16.mxu0 %v7823_v40  ;;  %5685 = vmatprep.subr.bf16.mxu1 %v7826_v41  ;;  %v7914_v40 = vld [vmem:[%s9161_s6 + $0x684] ss:$16 sps:$4 sm:$0xff]   ;;  %v7917_v41 = vld [vmem:[%s9161_s6 + $0x68c] ss:$16 sps:$4 sm:$0xff]  }
 0x110   : > { %5194 = vmatpush1.bf16.msra.mxu0 %v7821_v42  ;;  %5686 = vmatpush1.bf16.msra.mxu1 %v7824_v43  ;;  %v7912_v42 = vld [vmem:[%s9161_s6 + $0x680] ss:$16 sps:$4 sm:$0xff]   ;;  %v7915_v43 = vld [vmem:[%s9161_s6 + $0x688] ss:$16 sps:$4 sm:$0xff]  }
 0x111   : > { %5195 = vmatprep.subr.bf16.mxu0 %v7829_v45  ;;  %5687 = vmatprep.subr.bf16.mxu1 %v7832_v46  ;;  %v7920_v45 = vld [vmem:[%s9161_s6 + $0x6a4] ss:$16 sps:$4 sm:$0xff]   ;;  %v7923_v46 = vld [vmem:[%s9161_s6 + $0x6ac] ss:$16 sps:$4 sm:$0xff]  }
 0x114   : > { %5196 = vmatpush1.bf16.msra.mxu0 %v7827_v47  ;;  %5688 = vmatpush1.bf16.msra.mxu1 %v7830_v48  ;;  %v7918_v47 = vld [vmem:[%s9161_s6 + $0x6a0] ss:$16 sps:$4 sm:$0xff]   ;;  %v7921_v48 = vld [vmem:[%s9161_s6 + $0x6a8] ss:$16 sps:$4 sm:$0xff]  }
 0x115   : > { %5197 = vmatprep.subr.bf16.mxu0 %v7835_v49  ;;  %5689 = vmatprep.subr.bf16.mxu1 %v7838_v51  ;;  %v7926_v49 = vld [vmem:[%s9161_s6 + $0x6c4] ss:$16 sps:$4 sm:$0xff]   ;;  %v7929_v51 = vld [vmem:[%s9161_s6 + $0x6cc] ss:$16 sps:$4 sm:$0xff]  }
 0x118   : > { %5198 = vmatpush1.bf16.msra.mxu0 %v7833_v52  ;;  %5690 = vmatpush1.bf16.msra.mxu1 %v7836_v54  ;;  %v7924_v52 = vld [vmem:[%s9161_s6 + $0x6c0] ss:$16 sps:$4 sm:$0xff]   ;;  %v7927_v54 = vld [vmem:[%s9161_s6 + $0x6c8] ss:$16 sps:$4 sm:$0xff]  }
 0x119   : > { %5199 = vmatprep.subr.bf16.mxu0 %v7841_v55  ;;  %5691 = vmatprep.subr.bf16.mxu1 %v7844_v56  ;;  %v7932_v55 = vld [vmem:[%s9161_s6 + $0x6e4] ss:$16 sps:$4 sm:$0xff]   ;;  %v7935_v56 = vld [vmem:[%s9161_s6 + $0x6ec] ss:$16 sps:$4 sm:$0xff]  }
 0x11c   : > { %5200 = vmatpush1.bf16.msra.mxu0 %v7839_v57  ;;  %5692 = vmatpush1.bf16.msra.mxu1 %v7842_v58  ;;  %v7930_v57 = vld [vmem:[%s9161_s6 + $0x6e0] ss:$16 sps:$4 sm:$0xff]   ;;  %v7933_v58 = vld [vmem:[%s9161_s6 + $0x6e8] ss:$16 sps:$4 sm:$0xff]  }
 0x11d   : > { %5201 = vmatprep.subr.bf16.mxu0 %v7847_v59  ;;  %5693 = vmatprep.subr.bf16.mxu1 %v7850_v60  ;;  %v7938_v59 = vld [vmem:[%s9161_s6 + $0x704] ss:$16 sps:$4 sm:$0xff]   ;;  %v7941_v60 = vld [vmem:[%s9161_s6 + $0x70c] ss:$16 sps:$4 sm:$0xff]  }
 0x120   : > { %5202 = vmatpush1.bf16.msra.mxu0 %v7845_v61  ;;  %5694 = vmatpush1.bf16.msra.mxu1 %v7848_v62  ;;  %v7936_v61 = vld [vmem:[%s9161_s6 + $0x700] ss:$16 sps:$4 sm:$0xff]   ;;  %v7939_v62 = vld [vmem:[%s9161_s6 + $0x708] ss:$16 sps:$4 sm:$0xff]  }
 0x121   : > { %5203 = vmatprep.subr.bf16.mxu0 %v7853_v63  ;;  %5695 = vmatprep.subr.bf16.mxu1 %v7856_v0  ;;  %v7944_v63 = vld [vmem:[%s9161_s6 + $0x724] ss:$16 sps:$4 sm:$0xff]   ;;  %v7947_v0 = vld [vmem:[%s9161_s6 + $0x72c] ss:$16 sps:$4 sm:$0xff]  }
 0x124   : > { %5204 = vmatpush1.bf16.msra.mxu0 %v7851_v1  ;;  %5696 = vmatpush1.bf16.msra.mxu1 %v7854_v2  ;;  %v7942_v1 = vld [vmem:[%s9161_s6 + $0x720] ss:$16 sps:$4 sm:$0xff]   ;;  %v7945_v2 = vld [vmem:[%s9161_s6 + $0x728] ss:$16 sps:$4 sm:$0xff]  }
 0x125   : > { %5205 = vmatprep.subr.bf16.mxu0 %v7859_v3  ;;  %5697 = vmatprep.subr.bf16.mxu1 %v7862_v4  ;;  %v7950_v3 = vld [vmem:[%s9161_s6 + $0x744] ss:$16 sps:$4 sm:$0xff]   ;;  %v7953_v4 = vld [vmem:[%s9161_s6 + $0x74c] ss:$16 sps:$4 sm:$0xff]  }
 0x128   : > { %5206 = vmatpush1.bf16.msra.mxu0 %v7857_v5  ;;  %5698 = vmatpush1.bf16.msra.mxu1 %v7860_v6  ;;  %v7948_v5 = vld [vmem:[%s9161_s6 + $0x740] ss:$16 sps:$4 sm:$0xff]   ;;  %v7951_v6 = vld [vmem:[%s9161_s6 + $0x748] ss:$16 sps:$4 sm:$0xff]  }
 0x129   : > { %5207 = vmatprep.subr.bf16.mxu0 %v7865_v7  ;;  %5699 = vmatprep.subr.bf16.mxu1 %v7868_v8  ;;  %v7956_v7 = vld [vmem:[%s9161_s6 + $0x764] ss:$16 sps:$4 sm:$0xff]   ;;  %v7959_v8 = vld [vmem:[%s9161_s6 + $0x76c] ss:$16 sps:$4 sm:$0xff]  }
 0x12c   : > { %5208 = vmatpush1.bf16.msra.mxu0 %v7863_v9  ;;  %5700 = vmatpush1.bf16.msra.mxu1 %v7866_v10  ;;  %v7954_v9 = vld [vmem:[%s9161_s6 + $0x760] ss:$16 sps:$4 sm:$0xff]   ;;  %v7957_v10 = vld [vmem:[%s9161_s6 + $0x768] ss:$16 sps:$4 sm:$0xff]  }
 0x12d   : > { %5209 = vmatprep.subr.bf16.mxu0 %v7871_v11  ;;  %5701 = vmatprep.subr.bf16.mxu1 %v7874_v12  ;;  %v7962_v11 = vld [vmem:[%s9161_s6 + $0x784] ss:$16 sps:$4 sm:$0xff]   ;;  %v7965_v12 = vld [vmem:[%s9161_s6 + $0x78c] ss:$16 sps:$4 sm:$0xff]  }
 0x130   : > { %5210 = vmatpush1.bf16.msra.mxu0 %v7869_v13  ;;  %5702 = vmatpush1.bf16.msra.mxu1 %v7872_v15  ;;  %v7960_v13 = vld [vmem:[%s9161_s6 + $0x780] ss:$16 sps:$4 sm:$0xff]   ;;  %v7963_v15 = vld [vmem:[%s9161_s6 + $0x788] ss:$16 sps:$4 sm:$0xff]  }
 0x131   : > { %5211 = vmatprep.subr.bf16.mxu0 %v7877_v17  ;;  %5703 = vmatprep.subr.bf16.mxu1 %v7880_v53  ;;  %v7968_v17 = vld [vmem:[%s9161_s6 + $0x7a4] ss:$16 sps:$4 sm:$0xff]   ;;  %v7971_v53 = vld [vmem:[%s9161_s6 + $0x7ac] ss:$16 sps:$4 sm:$0xff]  }
 0x134   : > { %5212 = vmatpush1.bf16.msra.mxu0 %v7875_v18  ;;  %5704 = vmatpush1.bf16.msra.mxu1 %v7878_v19  ;;  %v7966_v18 = vld [vmem:[%s9161_s6 + $0x7a0] ss:$16 sps:$4 sm:$0xff]   ;;  %v7969_v19 = vld [vmem:[%s9161_s6 + $0x7a8] ss:$16 sps:$4 sm:$0xff]  }
 0x135   : > { %5213 = vmatprep.subr.bf16.mxu0 %v7883_v20  ;;  %5705 = vmatprep.subr.bf16.mxu1 %v7886_v21  ;;  %v7974_v20 = vld [vmem:[%s9161_s6 + $0x7c4] ss:$16 sps:$4 sm:$0xff]   ;;  %v7977_v21 = vld [vmem:[%s9161_s6 + $0x7cc] ss:$16 sps:$4 sm:$0xff]  }
 0x138   : > { %5214 = vmatpush1.bf16.msra.mxu0 %v7881_v22  ;;  %5706 = vmatpush1.bf16.msra.mxu1 %v7884_v23  ;;  %v9461_v22 = vld.sshfl [vmem:[%s9154_s10 + $0x8] sm:$0xff pattern:$0x75316420] }
 0x139   : > { %5224 = vmatprep.subr.bf16.mxu0 %v7890_v24  ;;  %5716 = vmatprep.subr.bf16.mxu1 %v7893_v25  ;;  %v7972_v23 = vld [vmem:[%s9161_s6 + $0x7c0] ss:$16 sps:$4 sm:$0xff]   ;;  %v7975_v24 = vld [vmem:[%s9161_s6 + $0x7c8] ss:$16 sps:$4 sm:$0xff]   ;;  %v7980_v25 = vld [vmem:[%s9161_s6 + $0x7e4] ss:$16 sps:$4 sm:$0xff]  }
 0x13b   : > { %5216 = vmatmul.mubr.bf16.vlgmr.msra.gmra.mrb[0].mxu0 %v9399_v14  ;;  %5708 = vmatmul.mubr.bf16.vlgmr.msra.gmra.mrb[0].mxu1 %v9399_v14 }
 0x13c   : > { %5225 = vmatpush1.bf16.msra.mxu0 %v7888_v27  ;;  %5717 = vmatpush1.bf16.msra.mxu1 %v7891_v28  ;;  %v7983_v27 = vld [vmem:[%s9161_s6 + $0x7ec] ss:$16 sps:$4 sm:$0xff]   ;;  %v7978_v28 = vld [vmem:[%s9161_s6 + $0x7e0] ss:$16 sps:$4 sm:$0xff]  }
 0x13d   : > { %5226 = vmatprep.subr.bf16.mxu0 %v7896_v29  ;;  %5718 = vmatprep.subr.bf16.mxu1 %v7899_v30  ;;  %v7981_v29 = vld [vmem:[%s9161_s6 + $0x7e8] ss:$16 sps:$4 sm:$0xff]   ;;  %v7986_v30 = vld [vmem:[%s9161_s6 + $0x804] ss:$16 sps:$4 sm:$0xff]  }
 0x13e   : > { %5256 = vmatprep.mubr.bf16.mxu0 %v1138_v31  ;;  %5748 = vmatprep.mubr.bf16.mxu1 %v1138_v31  ;;  %v7989_v31 = vld [vmem:[%s9161_s6 + $0x80c] ss:$16 sps:$4 sm:$0xff]  }
 0x140   : > { %5227 = vmatpush1.bf16.msra.mxu0 %v7894_v16  ;;  %5719 = vmatpush1.bf16.msra.mxu1 %v7897_v32  ;;  %v1154_v16 = vcombine.high %v9461_v22, %v9461_v22  ;;  %v1136_v32 = vcombine.high %v9399_v14, %v9399_v14  ;;  %v7990_v14 = vld [vmem:[%s9161_s6 + $0x820] ss:$16 sps:$4 sm:$0xff]  }
 0x141   : > { %5228 = vmatprep.subr.bf16.mxu0 %v7902_v33  ;;  %5720 = vmatprep.subr.bf16.mxu1 %v7905_v34  ;;  %v7984_v33 = vld [vmem:[%s9161_s6 + $0x800] ss:$16 sps:$4 sm:$0xff]   ;;  %v7987_v34 = vld [vmem:[%s9161_s6 + $0x808] ss:$16 sps:$4 sm:$0xff]  }
 0x144   : > { %5229 = vmatpush1.bf16.msra.mxu0 %v7900_v26  ;;  %5721 = vmatpush1.bf16.msra.mxu1 %v7903_v35  ;;  %v7992_v26 = vld [vmem:[%s9161_s6 + $0x824] ss:$16 sps:$4 sm:$0xff]   ;;  %v7995_v35 = vld [vmem:[%s9161_s6 + $0x82c] ss:$16 sps:$4 sm:$0xff]  }
 0x145   : > { %5230 = vmatprep.subr.bf16.mxu0 %v7908_v36  ;;  %5722 = vmatprep.subr.bf16.mxu1 %v7911_v37  ;;  %v9480_v36 = vrot.slane %v1154_v16, %v9219_v50  ;;  %v7993_v37 = vld [vmem:[%s9161_s6 + $0x828] ss:$16 sps:$4 sm:$0xff]   ;;  %v8076_v16 = vld [vmem:[%s9161_s6 + $0x9e4] ss:$16 sps:$4 sm:$0xff]  }
 0x148   : > { %5231 = vmatpush1.bf16.msra.mxu0 %v7906_v38  ;;  %5723 = vmatpush1.bf16.msra.mxu1 %v7909_v39  ;;  %v7998_v38 = vld [vmem:[%s9161_s6 + $0x844] ss:$16 sps:$4 sm:$0xff]   ;;  %v8001_v39 = vld [vmem:[%s9161_s6 + $0x84c] ss:$16 sps:$4 sm:$0xff]  }
 0x149   : > { %5232 = vmatprep.subr.bf16.mxu0 %v7914_v40  ;;  %5724 = vmatprep.subr.bf16.mxu1 %v7917_v41  ;;  %v7996_v40 = vld [vmem:[%s9161_s6 + $0x840] ss:$16 sps:$4 sm:$0xff]   ;;  %v7999_v41 = vld [vmem:[%s9161_s6 + $0x848] ss:$16 sps:$4 sm:$0xff]  }
 0x14c   : > { %5233 = vmatpush1.bf16.msra.mxu0 %v7912_v42  ;;  %5725 = vmatpush1.bf16.msra.mxu1 %v7915_v43  ;;  %v8004_v42 = vld [vmem:[%s9161_s6 + $0x864] ss:$16 sps:$4 sm:$0xff]   ;;  %v8007_v43 = vld [vmem:[%s9161_s6 + $0x86c] ss:$16 sps:$4 sm:$0xff]  }
 0x14d   : > { %5234 = vmatprep.subr.bf16.mxu0 %v7920_v45  ;;  %5726 = vmatprep.subr.bf16.mxu1 %v7923_v46  ;;  %v8002_v45 = vld [vmem:[%s9161_s6 + $0x860] ss:$16 sps:$4 sm:$0xff]   ;;  %v8005_v46 = vld [vmem:[%s9161_s6 + $0x868] ss:$16 sps:$4 sm:$0xff]  }
 0x150   : > { %5235 = vmatpush1.bf16.msra.mxu0 %v7918_v47  ;;  %5727 = vmatpush1.bf16.msra.mxu1 %v7921_v48  ;;  %v8010_v47 = vld [vmem:[%s9161_s6 + $0x884] ss:$16 sps:$4 sm:$0xff]   ;;  %v8013_v48 = vld [vmem:[%s9161_s6 + $0x88c] ss:$16 sps:$4 sm:$0xff]  }
 0x151   : > { %5236 = vmatprep.subr.bf16.mxu0 %v7926_v49  ;;  %5728 = vmatprep.subr.bf16.mxu1 %v7929_v51  ;;  %v8008_v49 = vld [vmem:[%s9161_s6 + $0x880] ss:$16 sps:$4 sm:$0xff]   ;;  %v8011_v51 = vld [vmem:[%s9161_s6 + $0x888] ss:$16 sps:$4 sm:$0xff]  }
 0x154   : > { %5237 = vmatpush1.bf16.msra.mxu0 %v7924_v52  ;;  %5729 = vmatpush1.bf16.msra.mxu1 %v7927_v54  ;;  %v8016_v52 = vld [vmem:[%s9161_s6 + $0x8a4] ss:$16 sps:$4 sm:$0xff]   ;;  %v8019_v54 = vld [vmem:[%s9161_s6 + $0x8ac] ss:$16 sps:$4 sm:$0xff]  }
 0x155   : > { %5238 = vmatprep.subr.bf16.mxu0 %v7932_v55  ;;  %5730 = vmatprep.subr.bf16.mxu1 %v7935_v56  ;;  %v8014_v55 = vld [vmem:[%s9161_s6 + $0x8a0] ss:$16 sps:$4 sm:$0xff]   ;;  %v8017_v56 = vld [vmem:[%s9161_s6 + $0x8a8] ss:$16 sps:$4 sm:$0xff]  }
 0x158   : > { %5239 = vmatpush1.bf16.msra.mxu0 %v7930_v57  ;;  %5731 = vmatpush1.bf16.msra.mxu1 %v7933_v58  ;;  %v8022_v57 = vld [vmem:[%s9161_s6 + $0x8c4] ss:$16 sps:$4 sm:$0xff]   ;;  %v8025_v58 = vld [vmem:[%s9161_s6 + $0x8cc] ss:$16 sps:$4 sm:$0xff]  }
 0x159   : > { %5240 = vmatprep.subr.bf16.mxu0 %v7938_v59  ;;  %5732 = vmatprep.subr.bf16.mxu1 %v7941_v60  ;;  %v8020_v59 = vld [vmem:[%s9161_s6 + $0x8c0] ss:$16 sps:$4 sm:$0xff]   ;;  %v8023_v60 = vld [vmem:[%s9161_s6 + $0x8c8] ss:$16 sps:$4 sm:$0xff]  }
 0x15c   : > { %5241 = vmatpush1.bf16.msra.mxu0 %v7936_v61  ;;  %5733 = vmatpush1.bf16.msra.mxu1 %v7939_v62  ;;  %v8028_v61 = vld [vmem:[%s9161_s6 + $0x8e4] ss:$16 sps:$4 sm:$0xff]   ;;  %v8031_v62 = vld [vmem:[%s9161_s6 + $0x8ec] ss:$16 sps:$4 sm:$0xff]  }
 0x15d   : > { %5242 = vmatprep.subr.bf16.mxu0 %v7944_v63  ;;  %5734 = vmatprep.subr.bf16.mxu1 %v7947_v0  ;;  %v8026_v63 = vld [vmem:[%s9161_s6 + $0x8e0] ss:$16 sps:$4 sm:$0xff]   ;;  %v8029_v0 = vld [vmem:[%s9161_s6 + $0x8e8] ss:$16 sps:$4 sm:$0xff]  }
 0x160   : > { %5243 = vmatpush1.bf16.msra.mxu0 %v7942_v1  ;;  %5735 = vmatpush1.bf16.msra.mxu1 %v7945_v2  ;;  %v8034_v1 = vld [vmem:[%s9161_s6 + $0x904] ss:$16 sps:$4 sm:$0xff]   ;;  %v8037_v2 = vld [vmem:[%s9161_s6 + $0x90c] ss:$16 sps:$4 sm:$0xff]  }
 0x161   : > { %5244 = vmatprep.subr.bf16.mxu0 %v7950_v3  ;;  %5736 = vmatprep.subr.bf16.mxu1 %v7953_v4  ;;  %v8032_v3 = vld [vmem:[%s9161_s6 + $0x900] ss:$16 sps:$4 sm:$0xff]   ;;  %v8035_v4 = vld [vmem:[%s9161_s6 + $0x908] ss:$16 sps:$4 sm:$0xff]  }
 0x164   : > { %5245 = vmatpush1.bf16.msra.mxu0 %v7948_v5  ;;  %5737 = vmatpush1.bf16.msra.mxu1 %v7951_v6  ;;  %v8040_v5 = vld [vmem:[%s9161_s6 + $0x924] ss:$16 sps:$4 sm:$0xff]   ;;  %v8043_v6 = vld [vmem:[%s9161_s6 + $0x92c] ss:$16 sps:$4 sm:$0xff]  }
 0x165   : > { %5246 = vmatprep.subr.bf16.mxu0 %v7956_v7  ;;  %5738 = vmatprep.subr.bf16.mxu1 %v7959_v8  ;;  %v8038_v7 = vld [vmem:[%s9161_s6 + $0x920] ss:$16 sps:$4 sm:$0xff]   ;;  %v8041_v8 = vld [vmem:[%s9161_s6 + $0x928] ss:$16 sps:$4 sm:$0xff]  }
 0x168   : > { %5247 = vmatpush1.bf16.msra.mxu0 %v7954_v9  ;;  %5739 = vmatpush1.bf16.msra.mxu1 %v7957_v10  ;;  %v8046_v9 = vld [vmem:[%s9161_s6 + $0x944] ss:$16 sps:$4 sm:$0xff]   ;;  %v8049_v10 = vld [vmem:[%s9161_s6 + $0x94c] ss:$16 sps:$4 sm:$0xff]  }
 0x169   : > { %5248 = vmatprep.subr.bf16.mxu0 %v7962_v11  ;;  %5740 = vmatprep.subr.bf16.mxu1 %v7965_v12  ;;  %v8044_v11 = vld [vmem:[%s9161_s6 + $0x940] ss:$16 sps:$4 sm:$0xff]   ;;  %v8047_v12 = vld [vmem:[%s9161_s6 + $0x948] ss:$16 sps:$4 sm:$0xff]  }
 0x16c   : > { %5249 = vmatpush1.bf16.msra.mxu0 %v7960_v13  ;;  %5741 = vmatpush1.bf16.msra.mxu1 %v7963_v15  ;;  %v8052_v13 = vld [vmem:[%s9161_s6 + $0x964] ss:$16 sps:$4 sm:$0xff]   ;;  %v8055_v15 = vld [vmem:[%s9161_s6 + $0x96c] ss:$16 sps:$4 sm:$0xff]  }
 0x16d   : > { %5250 = vmatprep.subr.bf16.mxu0 %v7968_v17  ;;  %5742 = vmatprep.subr.bf16.mxu1 %v7971_v53  ;;  %v8050_v17 = vld [vmem:[%s9161_s6 + $0x960] ss:$16 sps:$4 sm:$0xff]   ;;  %v8053_v53 = vld [vmem:[%s9161_s6 + $0x968] ss:$16 sps:$4 sm:$0xff]  }
 0x170   : > { %5251 = vmatpush1.bf16.msra.mxu0 %v7966_v18  ;;  %5743 = vmatpush1.bf16.msra.mxu1 %v7969_v19  ;;  %v8058_v18 = vld [vmem:[%s9161_s6 + $0x984] ss:$16 sps:$4 sm:$0xff]   ;;  %v8061_v19 = vld [vmem:[%s9161_s6 + $0x98c] ss:$16 sps:$4 sm:$0xff]  }
 0x171   : > { %5252 = vmatprep.subr.bf16.mxu0 %v7974_v20  ;;  %5744 = vmatprep.subr.bf16.mxu1 %v7977_v21  ;;  %v8056_v20 = vld [vmem:[%s9161_s6 + $0x980] ss:$16 sps:$4 sm:$0xff]   ;;  %v8059_v21 = vld [vmem:[%s9161_s6 + $0x988] ss:$16 sps:$4 sm:$0xff]  }
 0x174   : > { %5253 = vmatpush1.bf16.msra.mxu0 %v7972_v23  ;;  %5745 = vmatpush1.bf16.msra.mxu1 %v7975_v24  ;;  %v8064_v23 = vld [vmem:[%s9161_s6 + $0x9a4] ss:$16 sps:$4 sm:$0xff]   ;;  %v8067_v24 = vld [vmem:[%s9161_s6 + $0x9ac] ss:$16 sps:$4 sm:$0xff]  }
 0x175   : > { %5254 = vmatprep.subr.bf16.mxu0 %v7980_v25  ;;  %5746 = vmatprep.subr.bf16.mxu1 %v7983_v27  ;;  %v8062_v25 = vld [vmem:[%s9161_s6 + $0x9a0] ss:$16 sps:$4 sm:$0xff]   ;;  %v8065_v27 = vld [vmem:[%s9161_s6 + $0x9a8] ss:$16 sps:$4 sm:$0xff]  }
 0x178   : > { %5255 = vmatpush1.bf16.msra.mxu0 %v7978_v28  ;;  %5747 = vmatpush1.bf16.msra.mxu1 %v7981_v29  ;;  %v8070_v28 = vld [vmem:[%s9161_s6 + $0x9c4] ss:$16 sps:$4 sm:$0xff]   ;;  %v8073_v29 = vld [vmem:[%s9161_s6 + $0x9cc] ss:$16 sps:$4 sm:$0xff]  }
 0x179   : > { %5265 = vmatprep.subr.bf16.mxu0 %v7986_v30  ;;  %5757 = vmatprep.subr.bf16.mxu1 %v7989_v31  ;;  %v8068_v30 = vld [vmem:[%s9161_s6 + $0x9c0] ss:$16 sps:$4 sm:$0xff]   ;;  %v8071_v31 = vld [vmem:[%s9161_s6 + $0x9c8] ss:$16 sps:$4 sm:$0xff]  }
 0x17b   : > { %5257 = vmatmul.mubr.bf16.vlgmr.msra.gmra.mrb[0].mxu0 %v1136_v32  ;;  %5749 = vmatmul.mubr.bf16.vlgmr.msra.gmra.mrb[0].mxu1 %v1136_v32  ;;  %v8079_v32 = vld [vmem:[%s9161_s6 + $0x9ec] ss:$16 sps:$4 sm:$0xff]  }
 0x17c   : > { %5266 = vmatpush1.bf16.msra.mxu0 %v7984_v33  ;;  %5758 = vmatpush1.bf16.msra.mxu1 %v7987_v34  ;;  %v8074_v33 = vld [vmem:[%s9161_s6 + $0x9e0] ss:$16 sps:$4 sm:$0xff]   ;;  %v8077_v34 = vld [vmem:[%s9161_s6 + $0x9e8] ss:$16 sps:$4 sm:$0xff]  }
 0x17d   : > { %5267 = vmatprep.subr.bf16.mxu0 %v7992_v26  ;;  %5759 = vmatprep.subr.bf16.mxu1 %v7995_v35  ;;  %v8082_v26 = vld [vmem:[%s9161_s6 + $0xa04] ss:$16 sps:$4 sm:$0xff]   ;;  %v8085_v35 = vld [vmem:[%s9161_s6 + $0xa0c] ss:$16 sps:$4 sm:$0xff]  }
 0x17e   : > { %5297 = vmatprep.mubr.bf16.mxu0 %v9480_v36  ;;  %5789 = vmatprep.mubr.bf16.mxu1 %v9480_v36 }
 0x180   : > { %5268 = vmatpush1.bf16.msra.mxu0 %v7990_v14  ;;  %5760 = vmatpush1.bf16.msra.mxu1 %v7993_v37  ;;  %v9546_v14 = vrot.slane %v9461_v22, %v9219_v50  ;;  %v8080_v37 = vld [vmem:[%s9161_s6 + $0xa00] ss:$16 sps:$4 sm:$0xff]  }
 0x181   : > { %5269 = vmatprep.subr.bf16.mxu0 %v7998_v38  ;;  %5761 = vmatprep.subr.bf16.mxu1 %v8001_v39  ;;  %v8083_v38 = vld [vmem:[%s9161_s6 + $0xa08] ss:$16 sps:$4 sm:$0xff]   ;;  %v8088_v39 = vld [vmem:[%s9161_s6 + $0xa24] ss:$16 sps:$4 sm:$0xff]   ;;  %v8086_v22 = vld [vmem:[%s9161_s6 + $0xa20] ss:$16 sps:$4 sm:$0xff]  }
 0x184   : > { %5270 = vmatpush1.bf16.msra.mxu0 %v7996_v40  ;;  %5762 = vmatpush1.bf16.msra.mxu1 %v7999_v41  ;;  %v8091_v40 = vld [vmem:[%s9161_s6 + $0xa2c] ss:$16 sps:$4 sm:$0xff]   ;;  %v1186_v41 = vcombine.high %v9480_v36, %v9480_v36  ;;  %v8092_v36 = vld [vmem:[%s9161_s6 + $0xa40] ss:$16 sps:$4 sm:$0xff]  }
 0x185   : > { %5271 = vmatprep.subr.bf16.mxu0 %v8004_v42  ;;  %5763 = vmatprep.subr.bf16.mxu1 %v8007_v43  ;;  %v8089_v42 = vld [vmem:[%s9161_s6 + $0xa28] ss:$16 sps:$4 sm:$0xff]   ;;  %v8094_v43 = vld [vmem:[%s9161_s6 + $0xa44] ss:$16 sps:$4 sm:$0xff]  }
 0x188   : > { %5272 = vmatpush1.bf16.msra.mxu0 %v8002_v45  ;;  %5764 = vmatpush1.bf16.msra.mxu1 %v8005_v46  ;;  %v8097_v45 = vld [vmem:[%s9161_s6 + $0xa4c] ss:$16 sps:$4 sm:$0xff]   ;;  %v8095_v46 = vld [vmem:[%s9161_s6 + $0xa48] ss:$16 sps:$4 sm:$0xff]  }
 0x189   : > { %5273 = vmatprep.subr.bf16.mxu0 %v8010_v47  ;;  %5765 = vmatprep.subr.bf16.mxu1 %v8013_v48  ;;  %v8100_v47 = vld [vmem:[%s9161_s6 + $0xa64] ss:$16 sps:$4 sm:$0xff]   ;;  %v8103_v48 = vld [vmem:[%s9161_s6 + $0xa6c] ss:$16 sps:$4 sm:$0xff]  }
 0x18c   : > { %5274 = vmatpush1.bf16.msra.mxu0 %v8008_v49  ;;  %5766 = vmatpush1.bf16.msra.mxu1 %v8011_v51  ;;  %v8098_v49 = vld [vmem:[%s9161_s6 + $0xa60] ss:$16 sps:$4 sm:$0xff]   ;;  %v8101_v51 = vld [vmem:[%s9161_s6 + $0xa68] ss:$16 sps:$4 sm:$0xff]  }
 0x18d   : > { %5275 = vmatprep.subr.bf16.mxu0 %v8016_v52  ;;  %5767 = vmatprep.subr.bf16.mxu1 %v8019_v54  ;;  %v8106_v52 = vld [vmem:[%s9161_s6 + $0xa84] ss:$16 sps:$4 sm:$0xff]   ;;  %v8109_v54 = vld [vmem:[%s9161_s6 + $0xa8c] ss:$16 sps:$4 sm:$0xff]  }
 0x190   : > { %5276 = vmatpush1.bf16.msra.mxu0 %v8014_v55  ;;  %5768 = vmatpush1.bf16.msra.mxu1 %v8017_v56  ;;  %v8104_v55 = vld [vmem:[%s9161_s6 + $0xa80] ss:$16 sps:$4 sm:$0xff]   ;;  %v8107_v56 = vld [vmem:[%s9161_s6 + $0xa88] ss:$16 sps:$4 sm:$0xff]  }
 0x191   : > { %5277 = vmatprep.subr.bf16.mxu0 %v8022_v57  ;;  %5769 = vmatprep.subr.bf16.mxu1 %v8025_v58  ;;  %v8112_v57 = vld [vmem:[%s9161_s6 + $0xaa4] ss:$16 sps:$4 sm:$0xff]   ;;  %v8115_v58 = vld [vmem:[%s9161_s6 + $0xaac] ss:$16 sps:$4 sm:$0xff]  }
 0x194   : > { %5278 = vmatpush1.bf16.msra.mxu0 %v8020_v59  ;;  %5770 = vmatpush1.bf16.msra.mxu1 %v8023_v60  ;;  %v8110_v59 = vld [vmem:[%s9161_s6 + $0xaa0] ss:$16 sps:$4 sm:$0xff]   ;;  %v8113_v60 = vld [vmem:[%s9161_s6 + $0xaa8] ss:$16 sps:$4 sm:$0xff]  }
 0x195   : > { %5279 = vmatprep.subr.bf16.mxu0 %v8028_v61  ;;  %5771 = vmatprep.subr.bf16.mxu1 %v8031_v62  ;;  %v8118_v61 = vld [vmem:[%s9161_s6 + $0xac4] ss:$16 sps:$4 sm:$0xff]   ;;  %v8121_v62 = vld [vmem:[%s9161_s6 + $0xacc] ss:$16 sps:$4 sm:$0xff]  }
 0x198   : > { %5280 = vmatpush1.bf16.msra.mxu0 %v8026_v63  ;;  %5772 = vmatpush1.bf16.msra.mxu1 %v8029_v0  ;;  %v8116_v63 = vld [vmem:[%s9161_s6 + $0xac0] ss:$16 sps:$4 sm:$0xff]   ;;  %v8119_v0 = vld [vmem:[%s9161_s6 + $0xac8] ss:$16 sps:$4 sm:$0xff]  }
 0x199   : > { %5281 = vmatprep.subr.bf16.mxu0 %v8034_v1  ;;  %5773 = vmatprep.subr.bf16.mxu1 %v8037_v2  ;;  %v8124_v1 = vld [vmem:[%s9161_s6 + $0xae4] ss:$16 sps:$4 sm:$0xff]   ;;  %v8127_v2 = vld [vmem:[%s9161_s6 + $0xaec] ss:$16 sps:$4 sm:$0xff]  }
 0x19c   : > { %5282 = vmatpush1.bf16.msra.mxu0 %v8032_v3  ;;  %5774 = vmatpush1.bf16.msra.mxu1 %v8035_v4  ;;  %v8122_v3 = vld [vmem:[%s9161_s6 + $0xae0] ss:$16 sps:$4 sm:$0xff]   ;;  %v8125_v4 = vld [vmem:[%s9161_s6 + $0xae8] ss:$16 sps:$4 sm:$0xff]  }
 0x19d   : > { %5283 = vmatprep.subr.bf16.mxu0 %v8040_v5  ;;  %5775 = vmatprep.subr.bf16.mxu1 %v8043_v6  ;;  %v8130_v5 = vld [vmem:[%s9161_s6 + $0xb04] ss:$16 sps:$4 sm:$0xff]   ;;  %v8133_v6 = vld [vmem:[%s9161_s6 + $0xb0c] ss:$16 sps:$4 sm:$0xff]  }
 0x1a0   : > { %5284 = vmatpush1.bf16.msra.mxu0 %v8038_v7  ;;  %5776 = vmatpush1.bf16.msra.mxu1 %v8041_v8  ;;  %v8128_v7 = vld [vmem:[%s9161_s6 + $0xb00] ss:$16 sps:$4 sm:$0xff]   ;;  %v8131_v8 = vld [vmem:[%s9161_s6 + $0xb08] ss:$16 sps:$4 sm:$0xff]  }
 0x1a1   : > { %5285 = vmatprep.subr.bf16.mxu0 %v8046_v9  ;;  %5777 = vmatprep.subr.bf16.mxu1 %v8049_v10  ;;  %v8136_v9 = vld [vmem:[%s9161_s6 + $0xb24] ss:$16 sps:$4 sm:$0xff]   ;;  %v8139_v10 = vld [vmem:[%s9161_s6 + $0xb2c] ss:$16 sps:$4 sm:$0xff]  }
 0x1a4   : > { %5286 = vmatpush1.bf16.msra.mxu0 %v8044_v11  ;;  %5778 = vmatpush1.bf16.msra.mxu1 %v8047_v12  ;;  %v8134_v11 = vld [vmem:[%s9161_s6 + $0xb20] ss:$16 sps:$4 sm:$0xff]   ;;  %v8137_v12 = vld [vmem:[%s9161_s6 + $0xb28] ss:$16 sps:$4 sm:$0xff]  }
 0x1a5   : > { %5287 = vmatprep.subr.bf16.mxu0 %v8052_v13  ;;  %5779 = vmatprep.subr.bf16.mxu1 %v8055_v15  ;;  %v8142_v13 = vld [vmem:[%s9161_s6 + $0xb44] ss:$16 sps:$4 sm:$0xff]   ;;  %v8145_v15 = vld [vmem:[%s9161_s6 + $0xb4c] ss:$16 sps:$4 sm:$0xff]  }
 0x1a8   : > { %5288 = vmatpush1.bf16.msra.mxu0 %v8050_v17  ;;  %5780 = vmatpush1.bf16.msra.mxu1 %v8053_v53  ;;  %v8140_v17 = vld [vmem:[%s9161_s6 + $0xb40] ss:$16 sps:$4 sm:$0xff]   ;;  %v8143_v53 = vld [vmem:[%s9161_s6 + $0xb48] ss:$16 sps:$4 sm:$0xff]  }
 0x1a9   : > { %5289 = vmatprep.subr.bf16.mxu0 %v8058_v18  ;;  %5781 = vmatprep.subr.bf16.mxu1 %v8061_v19  ;;  %v8148_v18 = vld [vmem:[%s9161_s6 + $0xb64] ss:$16 sps:$4 sm:$0xff]   ;;  %v8151_v19 = vld [vmem:[%s9161_s6 + $0xb6c] ss:$16 sps:$4 sm:$0xff]  }
 0x1ac   : > { %5290 = vmatpush1.bf16.msra.mxu0 %v8056_v20  ;;  %5782 = vmatpush1.bf16.msra.mxu1 %v8059_v21  ;;  %v8146_v20 = vld [vmem:[%s9161_s6 + $0xb60] ss:$16 sps:$4 sm:$0xff]   ;;  %v8149_v21 = vld [vmem:[%s9161_s6 + $0xb68] ss:$16 sps:$4 sm:$0xff]  }
 0x1ad   : > { %5291 = vmatprep.subr.bf16.mxu0 %v8064_v23  ;;  %5783 = vmatprep.subr.bf16.mxu1 %v8067_v24  ;;  %v8154_v23 = vld [vmem:[%s9161_s6 + $0xb84] ss:$16 sps:$4 sm:$0xff]   ;;  %v8157_v24 = vld [vmem:[%s9161_s6 + $0xb8c] ss:$16 sps:$4 sm:$0xff]  }
 0x1b0   : > { %5292 = vmatpush1.bf16.msra.mxu0 %v8062_v25  ;;  %5784 = vmatpush1.bf16.msra.mxu1 %v8065_v27  ;;  %v8152_v25 = vld [vmem:[%s9161_s6 + $0xb80] ss:$16 sps:$4 sm:$0xff]   ;;  %v8155_v27 = vld [vmem:[%s9161_s6 + $0xb88] ss:$16 sps:$4 sm:$0xff]  }
 0x1b1   : > { %5293 = vmatprep.subr.bf16.mxu0 %v8070_v28  ;;  %5785 = vmatprep.subr.bf16.mxu1 %v8073_v29  ;;  %v8160_v28 = vld [vmem:[%s9161_s6 + $0xba4] ss:$16 sps:$4 sm:$0xff]   ;;  %v8163_v29 = vld [vmem:[%s9161_s6 + $0xbac] ss:$16 sps:$4 sm:$0xff]  }
 0x1b4   : > { %5294 = vmatpush1.bf16.msra.mxu0 %v8068_v30  ;;  %5786 = vmatpush1.bf16.msra.mxu1 %v8071_v31  ;;  %v8158_v30 = vld [vmem:[%s9161_s6 + $0xba0] ss:$16 sps:$4 sm:$0xff]   ;;  %v8161_v31 = vld [vmem:[%s9161_s6 + $0xba8] ss:$16 sps:$4 sm:$0xff]  }
 0x1b5   : > { %5295 = vmatprep.subr.bf16.mxu0 %v8076_v16  ;;  %5787 = vmatprep.subr.bf16.mxu1 %v8079_v32  ;;  %v8166_v16 = vld [vmem:[%s9161_s6 + $0xbc4] ss:$16 sps:$4 sm:$0xff]   ;;  %v8169_v32 = vld [vmem:[%s9161_s6 + $0xbcc] ss:$16 sps:$4 sm:$0xff]  }
 0x1b8   : > { %5296 = vmatpush1.bf16.msra.mxu0 %v8074_v33  ;;  %5788 = vmatpush1.bf16.msra.mxu1 %v8077_v34  ;;  %v8754_v33 = vld [vmem:[%s9154_s10 + $0x8] sm:$0xff] }
 0x1b9   : > { %5306 = vmatprep.subr.bf16.mxu0 %v8082_v26  ;;  %5798 = vmatprep.subr.bf16.mxu1 %v8085_v35  ;;  %v1139_v34 = vcombine.high %v8754_v33, %v8754_v33  ;;  %v8164_v26 = vld [vmem:[%s9161_s6 + $0xbc0] ss:$16 sps:$4 sm:$0xff]   ;;  %v8167_v35 = vld [vmem:[%s9161_s6 + $0xbc8] ss:$16 sps:$4 sm:$0xff]  }
 0x1ba   : > { %v8248_v33 = vld [vmem:[%s9161_s6 + $0xd80] ss:$16 sps:$4 sm:$0xff]  }
 0x1bb   : > { %5298 = vmatmul.mubr.bf16.vlgmr.msra.gmra.mrb[0].mxu0 %v9546_v14  ;;  %5790 = vmatmul.mubr.bf16.vlgmr.msra.gmra.mrb[0].mxu1 %v9546_v14 }
 0x1bc   : > { %5307 = vmatpush1.bf16.msra.mxu0 %v8080_v37  ;;  %5799 = vmatpush1.bf16.msra.mxu1 %v8083_v38  ;;  %v8172_v37 = vld [vmem:[%s9161_s6 + $0xbe4] ss:$16 sps:$4 sm:$0xff]   ;;  %v8175_v38 = vld [vmem:[%s9161_s6 + $0xbec] ss:$16 sps:$4 sm:$0xff]  }
 0x1bd   : > { %5308 = vmatprep.subr.bf16.mxu0 %v8088_v39  ;;  %5800 = vmatprep.subr.bf16.mxu1 %v8091_v40  ;;  %v9614_v39 = vrot.slane %v1139_v34, %v9219_v50  ;;  %v8170_v40 = vld [vmem:[%s9161_s6 + $0xbe0] ss:$16 sps:$4 sm:$0xff]   ;;  %v8251_v34 = vld [vmem:[%s9161_s6 + $0xd88] ss:$16 sps:$4 sm:$0xff]  }
 0x1be   : > { %5338 = vmatprep.mubr.bf16.mxu0 %v1186_v41  ;;  %5830 = vmatprep.mubr.bf16.mxu1 %v1186_v41  ;;  %v8173_v41 = vld [vmem:[%s9161_s6 + $0xbe8] ss:$16 sps:$4 sm:$0xff]  }
 0x1c0   : > { %5309 = vmatpush1.bf16.msra.mxu0 %v8086_v22  ;;  %5801 = vmatpush1.bf16.msra.mxu1 %v8089_v42  ;;  %v8178_v22 = vld [vmem:[%s9161_s6 + $0xc04] ss:$16 sps:$4 sm:$0xff]   ;;  %v8181_v42 = vld [vmem:[%s9161_s6 + $0xc0c] ss:$16 sps:$4 sm:$0xff]  }
 0x1c1   : > { %5310 = vmatprep.subr.bf16.mxu0 %v8094_v43  ;;  %5802 = vmatprep.subr.bf16.mxu1 %v8097_v45  ;;  %v1155_v43 = vcombine.high %v9614_v39, %v9614_v39  ;;  %v1184_v45 = vcombine.high %v9546_v14, %v9546_v14  ;;  %v8182_v14 = vld [vmem:[%s9161_s6 + $0xc20] ss:$16 sps:$4 sm:$0xff]  }
 0x1c4   : > { %5311 = vmatpush1.bf16.msra.mxu0 %v8092_v36  ;;  %5803 = vmatpush1.bf16.msra.mxu1 %v8095_v46  ;;  %v8176_v36 = vld [vmem:[%s9161_s6 + $0xc00] ss:$16 sps:$4 sm:$0xff]   ;;  %v8179_v46 = vld [vmem:[%s9161_s6 + $0xc08] ss:$16 sps:$4 sm:$0xff]  }
 0x1c5   : > { %5312 = vmatprep.subr.bf16.mxu0 %v8100_v47  ;;  %5804 = vmatprep.subr.bf16.mxu1 %v8103_v48  ;;  %v8184_v47 = vld [vmem:[%s9161_s6 + $0xc24] ss:$16 sps:$4 sm:$0xff]   ;;  %v8187_v48 = vld [vmem:[%s9161_s6 + $0xc2c] ss:$16 sps:$4 sm:$0xff]  }
 0x1c8   : > { %5313 = vmatpush1.bf16.msra.mxu0 %v8098_v49  ;;  %5805 = vmatpush1.bf16.msra.mxu1 %v8101_v51  ;;  %v9629_v49 = vrot.slane %v1155_v43, %v9219_v50  ;;  %v8185_v51 = vld [vmem:[%s9161_s6 + $0xc28] ss:$16 sps:$4 sm:$0xff]   ;;  %v8268_v43 = vld [vmem:[%s9161_s6 + $0xde4] ss:$16 sps:$4 sm:$0xff]  }
 0x1c9   : > { %5314 = vmatprep.subr.bf16.mxu0 %v8106_v52  ;;  %5806 = vmatprep.subr.bf16.mxu1 %v8109_v54  ;;  %v8190_v52 = vld [vmem:[%s9161_s6 + $0xc44] ss:$16 sps:$4 sm:$0xff]   ;;  %v8193_v54 = vld [vmem:[%s9161_s6 + $0xc4c] ss:$16 sps:$4 sm:$0xff]  }
 0x1cc   : > { %5315 = vmatpush1.bf16.msra.mxu0 %v8104_v55  ;;  %5807 = vmatpush1.bf16.msra.mxu1 %v8107_v56  ;;  %v8188_v55 = vld [vmem:[%s9161_s6 + $0xc40] ss:$16 sps:$4 sm:$0xff]   ;;  %v8191_v56 = vld [vmem:[%s9161_s6 + $0xc48] ss:$16 sps:$4 sm:$0xff]  }
 0x1cd   : > { %5316 = vmatprep.subr.bf16.mxu0 %v8112_v57  ;;  %5808 = vmatprep.subr.bf16.mxu1 %v8115_v58  ;;  %v8196_v57 = vld [vmem:[%s9161_s6 + $0xc64] ss:$16 sps:$4 sm:$0xff]   ;;  %v8199_v58 = vld [vmem:[%s9161_s6 + $0xc6c] ss:$16 sps:$4 sm:$0xff]  }
 0x1d0   : > { %5317 = vmatpush1.bf16.msra.mxu0 %v8110_v59  ;;  %5809 = vmatpush1.bf16.msra.mxu1 %v8113_v60  ;;  %v8194_v59 = vld [vmem:[%s9161_s6 + $0xc60] ss:$16 sps:$4 sm:$0xff]   ;;  %v8197_v60 = vld [vmem:[%s9161_s6 + $0xc68] ss:$16 sps:$4 sm:$0xff]  }
 0x1d1   : > { %5318 = vmatprep.subr.bf16.mxu0 %v8118_v61  ;;  %5810 = vmatprep.subr.bf16.mxu1 %v8121_v62  ;;  %v8202_v61 = vld [vmem:[%s9161_s6 + $0xc84] ss:$16 sps:$4 sm:$0xff]   ;;  %v8205_v62 = vld [vmem:[%s9161_s6 + $0xc8c] ss:$16 sps:$4 sm:$0xff]  }
 0x1d4   : > { %5319 = vmatpush1.bf16.msra.mxu0 %v8116_v63  ;;  %5811 = vmatpush1.bf16.msra.mxu1 %v8119_v0  ;;  %v8200_v63 = vld [vmem:[%s9161_s6 + $0xc80] ss:$16 sps:$4 sm:$0xff]   ;;  %v8203_v0 = vld [vmem:[%s9161_s6 + $0xc88] ss:$16 sps:$4 sm:$0xff]  }
 0x1d5   : > { %5320 = vmatprep.subr.bf16.mxu0 %v8124_v1  ;;  %5812 = vmatprep.subr.bf16.mxu1 %v8127_v2  ;;  %v8208_v1 = vld [vmem:[%s9161_s6 + $0xca4] ss:$16 sps:$4 sm:$0xff]   ;;  %v8211_v2 = vld [vmem:[%s9161_s6 + $0xcac] ss:$16 sps:$4 sm:$0xff]  }
 0x1d8   : > { %5321 = vmatpush1.bf16.msra.mxu0 %v8122_v3  ;;  %5813 = vmatpush1.bf16.msra.mxu1 %v8125_v4  ;;  %v8206_v3 = vld [vmem:[%s9161_s6 + $0xca0] ss:$16 sps:$4 sm:$0xff]   ;;  %v8209_v4 = vld [vmem:[%s9161_s6 + $0xca8] ss:$16 sps:$4 sm:$0xff]  }
 0x1d9   : > { %5322 = vmatprep.subr.bf16.mxu0 %v8130_v5  ;;  %5814 = vmatprep.subr.bf16.mxu1 %v8133_v6  ;;  %v8214_v5 = vld [vmem:[%s9161_s6 + $0xcc4] ss:$16 sps:$4 sm:$0xff]   ;;  %v8217_v6 = vld [vmem:[%s9161_s6 + $0xccc] ss:$16 sps:$4 sm:$0xff]  }
 0x1dc   : > { %5323 = vmatpush1.bf16.msra.mxu0 %v8128_v7  ;;  %5815 = vmatpush1.bf16.msra.mxu1 %v8131_v8  ;;  %v8212_v7 = vld [vmem:[%s9161_s6 + $0xcc0] ss:$16 sps:$4 sm:$0xff]   ;;  %v8215_v8 = vld [vmem:[%s9161_s6 + $0xcc8] ss:$16 sps:$4 sm:$0xff]  }
 0x1dd   : > { %5324 = vmatprep.subr.bf16.mxu0 %v8136_v9  ;;  %5816 = vmatprep.subr.bf16.mxu1 %v8139_v10  ;;  %v8220_v9 = vld [vmem:[%s9161_s6 + $0xce4] ss:$16 sps:$4 sm:$0xff]   ;;  %v8223_v10 = vld [vmem:[%s9161_s6 + $0xcec] ss:$16 sps:$4 sm:$0xff]  }
 0x1e0   : > { %5325 = vmatpush1.bf16.msra.mxu0 %v8134_v11  ;;  %5817 = vmatpush1.bf16.msra.mxu1 %v8137_v12  ;;  %v8218_v11 = vld [vmem:[%s9161_s6 + $0xce0] ss:$16 sps:$4 sm:$0xff]   ;;  %v8221_v12 = vld [vmem:[%s9161_s6 + $0xce8] ss:$16 sps:$4 sm:$0xff]  }
 0x1e1   : > { %5326 = vmatprep.subr.bf16.mxu0 %v8142_v13  ;;  %5818 = vmatprep.subr.bf16.mxu1 %v8145_v15  ;;  %v8226_v13 = vld [vmem:[%s9161_s6 + $0xd04] ss:$16 sps:$4 sm:$0xff]   ;;  %v8229_v15 = vld [vmem:[%s9161_s6 + $0xd0c] ss:$16 sps:$4 sm:$0xff]  }
 0x1e4   : > { %5327 = vmatpush1.bf16.msra.mxu0 %v8140_v17  ;;  %5819 = vmatpush1.bf16.msra.mxu1 %v8143_v53  ;;  %v8224_v17 = vld [vmem:[%s9161_s6 + $0xd00] ss:$16 sps:$4 sm:$0xff]   ;;  %v8227_v53 = vld [vmem:[%s9161_s6 + $0xd08] ss:$16 sps:$4 sm:$0xff]  }
 0x1e5   : > { %5328 = vmatprep.subr.bf16.mxu0 %v8148_v18  ;;  %5820 = vmatprep.subr.bf16.mxu1 %v8151_v19  ;;  %v8232_v18 = vld [vmem:[%s9161_s6 + $0xd24] ss:$16 sps:$4 sm:$0xff]   ;;  %v8235_v19 = vld [vmem:[%s9161_s6 + $0xd2c] ss:$16 sps:$4 sm:$0xff]  }
 0x1e8   : > { %5329 = vmatpush1.bf16.msra.mxu0 %v8146_v20  ;;  %5821 = vmatpush1.bf16.msra.mxu1 %v8149_v21  ;;  %v8230_v20 = vld [vmem:[%s9161_s6 + $0xd20] ss:$16 sps:$4 sm:$0xff]   ;;  %v8233_v21 = vld [vmem:[%s9161_s6 + $0xd28] ss:$16 sps:$4 sm:$0xff]  }
 0x1e9   : > { %5330 = vmatprep.subr.bf16.mxu0 %v8154_v23  ;;  %5822 = vmatprep.subr.bf16.mxu1 %v8157_v24  ;;  %v8238_v23 = vld [vmem:[%s9161_s6 + $0xd44] ss:$16 sps:$4 sm:$0xff]   ;;  %v8241_v24 = vld [vmem:[%s9161_s6 + $0xd4c] ss:$16 sps:$4 sm:$0xff]  }
 0x1ec   : > { %5331 = vmatpush1.bf16.msra.mxu0 %v8152_v25  ;;  %5823 = vmatpush1.bf16.msra.mxu1 %v8155_v27  ;;  %v8236_v25 = vld [vmem:[%s9161_s6 + $0xd40] ss:$16 sps:$4 sm:$0xff]   ;;  %v8239_v27 = vld [vmem:[%s9161_s6 + $0xd48] ss:$16 sps:$4 sm:$0xff]  }
 0x1ed   : > { %5332 = vmatprep.subr.bf16.mxu0 %v8160_v28  ;;  %5824 = vmatprep.subr.bf16.mxu1 %v8163_v29  ;;  %v8244_v28 = vld [vmem:[%s9161_s6 + $0xd64] ss:$16 sps:$4 sm:$0xff]   ;;  %v8247_v29 = vld [vmem:[%s9161_s6 + $0xd6c] ss:$16 sps:$4 sm:$0xff]  }
 0x1f0   : > { %5333 = vmatpush1.bf16.msra.mxu0 %v8158_v30  ;;  %5825 = vmatpush1.bf16.msra.mxu1 %v8161_v31  ;;  %v8242_v30 = vld [vmem:[%s9161_s6 + $0xd60] ss:$16 sps:$4 sm:$0xff]   ;;  %v8245_v31 = vld [vmem:[%s9161_s6 + $0xd68] ss:$16 sps:$4 sm:$0xff]  }
 0x1f1   : > { %5334 = vmatprep.subr.bf16.mxu0 %v8166_v16  ;;  %5826 = vmatprep.subr.bf16.mxu1 %v8169_v32  ;;  %v8250_v16 = vld [vmem:[%s9161_s6 + $0xd84] ss:$16 sps:$4 sm:$0xff]   ;;  %v8253_v32 = vld [vmem:[%s9161_s6 + $0xd8c] ss:$16 sps:$4 sm:$0xff]  }
 0x1f4   : > { %5335 = vmatpush1.bf16.msra.mxu0 %v8164_v26  ;;  %5827 = vmatpush1.bf16.msra.mxu1 %v8167_v35  ;;  %v8256_v26 = vld [vmem:[%s9161_s6 + $0xda4] ss:$16 sps:$4 sm:$0xff]   ;;  %v8259_v35 = vld [vmem:[%s9161_s6 + $0xdac] ss:$16 sps:$4 sm:$0xff]  }
 0x1f5   : > { %5336 = vmatprep.subr.bf16.mxu0 %v8172_v37  ;;  %5828 = vmatprep.subr.bf16.mxu1 %v8175_v38  ;;  %v8254_v37 = vld [vmem:[%s9161_s6 + $0xda0] ss:$16 sps:$4 sm:$0xff]   ;;  %v8257_v38 = vld [vmem:[%s9161_s6 + $0xda8] ss:$16 sps:$4 sm:$0xff]  }
 0x1f8   : > { %5337 = vmatpush1.bf16.msra.mxu0 %v8170_v40  ;;  %5829 = vmatpush1.bf16.msra.mxu1 %v8173_v41  ;;  %v8262_v40 = vld [vmem:[%s9161_s6 + $0xdc4] ss:$16 sps:$4 sm:$0xff]   ;;  %v8265_v41 = vld [vmem:[%s9161_s6 + $0xdcc] ss:$16 sps:$4 sm:$0xff]  }
 0x1f9   : > { %5347 = vmatprep.subr.bf16.mxu0 %v8178_v22  ;;  %5839 = vmatprep.subr.bf16.mxu1 %v8181_v42  ;;  %v8260_v22 = vld [vmem:[%s9161_s6 + $0xdc0] ss:$16 sps:$4 sm:$0xff]   ;;  %v8263_v42 = vld [vmem:[%s9161_s6 + $0xdc8] ss:$16 sps:$4 sm:$0xff]  }
 0x1fb   : > { %5339 = vmatmul.mubr.bf16.vlgmr.msra.gmra.mrb[0].mxu0 %v1184_v45  ;;  %5831 = vmatmul.mubr.bf16.vlgmr.msra.gmra.mrb[0].mxu1 %v1184_v45  ;;  %v8271_v45 = vld [vmem:[%s9161_s6 + $0xdec] ss:$16 sps:$4 sm:$0xff]  }
 0x1fc   : > { %5348 = vmatpush1.bf16.msra.mxu0 %v8176_v36  ;;  %5840 = vmatpush1.bf16.msra.mxu1 %v8179_v46  ;;  %v8266_v36 = vld [vmem:[%s9161_s6 + $0xde0] ss:$16 sps:$4 sm:$0xff]   ;;  %v8269_v46 = vld [vmem:[%s9161_s6 + $0xde8] ss:$16 sps:$4 sm:$0xff]  }
 0x1fd   : > { %5349 = vmatprep.subr.bf16.mxu0 %v8184_v47  ;;  %5841 = vmatprep.subr.bf16.mxu1 %v8187_v48  ;;  %v8275_v47 = vld [vmem:[%s9161_s6 + $0xe04] ss:$16 sps:$4 sm:$0xff]   ;;  %v8278_v48 = vld [vmem:[%s9161_s6 + $0xe0c] ss:$16 sps:$4 sm:$0xff]  }
 0x1fe   : > { %5379 = vmatprep.mubr.bf16.mxu0 %v9629_v49  ;;  %5871 = vmatprep.mubr.bf16.mxu1 %v9629_v49 }
 0x200   : > { %5350 = vmatpush1.bf16.msra.mxu0 %v8182_v14  ;;  %5842 = vmatpush1.bf16.msra.mxu1 %v8185_v51  ;;  %v9695_v14 = vrot.slane %v9614_v39, %v9219_v50  ;;  %v8273_v51 = vld [vmem:[%s9161_s6 + $0xe00] ss:$16 sps:$4 sm:$0xff]  }
 0x201   : > { %5351 = vmatprep.subr.bf16.mxu0 %v8190_v52  ;;  %5843 = vmatprep.subr.bf16.mxu1 %v8193_v54  ;;  %v8276_v52 = vld [vmem:[%s9161_s6 + $0xe08] ss:$16 sps:$4 sm:$0xff]   ;;  %v8281_v54 = vld [vmem:[%s9161_s6 + $0xe24] ss:$16 sps:$4 sm:$0xff]   ;;  %v8279_v39 = vld [vmem:[%s9161_s6 + $0xe20] ss:$16 sps:$4 sm:$0xff]  }
 0x204   : > { %5352 = vmatpush1.bf16.msra.mxu0 %v8188_v55  ;;  %5844 = vmatpush1.bf16.msra.mxu1 %v8191_v56  ;;  %v8284_v55 = vld [vmem:[%s9161_s6 + $0xe2c] ss:$16 sps:$4 sm:$0xff]   ;;  %v1187_v56 = vcombine.high %v9629_v49, %v9629_v49  ;;  %v8285_v49 = vld [vmem:[%s9161_s6 + $0xe40] ss:$16 sps:$4 sm:$0xff]  }
 0x205   : > { %5353 = vmatprep.subr.bf16.mxu0 %v8196_v57  ;;  %5845 = vmatprep.subr.bf16.mxu1 %v8199_v58  ;;  %v8282_v57 = vld [vmem:[%s9161_s6 + $0xe28] ss:$16 sps:$4 sm:$0xff]   ;;  %v8287_v58 = vld [vmem:[%s9161_s6 + $0xe44] ss:$16 sps:$4 sm:$0xff]  }
 0x208   : > { %5354 = vmatpush1.bf16.msra.mxu0 %v8194_v59  ;;  %5846 = vmatpush1.bf16.msra.mxu1 %v8197_v60  ;;  %v8290_v59 = vld [vmem:[%s9161_s6 + $0xe4c] ss:$16 sps:$4 sm:$0xff]   ;;  %v8288_v60 = vld [vmem:[%s9161_s6 + $0xe48] ss:$16 sps:$4 sm:$0xff]  }
 0x209   : > { %5355 = vmatprep.subr.bf16.mxu0 %v8202_v61  ;;  %5847 = vmatprep.subr.bf16.mxu1 %v8205_v62  ;;  %v8293_v61 = vld [vmem:[%s9161_s6 + $0xe64] ss:$16 sps:$4 sm:$0xff]   ;;  %v8296_v62 = vld [vmem:[%s9161_s6 + $0xe6c] ss:$16 sps:$4 sm:$0xff]  }
 0x20c   : > { %5356 = vmatpush1.bf16.msra.mxu0 %v8200_v63  ;;  %5848 = vmatpush1.bf16.msra.mxu1 %v8203_v0  ;;  %v8291_v63 = vld [vmem:[%s9161_s6 + $0xe60] ss:$16 sps:$4 sm:$0xff]   ;;  %v8294_v0 = vld [vmem:[%s9161_s6 + $0xe68] ss:$16 sps:$4 sm:$0xff]  }
 0x20d   : > { %5357 = vmatprep.subr.bf16.mxu0 %v8208_v1  ;;  %5849 = vmatprep.subr.bf16.mxu1 %v8211_v2  ;;  %v8299_v1 = vld [vmem:[%s9161_s6 + $0xe84] ss:$16 sps:$4 sm:$0xff]   ;;  %v8302_v2 = vld [vmem:[%s9161_s6 + $0xe8c] ss:$16 sps:$4 sm:$0xff]  }
 0x210   : > { %5358 = vmatpush1.bf16.msra.mxu0 %v8206_v3  ;;  %5850 = vmatpush1.bf16.msra.mxu1 %v8209_v4  ;;  %v8297_v3 = vld [vmem:[%s9161_s6 + $0xe80] ss:$16 sps:$4 sm:$0xff]   ;;  %v8300_v4 = vld [vmem:[%s9161_s6 + $0xe88] ss:$16 sps:$4 sm:$0xff]  }
 0x211   : > { %5359 = vmatprep.subr.bf16.mxu0 %v8214_v5  ;;  %5851 = vmatprep.subr.bf16.mxu1 %v8217_v6  ;;  %v8305_v5 = vld [vmem:[%s9161_s6 + $0xea4] ss:$16 sps:$4 sm:$0xff]   ;;  %v8308_v6 = vld [vmem:[%s9161_s6 + $0xeac] ss:$16 sps:$4 sm:$0xff]  }
 0x214   : > { %5360 = vmatpush1.bf16.msra.mxu0 %v8212_v7  ;;  %5852 = vmatpush1.bf16.msra.mxu1 %v8215_v8  ;;  %v8303_v7 = vld [vmem:[%s9161_s6 + $0xea0] ss:$16 sps:$4 sm:$0xff]   ;;  %v8306_v8 = vld [vmem:[%s9161_s6 + $0xea8] ss:$16 sps:$4 sm:$0xff]  }
 0x215   : > { %5361 = vmatprep.subr.bf16.mxu0 %v8220_v9  ;;  %5853 = vmatprep.subr.bf16.mxu1 %v8223_v10  ;;  %v8311_v9 = vld [vmem:[%s9161_s6 + $0xec4] ss:$16 sps:$4 sm:$0xff]   ;;  %v8314_v10 = vld [vmem:[%s9161_s6 + $0xecc] ss:$16 sps:$4 sm:$0xff]  }
 0x218   : > { %5362 = vmatpush1.bf16.msra.mxu0 %v8218_v11  ;;  %5854 = vmatpush1.bf16.msra.mxu1 %v8221_v12  ;;  %v8309_v11 = vld [vmem:[%s9161_s6 + $0xec0] ss:$16 sps:$4 sm:$0xff]   ;;  %v8312_v12 = vld [vmem:[%s9161_s6 + $0xec8] ss:$16 sps:$4 sm:$0xff]  }
 0x219   : > { %5363 = vmatprep.subr.bf16.mxu0 %v8226_v13  ;;  %5855 = vmatprep.subr.bf16.mxu1 %v8229_v15  ;;  %v8317_v13 = vld [vmem:[%s9161_s6 + $0xee4] ss:$16 sps:$4 sm:$0xff]   ;;  %v8320_v15 = vld [vmem:[%s9161_s6 + $0xeec] ss:$16 sps:$4 sm:$0xff]  }
 0x21c   : > { %5364 = vmatpush1.bf16.msra.mxu0 %v8224_v17  ;;  %5856 = vmatpush1.bf16.msra.mxu1 %v8227_v53  ;;  %v8315_v17 = vld [vmem:[%s9161_s6 + $0xee0] ss:$16 sps:$4 sm:$0xff]   ;;  %v8318_v53 = vld [vmem:[%s9161_s6 + $0xee8] ss:$16 sps:$4 sm:$0xff]  }
 0x21d   : > { %5365 = vmatprep.subr.bf16.mxu0 %v8232_v18  ;;  %5857 = vmatprep.subr.bf16.mxu1 %v8235_v19  ;;  %v8323_v18 = vld [vmem:[%s9161_s6 + $0xf04] ss:$16 sps:$4 sm:$0xff]   ;;  %v8326_v19 = vld [vmem:[%s9161_s6 + $0xf0c] ss:$16 sps:$4 sm:$0xff]  }
 0x220   : > { %5366 = vmatpush1.bf16.msra.mxu0 %v8230_v20  ;;  %5858 = vmatpush1.bf16.msra.mxu1 %v8233_v21  ;;  %v8321_v20 = vld [vmem:[%s9161_s6 + $0xf00] ss:$16 sps:$4 sm:$0xff]   ;;  %v8324_v21 = vld [vmem:[%s9161_s6 + $0xf08] ss:$16 sps:$4 sm:$0xff]  }
 0x221   : > { %5367 = vmatprep.subr.bf16.mxu0 %v8238_v23  ;;  %5859 = vmatprep.subr.bf16.mxu1 %v8241_v24  ;;  %v8329_v23 = vld [vmem:[%s9161_s6 + $0xf24] ss:$16 sps:$4 sm:$0xff]   ;;  %v8332_v24 = vld [vmem:[%s9161_s6 + $0xf2c] ss:$16 sps:$4 sm:$0xff]  }
 0x224   : > { %5368 = vmatpush1.bf16.msra.mxu0 %v8236_v25  ;;  %5860 = vmatpush1.bf16.msra.mxu1 %v8239_v27  ;;  %v8327_v25 = vld [vmem:[%s9161_s6 + $0xf20] ss:$16 sps:$4 sm:$0xff]   ;;  %v8330_v27 = vld [vmem:[%s9161_s6 + $0xf28] ss:$16 sps:$4 sm:$0xff]  }
 0x225   : > { %5369 = vmatprep.subr.bf16.mxu0 %v8244_v28  ;;  %5861 = vmatprep.subr.bf16.mxu1 %v8247_v29  ;;  %v8335_v28 = vld [vmem:[%s9161_s6 + $0xf44] ss:$16 sps:$4 sm:$0xff]   ;;  %v8338_v29 = vld [vmem:[%s9161_s6 + $0xf4c] ss:$16 sps:$4 sm:$0xff]  }
 0x228   : > { %5370 = vmatpush1.bf16.msra.mxu0 %v8242_v30  ;;  %5862 = vmatpush1.bf16.msra.mxu1 %v8245_v31  ;;  %v8333_v30 = vld [vmem:[%s9161_s6 + $0xf40] ss:$16 sps:$4 sm:$0xff]   ;;  %v8336_v31 = vld [vmem:[%s9161_s6 + $0xf48] ss:$16 sps:$4 sm:$0xff]  }
 0x229   : > { %5371 = vmatprep.subr.bf16.mxu0 %v8250_v16  ;;  %5863 = vmatprep.subr.bf16.mxu1 %v8253_v32  ;;  %v8341_v16 = vld [vmem:[%s9161_s6 + $0xf64] ss:$16 sps:$4 sm:$0xff]   ;;  %v8344_v32 = vld [vmem:[%s9161_s6 + $0xf6c] ss:$16 sps:$4 sm:$0xff]  }
 0x22c   : > { %5372 = vmatpush1.bf16.msra.mxu0 %v8248_v33  ;;  %5864 = vmatpush1.bf16.msra.mxu1 %v8251_v34  ;;  %v8339_v33 = vld [vmem:[%s9161_s6 + $0xf60] ss:$16 sps:$4 sm:$0xff]   ;;  %v8342_v34 = vld [vmem:[%s9161_s6 + $0xf68] ss:$16 sps:$4 sm:$0xff]  }
 0x22d   : > { %5373 = vmatprep.subr.bf16.mxu0 %v8256_v26  ;;  %5865 = vmatprep.subr.bf16.mxu1 %v8259_v35  ;;  %v8347_v26 = vld [vmem:[%s9161_s6 + $0xf84] ss:$16 sps:$4 sm:$0xff]   ;;  %v8350_v35 = vld [vmem:[%s9161_s6 + $0xf8c] ss:$16 sps:$4 sm:$0xff]  }
 0x230   : > { %5374 = vmatpush1.bf16.msra.mxu0 %v8254_v37  ;;  %5866 = vmatpush1.bf16.msra.mxu1 %v8257_v38  ;;  %v8345_v37 = vld [vmem:[%s9161_s6 + $0xf80] ss:$16 sps:$4 sm:$0xff]   ;;  %v8348_v38 = vld [vmem:[%s9161_s6 + $0xf88] ss:$16 sps:$4 sm:$0xff]  }
 0x231   : > { %5375 = vmatprep.subr.bf16.mxu0 %v8262_v40  ;;  %5867 = vmatprep.subr.bf16.mxu1 %v8265_v41  ;;  %v8353_v40 = vld [vmem:[%s9161_s6 + $0xfa4] ss:$16 sps:$4 sm:$0xff]   ;;  %v8356_v41 = vld [vmem:[%s9161_s6 + $0xfac] ss:$16 sps:$4 sm:$0xff]  }
 0x234   : > { %5376 = vmatpush1.bf16.msra.mxu0 %v8260_v22  ;;  %5868 = vmatpush1.bf16.msra.mxu1 %v8263_v42  ;;  %v8351_v22 = vld [vmem:[%s9161_s6 + $0xfa0] ss:$16 sps:$4 sm:$0xff]   ;;  %v8354_v42 = vld [vmem:[%s9161_s6 + $0xfa8] ss:$16 sps:$4 sm:$0xff]  }
 0x235   : > { %5377 = vmatprep.subr.bf16.mxu0 %v8268_v43  ;;  %5869 = vmatprep.subr.bf16.mxu1 %v8271_v45  ;;  %v8359_v43 = vld [vmem:[%s9161_s6 + $0xfc4] ss:$16 sps:$4 sm:$0xff]   ;;  %v8362_v45 = vld [vmem:[%s9161_s6 + $0xfcc] ss:$16 sps:$4 sm:$0xff]  }
 0x238   : > { %5378 = vmatpush1.bf16.msra.mxu0 %v8266_v36  ;;  %5870 = vmatpush1.bf16.msra.mxu1 %v8269_v46  ;;  %v9758_v36 = vld [vmem:[%s9154_s10 + $0x10] sm:$0xff] }
 0x239   : > { %5388 = vmatprep.subr.bf16.mxu0 %v8275_v47  ;;  %5880 = vmatprep.subr.bf16.mxu1 %v8278_v48  ;;  %v8357_v46 = vld [vmem:[%s9161_s6 + $0xfc0] ss:$16 sps:$4 sm:$0xff]   ;;  %v8360_v47 = vld [vmem:[%s9161_s6 + $0xfc8] ss:$16 sps:$4 sm:$0xff]   ;;  %v8365_v48 = vld [vmem:[%s9161_s6 + $0xfe4] ss:$16 sps:$4 sm:$0xff]  }
 0x23b   : > { %5380 = vmatmul.mubr.bf16.vlgmr.msra.gmra.mrb[0].mxu0 %v9695_v14  ;;  %5872 = vmatmul.mubr.bf16.vlgmr.msra.gmra.mrb[0].mxu1 %v9695_v14 }
 0x23c   : > { %5389 = vmatpush1.bf16.msra.mxu0 %v8273_v51  ;;  %5881 = vmatpush1.bf16.msra.mxu1 %v8276_v52  ;;  %v8368_v51 = vld [vmem:[%s9161_s6 + $0xfec] ss:$16 sps:$4 sm:$0xff]   ;;  %v9766_v52 = vrot.slane %v9758_v36, %v9219_v50 }
 0x23d   : > { %5390 = vmatprep.subr.bf16.mxu0 %v8281_v54  ;;  %5882 = vmatprep.subr.bf16.mxu1 %v8284_v55  ;;  %v8363_v54 = vld [vmem:[%s9161_s6 + $0xfe0] ss:$16 sps:$4 sm:$0xff]   ;;  %v8366_v55 = vld [vmem:[%s9161_s6 + $0xfe8] ss:$16 sps:$4 sm:$0xff]  }
 0x23e   : > { %5420 = vmatprep.mubr.bf16.mxu0 %v1187_v56  ;;  %5912 = vmatprep.mubr.bf16.mxu1 %v1187_v56  ;;  %v8371_v56 = vld [vmem:[%s9161_s6 + $0x1004] ss:$16 sps:$4 sm:$0xff]  }
 0x240   : > { %5391 = vmatpush1.bf16.msra.mxu0 %v8279_v39  ;;  %5883 = vmatpush1.bf16.msra.mxu1 %v8282_v57  ;;  %v8374_v39 = vld [vmem:[%s9161_s6 + $0x100c] ss:$16 sps:$4 sm:$0xff]   ;;  %v1203_v57 = vcombine.high %v9766_v52, %v9766_v52 }
 0x241   : > { %5392 = vmatprep.subr.bf16.mxu0 %v8287_v58  ;;  %5884 = vmatprep.subr.bf16.mxu1 %v8290_v59  ;;  %v1185_v58 = vcombine.high %v9695_v14, %v9695_v14  ;;  %v8369_v59 = vld [vmem:[%s9161_s6 + $0x1000] ss:$16 sps:$4 sm:$0xff]  }
 0x242   : > { %v8375_v14 = vld [vmem:[%s9161_s6 + $0x1020] ss:$16 sps:$4 sm:$0xff]  }
 0x244   : > { %5393 = vmatpush1.bf16.msra.mxu0 %v8285_v49  ;;  %5885 = vmatpush1.bf16.msra.mxu1 %v8288_v60  ;;  %v8372_v49 = vld [vmem:[%s9161_s6 + $0x1008] ss:$16 sps:$4 sm:$0xff]   ;;  %v8377_v60 = vld [vmem:[%s9161_s6 + $0x1024] ss:$16 sps:$4 sm:$0xff]  }
 0x245   : > { %5394 = vmatprep.subr.bf16.mxu0 %v8293_v61  ;;  %5886 = vmatprep.subr.bf16.mxu1 %v8296_v62  ;;  %v8380_v61 = vld [vmem:[%s9161_s6 + $0x102c] ss:$16 sps:$4 sm:$0xff]   ;;  %v9781_v62 = vrot.slane %v1203_v57, %v9219_v50  ;;  %v8456_v57 = vld [vmem:[%s9161_s6 + $0x11c8] ss:$16 sps:$4 sm:$0xff]  }
 0x248   : > { %5395 = vmatpush1.bf16.msra.mxu0 %v8291_v63  ;;  %5887 = vmatpush1.bf16.msra.mxu1 %v8294_v0  ;;  %v8378_v63 = vld [vmem:[%s9161_s6 + $0x1028] ss:$16 sps:$4 sm:$0xff]   ;;  %v8383_v0 = vld [vmem:[%s9161_s6 + $0x1044] ss:$16 sps:$4 sm:$0xff]  }
 0x249   : > { %5396 = vmatprep.subr.bf16.mxu0 %v8299_v1  ;;  %5888 = vmatprep.subr.bf16.mxu1 %v8302_v2  ;;  %v8386_v1 = vld [vmem:[%s9161_s6 + $0x104c] ss:$16 sps:$4 sm:$0xff]   ;;  %v8381_v2 = vld [vmem:[%s9161_s6 + $0x1040] ss:$16 sps:$4 sm:$0xff]  }
 0x24c   : > { %5397 = vmatpush1.bf16.msra.mxu0 %v8297_v3  ;;  %5889 = vmatpush1.bf16.msra.mxu1 %v8300_v4  ;;  %v8384_v3 = vld [vmem:[%s9161_s6 + $0x1048] ss:$16 sps:$4 sm:$0xff]   ;;  %v8389_v4 = vld [vmem:[%s9161_s6 + $0x1064] ss:$16 sps:$4 sm:$0xff]  }
 0x24d   : > { %5398 = vmatprep.subr.bf16.mxu0 %v8305_v5  ;;  %5890 = vmatprep.subr.bf16.mxu1 %v8308_v6  ;;  %v8392_v5 = vld [vmem:[%s9161_s6 + $0x106c] ss:$16 sps:$4 sm:$0xff]   ;;  %v8387_v6 = vld [vmem:[%s9161_s6 + $0x1060] ss:$16 sps:$4 sm:$0xff]  }
 0x250   : > { %5399 = vmatpush1.bf16.msra.mxu0 %v8303_v7  ;;  %5891 = vmatpush1.bf16.msra.mxu1 %v8306_v8  ;;  %v8390_v7 = vld [vmem:[%s9161_s6 + $0x1068] ss:$16 sps:$4 sm:$0xff]   ;;  %v8395_v8 = vld [vmem:[%s9161_s6 + $0x1084] ss:$16 sps:$4 sm:$0xff]  }
 0x251   : > { %5400 = vmatprep.subr.bf16.mxu0 %v8311_v9  ;;  %5892 = vmatprep.subr.bf16.mxu1 %v8314_v10  ;;  %v8398_v9 = vld [vmem:[%s9161_s6 + $0x108c] ss:$16 sps:$4 sm:$0xff]   ;;  %v8393_v10 = vld [vmem:[%s9161_s6 + $0x1080] ss:$16 sps:$4 sm:$0xff]  }
 0x254   : > { %5401 = vmatpush1.bf16.msra.mxu0 %v8309_v11  ;;  %5893 = vmatpush1.bf16.msra.mxu1 %v8312_v12  ;;  %v8396_v11 = vld [vmem:[%s9161_s6 + $0x1088] ss:$16 sps:$4 sm:$0xff]   ;;  %v8401_v12 = vld [vmem:[%s9161_s6 + $0x10a4] ss:$16 sps:$4 sm:$0xff]  }
 0x255   : > { %5402 = vmatprep.subr.bf16.mxu0 %v8317_v13  ;;  %5894 = vmatprep.subr.bf16.mxu1 %v8320_v15  ;;  %v8404_v13 = vld [vmem:[%s9161_s6 + $0x10ac] ss:$16 sps:$4 sm:$0xff]   ;;  %v8399_v15 = vld [vmem:[%s9161_s6 + $0x10a0] ss:$16 sps:$4 sm:$0xff]  }
 0x258   : > { %5403 = vmatpush1.bf16.msra.mxu0 %v8315_v17  ;;  %5895 = vmatpush1.bf16.msra.mxu1 %v8318_v53  ;;  %v8402_v17 = vld [vmem:[%s9161_s6 + $0x10a8] ss:$16 sps:$4 sm:$0xff]   ;;  %v8407_v53 = vld [vmem:[%s9161_s6 + $0x10c4] ss:$16 sps:$4 sm:$0xff]  }
 0x259   : > { %5404 = vmatprep.subr.bf16.mxu0 %v8323_v18  ;;  %5896 = vmatprep.subr.bf16.mxu1 %v8326_v19  ;;  %v8410_v18 = vld [vmem:[%s9161_s6 + $0x10cc] ss:$16 sps:$4 sm:$0xff]   ;;  %v8405_v19 = vld [vmem:[%s9161_s6 + $0x10c0] ss:$16 sps:$4 sm:$0xff]  }
 0x25c   : > { %5405 = vmatpush1.bf16.msra.mxu0 %v8321_v20  ;;  %5897 = vmatpush1.bf16.msra.mxu1 %v8324_v21  ;;  %v8408_v20 = vld [vmem:[%s9161_s6 + $0x10c8] ss:$16 sps:$4 sm:$0xff]   ;;  %v8413_v21 = vld [vmem:[%s9161_s6 + $0x10e4] ss:$16 sps:$4 sm:$0xff]  }
 0x25d   : > { %5406 = vmatprep.subr.bf16.mxu0 %v8329_v23  ;;  %5898 = vmatprep.subr.bf16.mxu1 %v8332_v24  ;;  %v8416_v23 = vld [vmem:[%s9161_s6 + $0x10ec] ss:$16 sps:$4 sm:$0xff]   ;;  %v8411_v24 = vld [vmem:[%s9161_s6 + $0x10e0] ss:$16 sps:$4 sm:$0xff]  }
 0x260   : > { %5407 = vmatpush1.bf16.msra.mxu0 %v8327_v25  ;;  %5899 = vmatpush1.bf16.msra.mxu1 %v8330_v27  ;;  %v8414_v25 = vld [vmem:[%s9161_s6 + $0x10e8] ss:$16 sps:$4 sm:$0xff]   ;;  %v8419_v27 = vld [vmem:[%s9161_s6 + $0x1104] ss:$16 sps:$4 sm:$0xff]  }
 0x261   : > { %5408 = vmatprep.subr.bf16.mxu0 %v8335_v28  ;;  %5900 = vmatprep.subr.bf16.mxu1 %v8338_v29  ;;  %v8422_v28 = vld [vmem:[%s9161_s6 + $0x110c] ss:$16 sps:$4 sm:$0xff]   ;;  %v8417_v29 = vld [vmem:[%s9161_s6 + $0x1100] ss:$16 sps:$4 sm:$0xff]  }
 0x264   : > { %5409 = vmatpush1.bf16.msra.mxu0 %v8333_v30  ;;  %5901 = vmatpush1.bf16.msra.mxu1 %v8336_v31  ;;  %v8420_v30 = vld [vmem:[%s9161_s6 + $0x1108] ss:$16 sps:$4 sm:$0xff]   ;;  %v8425_v31 = vld [vmem:[%s9161_s6 + $0x1124] ss:$16 sps:$4 sm:$0xff]  }
 0x265   : > { %5410 = vmatprep.subr.bf16.mxu0 %v8341_v16  ;;  %5902 = vmatprep.subr.bf16.mxu1 %v8344_v32  ;;  %v8428_v16 = vld [vmem:[%s9161_s6 + $0x112c] ss:$16 sps:$4 sm:$0xff]   ;;  %v8423_v32 = vld [vmem:[%s9161_s6 + $0x1120] ss:$16 sps:$4 sm:$0xff]  }
 0x268   : > { %5411 = vmatpush1.bf16.msra.mxu0 %v8339_v33  ;;  %5903 = vmatpush1.bf16.msra.mxu1 %v8342_v34  ;;  %v8426_v33 = vld [vmem:[%s9161_s6 + $0x1128] ss:$16 sps:$4 sm:$0xff]   ;;  %v8431_v34 = vld [vmem:[%s9161_s6 + $0x1144] ss:$16 sps:$4 sm:$0xff]  }
 0x269   : > { %5412 = vmatprep.subr.bf16.mxu0 %v8347_v26  ;;  %5904 = vmatprep.subr.bf16.mxu1 %v8350_v35  ;;  %v8434_v26 = vld [vmem:[%s9161_s6 + $0x114c] ss:$16 sps:$4 sm:$0xff]   ;;  %v8429_v35 = vld [vmem:[%s9161_s6 + $0x1140] ss:$16 sps:$4 sm:$0xff]  }
 0x26c   : > { %5413 = vmatpush1.bf16.msra.mxu0 %v8345_v37  ;;  %5905 = vmatpush1.bf16.msra.mxu1 %v8348_v38  ;;  %v8432_v37 = vld [vmem:[%s9161_s6 + $0x1148] ss:$16 sps:$4 sm:$0xff]   ;;  %v8437_v38 = vld [vmem:[%s9161_s6 + $0x1164] ss:$16 sps:$4 sm:$0xff]  }
 0x26d   : > { %5414 = vmatprep.subr.bf16.mxu0 %v8353_v40  ;;  %5906 = vmatprep.subr.bf16.mxu1 %v8356_v41  ;;  %v8440_v40 = vld [vmem:[%s9161_s6 + $0x116c] ss:$16 sps:$4 sm:$0xff]   ;;  %v8435_v41 = vld [vmem:[%s9161_s6 + $0x1160] ss:$16 sps:$4 sm:$0xff]  }
 0x270   : > { %5415 = vmatpush1.bf16.msra.mxu0 %v8351_v22  ;;  %5907 = vmatpush1.bf16.msra.mxu1 %v8354_v42  ;;  %v8438_v22 = vld [vmem:[%s9161_s6 + $0x1168] ss:$16 sps:$4 sm:$0xff]   ;;  %v8443_v42 = vld [vmem:[%s9161_s6 + $0x1184] ss:$16 sps:$4 sm:$0xff]  }
 0x271   : > { %5416 = vmatprep.subr.bf16.mxu0 %v8359_v43  ;;  %5908 = vmatprep.subr.bf16.mxu1 %v8362_v45  ;;  %v8446_v43 = vld [vmem:[%s9161_s6 + $0x118c] ss:$16 sps:$4 sm:$0xff]   ;;  %v8441_v45 = vld [vmem:[%s9161_s6 + $0x1180] ss:$16 sps:$4 sm:$0xff]  }
 0x274   : > { %5417 = vmatpush1.bf16.msra.mxu0 %v8357_v46  ;;  %5909 = vmatpush1.bf16.msra.mxu1 %v8360_v47  ;;  %v8444_v46 = vld [vmem:[%s9161_s6 + $0x1188] ss:$16 sps:$4 sm:$0xff]   ;;  %v8449_v47 = vld [vmem:[%s9161_s6 + $0x11a4] ss:$16 sps:$4 sm:$0xff]  }
 0x275   : > { %5418 = vmatprep.subr.bf16.mxu0 %v8365_v48  ;;  %5910 = vmatprep.subr.bf16.mxu1 %v8368_v51  ;;  %v8452_v48 = vld [vmem:[%s9161_s6 + $0x11ac] ss:$16 sps:$4 sm:$0xff]   ;;  %v8447_v51 = vld [vmem:[%s9161_s6 + $0x11a0] ss:$16 sps:$4 sm:$0xff]  }
 0x278   : > { %5419 = vmatpush1.bf16.msra.mxu0 %v8363_v54  ;;  %5911 = vmatpush1.bf16.msra.mxu1 %v8366_v55  ;;  %v8450_v54 = vld [vmem:[%s9161_s6 + $0x11a8] ss:$16 sps:$4 sm:$0xff]   ;;  %v8455_v55 = vld [vmem:[%s9161_s6 + $0x11c4] ss:$16 sps:$4 sm:$0xff]  }
 0x279   : > { %5429 = vmatprep.subr.bf16.mxu0 %v8371_v56  ;;  %5921 = vmatprep.subr.bf16.mxu1 %v8374_v39  ;;  %v8458_v56 = vld [vmem:[%s9161_s6 + $0x11cc] ss:$16 sps:$4 sm:$0xff]   ;;  %v8453_v39 = vld [vmem:[%s9161_s6 + $0x11c0] ss:$16 sps:$4 sm:$0xff]  }
 0x27b   : > { %5421 = vmatmul.mubr.bf16.vlgmr.msra.gmra.mrb[0].mxu0 %v1185_v58  ;;  %5913 = vmatmul.mubr.bf16.vlgmr.msra.gmra.mrb[0].mxu1 %v1185_v58  ;;  %v8461_v58 = vld [vmem:[%s9161_s6 + $0x11e4] ss:$16 sps:$4 sm:$0xff]  }
 0x27c   : > { %5430 = vmatpush1.bf16.msra.mxu0 %v8369_v59  ;;  %5922 = vmatpush1.bf16.msra.mxu1 %v8372_v49  ;;  %v8464_v59 = vld [vmem:[%s9161_s6 + $0x11ec] ss:$16 sps:$4 sm:$0xff]   ;;  %v8459_v49 = vld [vmem:[%s9161_s6 + $0x11e0] ss:$16 sps:$4 sm:$0xff]  }
 0x27d   : > { %5431 = vmatprep.subr.bf16.mxu0 %v8377_v60  ;;  %5923 = vmatprep.subr.bf16.mxu1 %v8380_v61  ;;  %v8462_v60 = vld [vmem:[%s9161_s6 + $0x11e8] ss:$16 sps:$4 sm:$0xff]   ;;  %v8467_v61 = vld [vmem:[%s9161_s6 + $0x1204] ss:$16 sps:$4 sm:$0xff]  }
 0x27e   : > { %5461 = vmatprep.mubr.bf16.mxu0 %v9781_v62  ;;  %5953 = vmatprep.mubr.bf16.mxu1 %v9781_v62 }
 0x280   : > { %5432 = vmatpush1.bf16.msra.mxu0 %v8375_v14  ;;  %5924 = vmatpush1.bf16.msra.mxu1 %v8378_v63  ;;  %v8470_v14 = vld [vmem:[%s9161_s6 + $0x120c] ss:$16 sps:$4 sm:$0xff]   ;;  %v9847_v63 = vrot.slane %v9766_v52, %v9219_v50  ;;  %v8471_v52 = vld [vmem:[%s9161_s6 + $0x1220] ss:$16 sps:$4 sm:$0xff]  }
 0x281   : > { %5433 = vmatprep.subr.bf16.mxu0 %v8383_v0  ;;  %5925 = vmatprep.subr.bf16.mxu1 %v8386_v1  ;;  %v8465_v0 = vld [vmem:[%s9161_s6 + $0x1200] ss:$16 sps:$4 sm:$0xff]   ;;  %v8468_v1 = vld [vmem:[%s9161_s6 + $0x1208] ss:$16 sps:$4 sm:$0xff]  }
 0x284   : > { %5434 = vmatpush1.bf16.msra.mxu0 %v8381_v2  ;;  %5926 = vmatpush1.bf16.msra.mxu1 %v8384_v3  ;;  %v8473_v2 = vld [vmem:[%s9161_s6 + $0x1224] ss:$16 sps:$4 sm:$0xff]   ;;  %v8476_v3 = vld [vmem:[%s9161_s6 + $0x122c] ss:$16 sps:$4 sm:$0xff]  }
 0x285   : > { %5435 = vmatprep.subr.bf16.mxu0 %v8389_v4  ;;  %5927 = vmatprep.subr.bf16.mxu1 %v8392_v5  ;;  %v1235_v4 = vcombine.high %v9781_v62, %v9781_v62  ;;  %v8474_v5 = vld [vmem:[%s9161_s6 + $0x1228] ss:$16 sps:$4 sm:$0xff]   ;;  %v8477_v62 = vld [vmem:[%s9161_s6 + $0x1240] ss:$16 sps:$4 sm:$0xff]  }
 0x288   : > { %5436 = vmatpush1.bf16.msra.mxu0 %v8387_v6  ;;  %5928 = vmatpush1.bf16.msra.mxu1 %v8390_v7  ;;  %v8479_v6 = vld [vmem:[%s9161_s6 + $0x1244] ss:$16 sps:$4 sm:$0xff]   ;;  %v8482_v7 = vld [vmem:[%s9161_s6 + $0x124c] ss:$16 sps:$4 sm:$0xff]  }
 0x289   : > { %5437 = vmatprep.subr.bf16.mxu0 %v8395_v8  ;;  %5929 = vmatprep.subr.bf16.mxu1 %v8398_v9  ;;  %v8480_v8 = vld [vmem:[%s9161_s6 + $0x1248] ss:$16 sps:$4 sm:$0xff]   ;;  %v8485_v9 = vld [vmem:[%s9161_s6 + $0x1264] ss:$16 sps:$4 sm:$0xff]  }
 0x28c   : > { %5438 = vmatpush1.bf16.msra.mxu0 %v8393_v10  ;;  %5930 = vmatpush1.bf16.msra.mxu1 %v8396_v11  ;;  %v8488_v10 = vld [vmem:[%s9161_s6 + $0x126c] ss:$16 sps:$4 sm:$0xff]   ;;  %v8483_v11 = vld [vmem:[%s9161_s6 + $0x1260] ss:$16 sps:$4 sm:$0xff]  }
 0x28d   : > { %5439 = vmatprep.subr.bf16.mxu0 %v8401_v12  ;;  %5931 = vmatprep.subr.bf16.mxu1 %v8404_v13  ;;  %v8486_v12 = vld [vmem:[%s9161_s6 + $0x1268] ss:$16 sps:$4 sm:$0xff]   ;;  %v8491_v13 = vld [vmem:[%s9161_s6 + $0x1284] ss:$16 sps:$4 sm:$0xff]  }
 0x290   : > { %5440 = vmatpush1.bf16.msra.mxu0 %v8399_v15  ;;  %5932 = vmatpush1.bf16.msra.mxu1 %v8402_v17  ;;  %v8494_v15 = vld [vmem:[%s9161_s6 + $0x128c] ss:$16 sps:$4 sm:$0xff]   ;;  %v8489_v17 = vld [vmem:[%s9161_s6 + $0x1280] ss:$16 sps:$4 sm:$0xff]  }
 0x291   : > { %5441 = vmatprep.subr.bf16.mxu0 %v8407_v53  ;;  %5933 = vmatprep.subr.bf16.mxu1 %v8410_v18  ;;  %v8492_v53 = vld [vmem:[%s9161_s6 + $0x1288] ss:$16 sps:$4 sm:$0xff]   ;;  %v8497_v18 = vld [vmem:[%s9161_s6 + $0x12a4] ss:$16 sps:$4 sm:$0xff]  }
 0x294   : > { %5442 = vmatpush1.bf16.msra.mxu0 %v8405_v19  ;;  %5934 = vmatpush1.bf16.msra.mxu1 %v8408_v20  ;;  %v8500_v19 = vld [vmem:[%s9161_s6 + $0x12ac] ss:$16 sps:$4 sm:$0xff]   ;;  %v8495_v20 = vld [vmem:[%s9161_s6 + $0x12a0] ss:$16 sps:$4 sm:$0xff]  }
 0x295   : > { %5443 = vmatprep.subr.bf16.mxu0 %v8413_v21  ;;  %5935 = vmatprep.subr.bf16.mxu1 %v8416_v23  ;;  %v8498_v21 = vld [vmem:[%s9161_s6 + $0x12a8] ss:$16 sps:$4 sm:$0xff]   ;;  %v8503_v23 = vld [vmem:[%s9161_s6 + $0x12c4] ss:$16 sps:$4 sm:$0xff]  }
 0x298   : > { %5444 = vmatpush1.bf16.msra.mxu0 %v8411_v24  ;;  %5936 = vmatpush1.bf16.msra.mxu1 %v8414_v25  ;;  %v8506_v24 = vld [vmem:[%s9161_s6 + $0x12cc] ss:$16 sps:$4 sm:$0xff]   ;;  %v8501_v25 = vld [vmem:[%s9161_s6 + $0x12c0] ss:$16 sps:$4 sm:$0xff]  }
 0x299   : > { %5445 = vmatprep.subr.bf16.mxu0 %v8419_v27  ;;  %5937 = vmatprep.subr.bf16.mxu1 %v8422_v28  ;;  %v8504_v27 = vld [vmem:[%s9161_s6 + $0x12c8] ss:$16 sps:$4 sm:$0xff]   ;;  %v8509_v28 = vld [vmem:[%s9161_s6 + $0x12e4] ss:$16 sps:$4 sm:$0xff]  }
 0x29c   : > { %5446 = vmatpush1.bf16.msra.mxu0 %v8417_v29  ;;  %5938 = vmatpush1.bf16.msra.mxu1 %v8420_v30  ;;  %v8512_v29 = vld [vmem:[%s9161_s6 + $0x12ec] ss:$16 sps:$4 sm:$0xff]   ;;  %v8507_v30 = vld [vmem:[%s9161_s6 + $0x12e0] ss:$16 sps:$4 sm:$0xff]  }
 0x29d   : > { %5447 = vmatprep.subr.bf16.mxu0 %v8425_v31  ;;  %5939 = vmatprep.subr.bf16.mxu1 %v8428_v16  ;;  %v8510_v31 = vld [vmem:[%s9161_s6 + $0x12e8] ss:$16 sps:$4 sm:$0xff]   ;;  %v8515_v16 = vld [vmem:[%s9161_s6 + $0x1304] ss:$16 sps:$4 sm:$0xff]  }
 0x2a0   : > { %5448 = vmatpush1.bf16.msra.mxu0 %v8423_v32  ;;  %5940 = vmatpush1.bf16.msra.mxu1 %v8426_v33  ;;  %v8518_v32 = vld [vmem:[%s9161_s6 + $0x130c] ss:$16 sps:$4 sm:$0xff]   ;;  %v8513_v33 = vld [vmem:[%s9161_s6 + $0x1300] ss:$16 sps:$4 sm:$0xff]  }
 0x2a1   : > { %5449 = vmatprep.subr.bf16.mxu0 %v8431_v34  ;;  %5941 = vmatprep.subr.bf16.mxu1 %v8434_v26  ;;  %v8516_v34 = vld [vmem:[%s9161_s6 + $0x1308] ss:$16 sps:$4 sm:$0xff]   ;;  %v8521_v26 = vld [vmem:[%s9161_s6 + $0x1324] ss:$16 sps:$4 sm:$0xff]  }
 0x2a4   : > { %5450 = vmatpush1.bf16.msra.mxu0 %v8429_v35  ;;  %5942 = vmatpush1.bf16.msra.mxu1 %v8432_v37  ;;  %v8524_v35 = vld [vmem:[%s9161_s6 + $0x132c] ss:$16 sps:$4 sm:$0xff]   ;;  %v8519_v37 = vld [vmem:[%s9161_s6 + $0x1320] ss:$16 sps:$4 sm:$0xff]  }
 0x2a5   : > { %5451 = vmatprep.subr.bf16.mxu0 %v8437_v38  ;;  %5943 = vmatprep.subr.bf16.mxu1 %v8440_v40  ;;  %v8522_v38 = vld [vmem:[%s9161_s6 + $0x1328] ss:$16 sps:$4 sm:$0xff]   ;;  %v8527_v40 = vld [vmem:[%s9161_s6 + $0x1344] ss:$16 sps:$4 sm:$0xff]  }
 0x2a8   : > { %5452 = vmatpush1.bf16.msra.mxu0 %v8435_v41  ;;  %5944 = vmatpush1.bf16.msra.mxu1 %v8438_v22  ;;  %v8530_v41 = vld [vmem:[%s9161_s6 + $0x134c] ss:$16 sps:$4 sm:$0xff]   ;;  %v8525_v22 = vld [vmem:[%s9161_s6 + $0x1340] ss:$16 sps:$4 sm:$0xff]  }
 0x2a9   : > { %5453 = vmatprep.subr.bf16.mxu0 %v8443_v42  ;;  %5945 = vmatprep.subr.bf16.mxu1 %v8446_v43  ;;  %v8528_v42 = vld [vmem:[%s9161_s6 + $0x1348] ss:$16 sps:$4 sm:$0xff]   ;;  %v8533_v43 = vld [vmem:[%s9161_s6 + $0x1364] ss:$16 sps:$4 sm:$0xff]  }
 0x2ac   : > { %5454 = vmatpush1.bf16.msra.mxu0 %v8441_v45  ;;  %5946 = vmatpush1.bf16.msra.mxu1 %v8444_v46  ;;  %v8536_v45 = vld [vmem:[%s9161_s6 + $0x136c] ss:$16 sps:$4 sm:$0xff]   ;;  %v8531_v46 = vld [vmem:[%s9161_s6 + $0x1360] ss:$16 sps:$4 sm:$0xff]  }
 0x2ad   : > { %5455 = vmatprep.subr.bf16.mxu0 %v8449_v47  ;;  %5947 = vmatprep.subr.bf16.mxu1 %v8452_v48  ;;  %v8534_v47 = vld [vmem:[%s9161_s6 + $0x1368] ss:$16 sps:$4 sm:$0xff]   ;;  %v8539_v48 = vld [vmem:[%s9161_s6 + $0x1384] ss:$16 sps:$4 sm:$0xff]  }
 0x2b0   : > { %5456 = vmatpush1.bf16.msra.mxu0 %v8447_v51  ;;  %5948 = vmatpush1.bf16.msra.mxu1 %v8450_v54  ;;  %v8542_v51 = vld [vmem:[%s9161_s6 + $0x138c] ss:$16 sps:$4 sm:$0xff]   ;;  %v8537_v54 = vld [vmem:[%s9161_s6 + $0x1380] ss:$16 sps:$4 sm:$0xff]  }
 0x2b1   : > { %5457 = vmatprep.subr.bf16.mxu0 %v8455_v55  ;;  %5949 = vmatprep.subr.bf16.mxu1 %v8458_v56  ;;  %v8540_v55 = vld [vmem:[%s9161_s6 + $0x1388] ss:$16 sps:$4 sm:$0xff]   ;;  %v8545_v56 = vld [vmem:[%s9161_s6 + $0x13a4] ss:$16 sps:$4 sm:$0xff]  }
 0x2b4   : > { %5458 = vmatpush1.bf16.msra.mxu0 %v8453_v39  ;;  %5950 = vmatpush1.bf16.msra.mxu1 %v8456_v57  ;;  %v8548_v39 = vld [vmem:[%s9161_s6 + $0x13ac] ss:$16 sps:$4 sm:$0xff]   ;;  %v8543_v57 = vld [vmem:[%s9161_s6 + $0x13a0] ss:$16 sps:$4 sm:$0xff]  }
 0x2b5   : > { %5459 = vmatprep.subr.bf16.mxu0 %v8461_v58  ;;  %5951 = vmatprep.subr.bf16.mxu1 %v8464_v59  ;;  %v8546_v58 = vld [vmem:[%s9161_s6 + $0x13a8] ss:$16 sps:$4 sm:$0xff]   ;;  %v8551_v59 = vld [vmem:[%s9161_s6 + $0x13c4] ss:$16 sps:$4 sm:$0xff]  }
 0x2b8   : > { %5460 = vmatpush1.bf16.msra.mxu0 %v8459_v49  ;;  %5952 = vmatpush1.bf16.msra.mxu1 %v8462_v60  ;;  %v8554_v49 = vld [vmem:[%s9161_s6 + $0x13cc] ss:$16 sps:$4 sm:$0xff]   ;;  %v1188_v60 = vcombine.high %v9758_v36, %v9758_v36  ;;  %v8555_v36 = vld [vmem:[%s9161_s6 + $0x13e0] ss:$16 sps:$4 sm:$0xff]  }
 0x2b9   : > { %5470 = vmatprep.subr.bf16.mxu0 %v8467_v61  ;;  %5962 = vmatprep.subr.bf16.mxu1 %v8470_v14  ;;  %v8549_v61 = vld [vmem:[%s9161_s6 + $0x13c0] ss:$16 sps:$4 sm:$0xff]   ;;  %v8552_v14 = vld [vmem:[%s9161_s6 + $0x13c8] ss:$16 sps:$4 sm:$0xff]  }
 0x2bb   : > { %5462 = vmatmul.mubr.bf16.vlgmr.msra.gmra.mrb[0].mxu0 %v9847_v63  ;;  %5954 = vmatmul.mubr.bf16.vlgmr.msra.gmra.mrb[0].mxu1 %v9847_v63 }
 0x2bc   : > { %5471 = vmatpush1.bf16.msra.mxu0 %v8465_v0  ;;  %5963 = vmatpush1.bf16.msra.mxu1 %v8468_v1  ;;  %v8557_v0 = vld [vmem:[%s9161_s6 + $0x13e4] ss:$16 sps:$4 sm:$0xff]   ;;  %v8560_v1 = vld [vmem:[%s9161_s6 + $0x13ec] ss:$16 sps:$4 sm:$0xff]  }
 0x2bd   : > { %5472 = vmatprep.subr.bf16.mxu0 %v8473_v2  ;;  %5964 = vmatprep.subr.bf16.mxu1 %v8476_v3  ;;  %v9916_v2 = vrot.slane %v1188_v60, %v9219_v50  ;;  %v8558_v3 = vld [vmem:[%s9161_s6 + $0x13e8] ss:$16 sps:$4 sm:$0xff]  }
 0x2be   : > { %5502 = vmatprep.mubr.bf16.mxu0 %v1235_v4  ;;  %5994 = vmatprep.mubr.bf16.mxu1 %v1235_v4  ;;  %v8563_v4 = vld [vmem:[%s9161_s6 + $0x1404] ss:$16 sps:$4 sm:$0xff]   ;;  %v8636_v60 = vld [vmem:[%s9161_s6 + $0x1588] ss:$16 sps:$4 sm:$0xff]  }
 0x2c0   : > { %5473 = vmatpush1.bf16.msra.mxu0 %v8471_v52  ;;  %5965 = vmatpush1.bf16.msra.mxu1 %v8474_v5  ;;  %v8566_v52 = vld [vmem:[%s9161_s6 + $0x140c] ss:$16 sps:$4 sm:$0xff]   ;;  %v1204_v5 = vcombine.high %v9916_v2, %v9916_v2 }
 0x2c1   : > { %5474 = vmatprep.subr.bf16.mxu0 %v8479_v6  ;;  %5966 = vmatprep.subr.bf16.mxu1 %v8482_v7  ;;  %v1233_v6 = vcombine.high %v9847_v63, %v9847_v63  ;;  %v8561_v7 = vld [vmem:[%s9161_s6 + $0x1400] ss:$16 sps:$4 sm:$0xff]  }
 0x2c2   : > { %v8567_v63 = vld [vmem:[%s9161_s6 + $0x1420] ss:$16 sps:$4 sm:$0xff]  }
 0x2c4   : > { %5475 = vmatpush1.bf16.msra.mxu0 %v8477_v62  ;;  %5967 = vmatpush1.bf16.msra.mxu1 %v8480_v8  ;;  %v8564_v62 = vld [vmem:[%s9161_s6 + $0x1408] ss:$16 sps:$4 sm:$0xff]   ;;  %v8569_v8 = vld [vmem:[%s9161_s6 + $0x1424] ss:$16 sps:$4 sm:$0xff]  }
 0x2c5   : > { %5476 = vmatprep.subr.bf16.mxu0 %v8485_v9  ;;  %5968 = vmatprep.subr.bf16.mxu1 %v8488_v10  ;;  %v8572_v9 = vld [vmem:[%s9161_s6 + $0x142c] ss:$16 sps:$4 sm:$0xff]   ;;  %v9931_v10 = vrot.slane %v1204_v5, %v9219_v50  ;;  %v8653_v5 = vld [vmem:[%s9161_s6 + $0x15e4] ss:$16 sps:$4 sm:$0xff]  }
 0x2c8   : > { %5477 = vmatpush1.bf16.msra.mxu0 %v8483_v11  ;;  %5969 = vmatpush1.bf16.msra.mxu1 %v8486_v12  ;;  %v8570_v11 = vld [vmem:[%s9161_s6 + $0x1428] ss:$16 sps:$4 sm:$0xff]   ;;  %v8575_v12 = vld [vmem:[%s9161_s6 + $0x1444] ss:$16 sps:$4 sm:$0xff]  }
 0x2c9   : > { %5478 = vmatprep.subr.bf16.mxu0 %v8491_v13  ;;  %5970 = vmatprep.subr.bf16.mxu1 %v8494_v15  ;;  %v8578_v13 = vld [vmem:[%s9161_s6 + $0x144c] ss:$16 sps:$4 sm:$0xff]   ;;  %v8573_v15 = vld [vmem:[%s9161_s6 + $0x1440] ss:$16 sps:$4 sm:$0xff]  }
 0x2cc   : > { %5479 = vmatpush1.bf16.msra.mxu0 %v8489_v17  ;;  %5971 = vmatpush1.bf16.msra.mxu1 %v8492_v53  ;;  %v8576_v17 = vld [vmem:[%s9161_s6 + $0x1448] ss:$16 sps:$4 sm:$0xff]   ;;  %v8581_v53 = vld [vmem:[%s9161_s6 + $0x1464] ss:$16 sps:$4 sm:$0xff]  }
 0x2cd   : > { %5480 = vmatprep.subr.bf16.mxu0 %v8497_v18  ;;  %5972 = vmatprep.subr.bf16.mxu1 %v8500_v19  ;;  %v8584_v18 = vld [vmem:[%s9161_s6 + $0x146c] ss:$16 sps:$4 sm:$0xff]   ;;  %v8579_v19 = vld [vmem:[%s9161_s6 + $0x1460] ss:$16 sps:$4 sm:$0xff]  }
 0x2d0   : > { %5481 = vmatpush1.bf16.msra.mxu0 %v8495_v20  ;;  %5973 = vmatpush1.bf16.msra.mxu1 %v8498_v21  ;;  %v8582_v20 = vld [vmem:[%s9161_s6 + $0x1468] ss:$16 sps:$4 sm:$0xff]   ;;  %v8587_v21 = vld [vmem:[%s9161_s6 + $0x1484] ss:$16 sps:$4 sm:$0xff]  }
 0x2d1   : > { %5482 = vmatprep.subr.bf16.mxu0 %v8503_v23  ;;  %5974 = vmatprep.subr.bf16.mxu1 %v8506_v24  ;;  %v8590_v23 = vld [vmem:[%s9161_s6 + $0x148c] ss:$16 sps:$4 sm:$0xff]   ;;  %v8585_v24 = vld [vmem:[%s9161_s6 + $0x1480] ss:$16 sps:$4 sm:$0xff]  }
 0x2d4   : > { %5483 = vmatpush1.bf16.msra.mxu0 %v8501_v25  ;;  %5975 = vmatpush1.bf16.msra.mxu1 %v8504_v27  ;;  %v8588_v25 = vld [vmem:[%s9161_s6 + $0x1488] ss:$16 sps:$4 sm:$0xff]   ;;  %v8593_v27 = vld [vmem:[%s9161_s6 + $0x14a4] ss:$16 sps:$4 sm:$0xff]  }
 0x2d5   : > { %5484 = vmatprep.subr.bf16.mxu0 %v8509_v28  ;;  %5976 = vmatprep.subr.bf16.mxu1 %v8512_v29  ;;  %v8596_v28 = vld [vmem:[%s9161_s6 + $0x14ac] ss:$16 sps:$4 sm:$0xff]   ;;  %v8591_v29 = vld [vmem:[%s9161_s6 + $0x14a0] ss:$16 sps:$4 sm:$0xff]  }
 0x2d8   : > { %5485 = vmatpush1.bf16.msra.mxu0 %v8507_v30  ;;  %5977 = vmatpush1.bf16.msra.mxu1 %v8510_v31  ;;  %v8594_v30 = vld [vmem:[%s9161_s6 + $0x14a8] ss:$16 sps:$4 sm:$0xff]   ;;  %v8599_v31 = vld [vmem:[%s9161_s6 + $0x14c4] ss:$16 sps:$4 sm:$0xff]  }
 0x2d9   : > { %5486 = vmatprep.subr.bf16.mxu0 %v8515_v16  ;;  %5978 = vmatprep.subr.bf16.mxu1 %v8518_v32  ;;  %v8602_v16 = vld [vmem:[%s9161_s6 + $0x14cc] ss:$16 sps:$4 sm:$0xff]   ;;  %v8597_v32 = vld [vmem:[%s9161_s6 + $0x14c0] ss:$16 sps:$4 sm:$0xff]  }
 0x2dc   : > { %5487 = vmatpush1.bf16.msra.mxu0 %v8513_v33  ;;  %5979 = vmatpush1.bf16.msra.mxu1 %v8516_v34  ;;  %v8600_v33 = vld [vmem:[%s9161_s6 + $0x14c8] ss:$16 sps:$4 sm:$0xff]   ;;  %v8605_v34 = vld [vmem:[%s9161_s6 + $0x14e4] ss:$16 sps:$4 sm:$0xff]  }
 0x2dd   : > { %5488 = vmatprep.subr.bf16.mxu0 %v8521_v26  ;;  %5980 = vmatprep.subr.bf16.mxu1 %v8524_v35  ;;  %v8608_v26 = vld [vmem:[%s9161_s6 + $0x14ec] ss:$16 sps:$4 sm:$0xff]   ;;  %v8603_v35 = vld [vmem:[%s9161_s6 + $0x14e0] ss:$16 sps:$4 sm:$0xff]  }
 0x2e0   : > { %5489 = vmatpush1.bf16.msra.mxu0 %v8519_v37  ;;  %5981 = vmatpush1.bf16.msra.mxu1 %v8522_v38  ;;  %v8606_v37 = vld [vmem:[%s9161_s6 + $0x14e8] ss:$16 sps:$4 sm:$0xff]   ;;  %v8611_v38 = vld [vmem:[%s9161_s6 + $0x1504] ss:$16 sps:$4 sm:$0xff]  }
 0x2e1   : > { %5490 = vmatprep.subr.bf16.mxu0 %v8527_v40  ;;  %5982 = vmatprep.subr.bf16.mxu1 %v8530_v41  ;;  %v8614_v40 = vld [vmem:[%s9161_s6 + $0x150c] ss:$16 sps:$4 sm:$0xff]   ;;  %v8609_v41 = vld [vmem:[%s9161_s6 + $0x1500] ss:$16 sps:$4 sm:$0xff]  }
 0x2e4   : > { %5491 = vmatpush1.bf16.msra.mxu0 %v8525_v22  ;;  %5983 = vmatpush1.bf16.msra.mxu1 %v8528_v42  ;;  %v8612_v22 = vld [vmem:[%s9161_s6 + $0x1508] ss:$16 sps:$4 sm:$0xff]   ;;  %v8617_v42 = vld [vmem:[%s9161_s6 + $0x1524] ss:$16 sps:$4 sm:$0xff]  }
 0x2e5   : > { %5492 = vmatprep.subr.bf16.mxu0 %v8533_v43  ;;  %5984 = vmatprep.subr.bf16.mxu1 %v8536_v45  ;;  %v8620_v43 = vld [vmem:[%s9161_s6 + $0x152c] ss:$16 sps:$4 sm:$0xff]   ;;  %v8615_v45 = vld [vmem:[%s9161_s6 + $0x1520] ss:$16 sps:$4 sm:$0xff]  }
 0x2e8   : > { %5493 = vmatpush1.bf16.msra.mxu0 %v8531_v46  ;;  %5985 = vmatpush1.bf16.msra.mxu1 %v8534_v47  ;;  %v8618_v46 = vld [vmem:[%s9161_s6 + $0x1528] ss:$16 sps:$4 sm:$0xff]   ;;  %v8623_v47 = vld [vmem:[%s9161_s6 + $0x1544] ss:$16 sps:$4 sm:$0xff]  }
 0x2e9   : > { %5494 = vmatprep.subr.bf16.mxu0 %v8539_v48  ;;  %5986 = vmatprep.subr.bf16.mxu1 %v8542_v51  ;;  %v8626_v48 = vld [vmem:[%s9161_s6 + $0x154c] ss:$16 sps:$4 sm:$0xff]   ;;  %v8621_v51 = vld [vmem:[%s9161_s6 + $0x1540] ss:$16 sps:$4 sm:$0xff]  }
 0x2ec   : > { %5495 = vmatpush1.bf16.msra.mxu0 %v8537_v54  ;;  %5987 = vmatpush1.bf16.msra.mxu1 %v8540_v55  ;;  %v8624_v54 = vld [vmem:[%s9161_s6 + $0x1548] ss:$16 sps:$4 sm:$0xff]   ;;  %v8629_v55 = vld [vmem:[%s9161_s6 + $0x1564] ss:$16 sps:$4 sm:$0xff]  }
 0x2ed   : > { %5496 = vmatprep.subr.bf16.mxu0 %v8545_v56  ;;  %5988 = vmatprep.subr.bf16.mxu1 %v8548_v39  ;;  %v8632_v56 = vld [vmem:[%s9161_s6 + $0x156c] ss:$16 sps:$4 sm:$0xff]   ;;  %v8627_v39 = vld [vmem:[%s9161_s6 + $0x1560] ss:$16 sps:$4 sm:$0xff]  }
 0x2f0   : > { %5497 = vmatpush1.bf16.msra.mxu0 %v8543_v57  ;;  %5989 = vmatpush1.bf16.msra.mxu1 %v8546_v58  ;;  %v8630_v57 = vld [vmem:[%s9161_s6 + $0x1568] ss:$16 sps:$4 sm:$0xff]   ;;  %v8635_v58 = vld [vmem:[%s9161_s6 + $0x1584] ss:$16 sps:$4 sm:$0xff]  }
 0x2f1   : > { %5498 = vmatprep.subr.bf16.mxu0 %v8551_v59  ;;  %5990 = vmatprep.subr.bf16.mxu1 %v8554_v49  ;;  %v8638_v59 = vld [vmem:[%s9161_s6 + $0x158c] ss:$16 sps:$4 sm:$0xff]   ;;  %v8633_v49 = vld [vmem:[%s9161_s6 + $0x1580] ss:$16 sps:$4 sm:$0xff]  }
 0x2f4   : > { %5499 = vmatpush1.bf16.msra.mxu0 %v8549_v61  ;;  %5991 = vmatpush1.bf16.msra.mxu1 %v8552_v14  ;;  %v8641_v61 = vld [vmem:[%s9161_s6 + $0x15a4] ss:$16 sps:$4 sm:$0xff]   ;;  %v8644_v14 = vld [vmem:[%s9161_s6 + $0x15ac] ss:$16 sps:$4 sm:$0xff]  }
 0x2f5   : > { %5500 = vmatprep.subr.bf16.mxu0 %v8557_v0  ;;  %5992 = vmatprep.subr.bf16.mxu1 %v8560_v1  ;;  %v8639_v0 = vld [vmem:[%s9161_s6 + $0x15a0] ss:$16 sps:$4 sm:$0xff]   ;;  %v8642_v1 = vld [vmem:[%s9161_s6 + $0x15a8] ss:$16 sps:$4 sm:$0xff]  }
 0x2f8   : > { %5501 = vmatpush1.bf16.msra.mxu0 %v8555_v36  ;;  %5993 = vmatpush1.bf16.msra.mxu1 %v8558_v3  ;;  %v8647_v36 = vld [vmem:[%s9161_s6 + $0x15c4] ss:$16 sps:$4 sm:$0xff]   ;;  %v8650_v3 = vld [vmem:[%s9161_s6 + $0x15cc] ss:$16 sps:$4 sm:$0xff]  }
 0x2f9   : > { %5511 = vmatprep.subr.bf16.mxu0 %v8563_v4  ;;  %6003 = vmatprep.subr.bf16.mxu1 %v8566_v52  ;;  %v8645_v4 = vld [vmem:[%s9161_s6 + $0x15c0] ss:$16 sps:$4 sm:$0xff]   ;;  %v8648_v52 = vld [vmem:[%s9161_s6 + $0x15c8] ss:$16 sps:$4 sm:$0xff]  }
 0x2fb   : > { %5503 = vmatmul.mubr.bf16.vlgmr.msra.gmra.mrb[0].mxu0 %v1233_v6  ;;  %5995 = vmatmul.mubr.bf16.vlgmr.msra.gmra.mrb[0].mxu1 %v1233_v6  ;;  %v8656_v6 = vld [vmem:[%s9161_s6 + $0x15ec] ss:$16 sps:$4 sm:$0xff]  }
 0x2fc   : > { %5512 = vmatpush1.bf16.msra.mxu0 %v8561_v7  ;;  %6004 = vmatpush1.bf16.msra.mxu1 %v8564_v62  ;;  %v8651_v7 = vld [vmem:[%s9161_s6 + $0x15e0] ss:$16 sps:$4 sm:$0xff]   ;;  %v8654_v62 = vld [vmem:[%s9161_s6 + $0x15e8] ss:$16 sps:$4 sm:$0xff]  }
 0x2fd   : > { %5513 = vmatprep.subr.bf16.mxu0 %v8569_v8  ;;  %6005 = vmatprep.subr.bf16.mxu1 %v8572_v9  ;;  %v8660_v8 = vld [vmem:[%s9161_s6 + $0x1604] ss:$16 sps:$4 sm:$0xff]   ;;  %v8663_v9 = vld [vmem:[%s9161_s6 + $0x160c] ss:$16 sps:$4 sm:$0xff]  }
 0x2fe   : > { %5543 = vmatprep.mubr.bf16.mxu0 %v9931_v10  ;;  %6035 = vmatprep.mubr.bf16.mxu1 %v9931_v10 }
 0x300   : > { %5514 = vmatpush1.bf16.msra.mxu0 %v8567_v63  ;;  %6006 = vmatpush1.bf16.msra.mxu1 %v8570_v11  ;;  %v9997_v63 = vrot.slane %v9916_v2, %v9219_v50  ;;  %v8658_v11 = vld [vmem:[%s9161_s6 + $0x1600] ss:$16 sps:$4 sm:$0xff]   ;;  %v8667_v2 = vld [vmem:[%s9161_s6 + $0x1628] ss:$16 sps:$4 sm:$0xff]  }
 0x301   : > { %5515 = vmatprep.subr.bf16.mxu0 %v8575_v12  ;;  %6007 = vmatprep.subr.bf16.mxu1 %v8578_v13  ;;  %v8661_v12 = vld [vmem:[%s9161_s6 + $0x1608] ss:$16 sps:$4 sm:$0xff]   ;;  %v8666_v13 = vld [vmem:[%s9161_s6 + $0x1624] ss:$16 sps:$4 sm:$0xff]   ;;  %v8664_v50 = vld [vmem:[%s9161_s6 + $0x1620] ss:$16 sps:$4 sm:$0xff]  }
 0x304   : > { %5516 = vmatpush1.bf16.msra.mxu0 %v8573_v15  ;;  %6008 = vmatpush1.bf16.msra.mxu1 %v8576_v17  ;;  %v8669_v15 = vld [vmem:[%s9161_s6 + $0x162c] ss:$16 sps:$4 sm:$0xff]   ;;  %v1236_v17 = vcombine.high %v9931_v10, %v9931_v10  ;;  %v8670_v10 = vld [vmem:[%s9161_s6 + $0x1640] ss:$16 sps:$4 sm:$0xff]  }
 0x305   : > { %5517 = vmatprep.subr.bf16.mxu0 %v8581_v53  ;;  %6009 = vmatprep.subr.bf16.mxu1 %v8584_v18  ;;  %v8672_v53 = vld [vmem:[%s9161_s6 + $0x1644] ss:$16 sps:$4 sm:$0xff]   ;;  %v8675_v18 = vld [vmem:[%s9161_s6 + $0x164c] ss:$16 sps:$4 sm:$0xff]  }
 0x308   : > { %5518 = vmatpush1.bf16.msra.mxu0 %v8579_v19  ;;  %6010 = vmatpush1.bf16.msra.mxu1 %v8582_v20  ;;  %v8673_v19 = vld [vmem:[%s9161_s6 + $0x1648] ss:$16 sps:$4 sm:$0xff]   ;;  %v8678_v20 = vld [vmem:[%s9161_s6 + $0x1664] ss:$16 sps:$4 sm:$0xff]  }
 0x309   : > { %5519 = vmatprep.subr.bf16.mxu0 %v8587_v21  ;;  %6011 = vmatprep.subr.bf16.mxu1 %v8590_v23  ;;  %v8681_v21 = vld [vmem:[%s9161_s6 + $0x166c] ss:$16 sps:$4 sm:$0xff]   ;;  %v8676_v23 = vld [vmem:[%s9161_s6 + $0x1660] ss:$16 sps:$4 sm:$0xff]  }
 0x30c   : > { %5520 = vmatpush1.bf16.msra.mxu0 %v8585_v24  ;;  %6012 = vmatpush1.bf16.msra.mxu1 %v8588_v25  ;;  %v8679_v24 = vld [vmem:[%s9161_s6 + $0x1668] ss:$16 sps:$4 sm:$0xff]   ;;  %v8684_v25 = vld [vmem:[%s9161_s6 + $0x1684] ss:$16 sps:$4 sm:$0xff]  }
 0x30d   : > { %5521 = vmatprep.subr.bf16.mxu0 %v8593_v27  ;;  %6013 = vmatprep.subr.bf16.mxu1 %v8596_v28  ;;  %v8687_v27 = vld [vmem:[%s9161_s6 + $0x168c] ss:$16 sps:$4 sm:$0xff]   ;;  %v8682_v28 = vld [vmem:[%s9161_s6 + $0x1680] ss:$16 sps:$4 sm:$0xff]  }
 0x310   : > { %5522 = vmatpush1.bf16.msra.mxu0 %v8591_v29  ;;  %6014 = vmatpush1.bf16.msra.mxu1 %v8594_v30  ;;  %v8685_v29 = vld [vmem:[%s9161_s6 + $0x1688] ss:$16 sps:$4 sm:$0xff]   ;;  %v8690_v30 = vld [vmem:[%s9161_s6 + $0x16a4] ss:$16 sps:$4 sm:$0xff]  }
 0x311   : > { %5523 = vmatprep.subr.bf16.mxu0 %v8599_v31  ;;  %6015 = vmatprep.subr.bf16.mxu1 %v8602_v16  ;;  %v8693_v31 = vld [vmem:[%s9161_s6 + $0x16ac] ss:$16 sps:$4 sm:$0xff]   ;;  %v8688_v16 = vld [vmem:[%s9161_s6 + $0x16a0] ss:$16 sps:$4 sm:$0xff]  }
 0x314   : > { %5524 = vmatpush1.bf16.msra.mxu0 %v8597_v32  ;;  %6016 = vmatpush1.bf16.msra.mxu1 %v8600_v33  ;;  %v8691_v32 = vld [vmem:[%s9161_s6 + $0x16a8] ss:$16 sps:$4 sm:$0xff]   ;;  %v8696_v33 = vld [vmem:[%s9161_s6 + $0x16c4] ss:$16 sps:$4 sm:$0xff]  }
 0x315   : > { %5525 = vmatprep.subr.bf16.mxu0 %v8605_v34  ;;  %6017 = vmatprep.subr.bf16.mxu1 %v8608_v26  ;;  %v8699_v34 = vld [vmem:[%s9161_s6 + $0x16cc] ss:$16 sps:$4 sm:$0xff]   ;;  %v8694_v26 = vld [vmem:[%s9161_s6 + $0x16c0] ss:$16 sps:$4 sm:$0xff]  }
 0x318   : > { %5526 = vmatpush1.bf16.msra.mxu0 %v8603_v35  ;;  %6018 = vmatpush1.bf16.msra.mxu1 %v8606_v37  ;;  %v8697_v35 = vld [vmem:[%s9161_s6 + $0x16c8] ss:$16 sps:$4 sm:$0xff]   ;;  %v8702_v37 = vld [vmem:[%s9161_s6 + $0x16e4] ss:$16 sps:$4 sm:$0xff]  }
 0x319   : > { %5527 = vmatprep.subr.bf16.mxu0 %v8611_v38  ;;  %6019 = vmatprep.subr.bf16.mxu1 %v8614_v40  ;;  %v8705_v38 = vld [vmem:[%s9161_s6 + $0x16ec] ss:$16 sps:$4 sm:$0xff]   ;;  %v8700_v40 = vld [vmem:[%s9161_s6 + $0x16e0] ss:$16 sps:$4 sm:$0xff]  }
 0x31c   : > { %5528 = vmatpush1.bf16.msra.mxu0 %v8609_v41  ;;  %6020 = vmatpush1.bf16.msra.mxu1 %v8612_v22  ;;  %v8703_v41 = vld [vmem:[%s9161_s6 + $0x16e8] ss:$16 sps:$4 sm:$0xff]   ;;  %v8708_v22 = vld [vmem:[%s9161_s6 + $0x1704] ss:$16 sps:$4 sm:$0xff]  }
 0x31d   : > { %5529 = vmatprep.subr.bf16.mxu0 %v8617_v42  ;;  %6021 = vmatprep.subr.bf16.mxu1 %v8620_v43  ;;  %v8711_v42 = vld [vmem:[%s9161_s6 + $0x170c] ss:$16 sps:$4 sm:$0xff]   ;;  %v8706_v43 = vld [vmem:[%s9161_s6 + $0x1700] ss:$16 sps:$4 sm:$0xff]  }
 0x320   : > { %5530 = vmatpush1.bf16.msra.mxu0 %v8615_v45  ;;  %6022 = vmatpush1.bf16.msra.mxu1 %v8618_v46  ;;  %v8709_v45 = vld [vmem:[%s9161_s6 + $0x1708] ss:$16 sps:$4 sm:$0xff]   ;;  %v8714_v46 = vld [vmem:[%s9161_s6 + $0x1724] ss:$16 sps:$4 sm:$0xff]  }
 0x321   : > { %5531 = vmatprep.subr.bf16.mxu0 %v8623_v47  ;;  %6023 = vmatprep.subr.bf16.mxu1 %v8626_v48  ;;  %v8717_v47 = vld [vmem:[%s9161_s6 + $0x172c] ss:$16 sps:$4 sm:$0xff]   ;;  %v8712_v48 = vld [vmem:[%s9161_s6 + $0x1720] ss:$16 sps:$4 sm:$0xff]  }
 0x324   : > { %5532 = vmatpush1.bf16.msra.mxu0 %v8621_v51  ;;  %6024 = vmatpush1.bf16.msra.mxu1 %v8624_v54  ;;  %v8715_v51 = vld [vmem:[%s9161_s6 + $0x1728] ss:$16 sps:$4 sm:$0xff]   ;;  %v8720_v54 = vld [vmem:[%s9161_s6 + $0x1744] ss:$16 sps:$4 sm:$0xff]  }
 0x325   : > { %5533 = vmatprep.subr.bf16.mxu0 %v8629_v55  ;;  %6025 = vmatprep.subr.bf16.mxu1 %v8632_v56  ;;  %v8723_v55 = vld [vmem:[%s9161_s6 + $0x174c] ss:$16 sps:$4 sm:$0xff]   ;;  %v8718_v56 = vld [vmem:[%s9161_s6 + $0x1740] ss:$16 sps:$4 sm:$0xff]  }
 0x328   : > { %5534 = vmatpush1.bf16.msra.mxu0 %v8627_v39  ;;  %6026 = vmatpush1.bf16.msra.mxu1 %v8630_v57  ;;  %v8721_v39 = vld [vmem:[%s9161_s6 + $0x1748] ss:$16 sps:$4 sm:$0xff]   ;;  %v8726_v57 = vld [vmem:[%s9161_s6 + $0x1764] ss:$16 sps:$4 sm:$0xff]  }
 0x329   : > { %5535 = vmatprep.subr.bf16.mxu0 %v8635_v58  ;;  %6027 = vmatprep.subr.bf16.mxu1 %v8638_v59  ;;  %v8729_v58 = vld [vmem:[%s9161_s6 + $0x176c] ss:$16 sps:$4 sm:$0xff]   ;;  %v8724_v59 = vld [vmem:[%s9161_s6 + $0x1760] ss:$16 sps:$4 sm:$0xff]  }
 0x32c   : > { %5536 = vmatpush1.bf16.msra.mxu0 %v8633_v49  ;;  %6028 = vmatpush1.bf16.msra.mxu1 %v8636_v60  ;;  %v8727_v49 = vld [vmem:[%s9161_s6 + $0x1768] ss:$16 sps:$4 sm:$0xff]   ;;  %v8732_v60 = vld [vmem:[%s9161_s6 + $0x1784] ss:$16 sps:$4 sm:$0xff]  }
 0x32d   : > { %5537 = vmatprep.subr.bf16.mxu0 %v8641_v61  ;;  %6029 = vmatprep.subr.bf16.mxu1 %v8644_v14  ;;  %v8735_v61 = vld [vmem:[%s9161_s6 + $0x178c] ss:$16 sps:$4 sm:$0xff]   ;;  %v8730_v14 = vld [vmem:[%s9161_s6 + $0x1780] ss:$16 sps:$4 sm:$0xff]  }
 0x330   : > { %5538 = vmatpush1.bf16.msra.mxu0 %v8639_v0  ;;  %6030 = vmatpush1.bf16.msra.mxu1 %v8642_v1  ;;  %v8733_v0 = vld [vmem:[%s9161_s6 + $0x1788] ss:$16 sps:$4 sm:$0xff]   ;;  %v8738_v1 = vld [vmem:[%s9161_s6 + $0x17a4] ss:$16 sps:$4 sm:$0xff]  }
 0x331   : > { %5539 = vmatprep.subr.bf16.mxu0 %v8647_v36  ;;  %6031 = vmatprep.subr.bf16.mxu1 %v8650_v3  ;;  %v8741_v36 = vld [vmem:[%s9161_s6 + $0x17ac] ss:$16 sps:$4 sm:$0xff]   ;;  %v8736_v3 = vld [vmem:[%s9161_s6 + $0x17a0] ss:$16 sps:$4 sm:$0xff]  }
 0x334   : > { %5540 = vmatpush1.bf16.msra.mxu0 %v8645_v4  ;;  %6032 = vmatpush1.bf16.msra.mxu1 %v8648_v52  ;;  %v8739_v4 = vld [vmem:[%s9161_s6 + $0x17a8] ss:$16 sps:$4 sm:$0xff]   ;;  %v8744_v52 = vld [vmem:[%s9161_s6 + $0x17c4] ss:$16 sps:$4 sm:$0xff]  }
 0x335   : > { %5541 = vmatprep.subr.bf16.mxu0 %v8653_v5  ;;  %6033 = vmatprep.subr.bf16.mxu1 %v8656_v6  ;;  %v8747_v5 = vld [vmem:[%s9161_s6 + $0x17cc] ss:$16 sps:$4 sm:$0xff]   ;;  %v8742_v6 = vld [vmem:[%s9161_s6 + $0x17c0] ss:$16 sps:$4 sm:$0xff]  }
 0x338   : > { %5542 = vmatpush1.bf16.msra.mxu0 %v8651_v7  ;;  %6034 = vmatpush1.bf16.msra.mxu1 %v8654_v62  ;;  %v8745_v7 = vld [vmem:[%s9161_s6 + $0x17c8] ss:$16 sps:$4 sm:$0xff]   ;;  %v8750_v62 = vld [vmem:[%s9161_s6 + $0x17e4] ss:$16 sps:$4 sm:$0xff]  }
 0x339   : > { %5552 = vmatprep.subr.bf16.mxu0 %v8660_v8  ;;  %6044 = vmatprep.subr.bf16.mxu1 %v8663_v9  ;;  %v8753_v8 = vld [vmem:[%s9161_s6 + $0x17ec] ss:$16 sps:$4 sm:$0xff]   ;;  %v8748_v9 = vld [vmem:[%s9161_s6 + $0x17e0] ss:$16 sps:$4 sm:$0xff]  }
 0x33b   : > { %5544 = vmatmul.mubr.bf16.vlgmr.msra.gmra.mrb[0].mxu0 %v9997_v63  ;;  %6036 = vmatmul.mubr.bf16.vlgmr.msra.gmra.mrb[0].mxu1 %v9997_v63 }
 0x33c   : > { %5553 = vmatpush1.bf16.msra.mxu0 %v8658_v11  ;;  %6045 = vmatpush1.bf16.msra.mxu1 %v8661_v12  ;;  %v8751_v11 = vld [vmem:[%s9161_s6 + $0x17e8] ss:$16 sps:$4 sm:$0xff]   ;;  %v1234_v12 = vcombine.high %v9997_v63, %v9997_v63 }
 0x33d   : > { %5554 = vmatprep.subr.bf16.mxu0 %v8666_v13  ;;  %6046 = vmatprep.subr.bf16.mxu1 %v8669_v15  ;;  %v8941_v13 = vmov 1983009808  }
 0x33e   : > { %5584 = vmatprep.mubr.bf16.mxu0 %v1236_v17  ;;  %6076 = vmatprep.mubr.bf16.mxu1 %v1236_v17  ;;  %v6092_v15 = vunpack.c.l.s4 %v8941_v13  ;;  %v6190_v13 = vld [vmem:[%s10317_s3 + $0x130] sm:$0xff] (!%p7281_p9) }
 0x340   : > { %5555 = vmatpush1.bf16.msra.mxu0 %v8664_v50  ;;  %6047 = vmatpush1.bf16.msra.mxu1 %v8667_v2  ;;  %v6093_v17 = vunpack.c.0.s8 %v6092_v15  ;;  %v6191_v15 = vld [vmem:[%s10317_s3 + $0x138] sm:$0xff] (!%p7281_p9) }
 0x341   : > { %5556 = vmatprep.subr.bf16.mxu0 %v8672_v53  ;;  %6048 = vmatprep.subr.bf16.mxu1 %v8675_v18 }
 0x342   : > { %v10068_v53 = vsub.s32 %v6093_v17, %v9211_v44  ;;  %v6176_v17 = vld [vmem:[%s10317_s3 + $0xc0] sm:$0xff] (!%p7281_p9) }
 0x344   : > { %5557 = vmatpush1.bf16.msra.mxu0 %v8670_v10  ;;  %6049 = vmatpush1.bf16.msra.mxu1 %v8673_v19 }
 0x345   : > { %5558 = vmatprep.subr.bf16.mxu0 %v8678_v20  ;;  %6050 = vmatprep.subr.bf16.mxu1 %v8681_v21 }
 0x348   : > { %5559 = vmatpush1.bf16.msra.mxu0 %v8676_v23  ;;  %6051 = vmatpush1.bf16.msra.mxu1 %v8679_v24 }
 0x349   : > { %5560 = vmatprep.subr.bf16.mxu0 %v8684_v25  ;;  %6052 = vmatprep.subr.bf16.mxu1 %v8687_v27 }
 0x34c   : > { %5561 = vmatpush1.bf16.msra.mxu0 %v8682_v28  ;;  %6053 = vmatpush1.bf16.msra.mxu1 %v8685_v29  ;;  %v315_v28 = vld [vmem:[#allocation2] sm:$0xff] }
 0x34d   : > { %5562 = vmatprep.subr.bf16.mxu0 %v8690_v30  ;;  %6054 = vmatprep.subr.bf16.mxu1 %v8693_v31  ;;  %v6168_v31 = vld [vmem:[%s10317_s3 + $0x80] sm:$0xff] (!%p7281_p9) }
 0x350   : > { %5563 = vmatpush1.bf16.msra.mxu0 %v8688_v16  ;;  %6055 = vmatpush1.bf16.msra.mxu1 %v8691_v32  ;;  %v6169_v16 = vld [vmem:[%s10317_s3 + $0x88] sm:$0xff] (!%p7281_p9)  ;;  %v6200_v32 = vld [vmem:[%s10317_s3 + $0x180] sm:$0xff] (!%p7281_p9) }
 0x351   : > { %5564 = vmatprep.subr.bf16.mxu0 %v8696_v33  ;;  %6056 = vmatprep.subr.bf16.mxu1 %v8699_v34  ;;  %v7360_v33 = vpack.c.bf16 (!%p7281_p9), %v6169_v16, %v6168_v31  ;;  %v6201_v34 = vld [vmem:[%s10317_s3 + $0x188] sm:$0xff] (!%p7281_p9) }
 0x354   : > { %5565 = vmatpush1.bf16.msra.mxu0 %v8694_v26  ;;  %6057 = vmatpush1.bf16.msra.mxu1 %v8697_v35  ;;  %v6152_v26 = vld [vmem:[%s10317_s3] sm:$0xff] (!%p7281_p9)  ;;  %v6153_v35 = vld [vmem:[%s10317_s3 + $0x8] sm:$0xff] (!%p7281_p9) }
 0x355   : > { %5566 = vmatprep.subr.bf16.mxu0 %v8702_v37  ;;  %6058 = vmatprep.subr.bf16.mxu1 %v8705_v38  ;;  %v7392_v37 = vpack.c.bf16 (!%p7281_p9), %v6201_v34, %v6200_v32  ;;  %v7362_v38 = vpack.c.bf16 (!%p7281_p9), %v6153_v35, %v6152_v26  ;;  %v6163_v34 = vld [vmem:[%s10317_s3 + $0x58] sm:$0xff] (!%p7281_p9)  ;;  %v6194_v26 = vld [vmem:[%s10317_s3 + $0x150] sm:$0xff] (!%p7281_p9) }
 0x358   : > { %5567 = vmatpush1.bf16.msra.mxu0 %v8700_v40  ;;  %6059 = vmatpush1.bf16.msra.mxu1 %v8703_v41  ;;  %v6184_v40 = vld [vmem:[%s10317_s3 + $0x100] sm:$0xff] (!%p7281_p9)  ;;  %v6185_v41 = vld [vmem:[%s10317_s3 + $0x108] sm:$0xff] (!%p7281_p9) }
 0x359   : > { %5568 = vmatprep.subr.bf16.mxu0 %v8708_v22  ;;  %6060 = vmatprep.subr.bf16.mxu1 %v8711_v42  ;;  %v6170_v22 = vld [vmem:[%s10317_s3 + $0x90] sm:$0xff] (!%p7281_p9)  ;;  %v7394_v42 = vpack.c.bf16 (!%p7281_p9), %v6185_v41, %v6184_v40  ;;  %v6181_v40 = vld [vmem:[%s10317_s3 + $0xe8] sm:$0xff] (!%p7281_p9)  ;;  %v6118_v41 = vsub.s32 (!%p7281_p9), 0, %v9211_v44 }
 0x35c   : > { %5569 = vmatpush1.bf16.msra.mxu0 %v8706_v43  ;;  %6061 = vmatpush1.bf16.msra.mxu1 %v8709_v45  ;;  %v6171_v43 = vld [vmem:[%s10317_s3 + $0x98] sm:$0xff] (!%p7281_p9)  ;;  %v6202_v45 = vld [vmem:[%s10317_s3 + $0x190] sm:$0xff] (!%p7281_p9) }
 0x35d   : > { %5570 = vmatprep.subr.bf16.mxu0 %v8714_v46  ;;  %6062 = vmatprep.subr.bf16.mxu1 %v8717_v47  ;;  %v6203_v46 = vld [vmem:[%s10317_s3 + $0x198] sm:$0xff] (!%p7281_p9)  ;;  %v7364_v47 = vpack.c.bf16 (!%p7281_p9), %v6171_v43, %v6170_v22  ;;  %v6122_v22 = vsub.s32 (!%p7281_p9), 1, %v9211_v44  ;;  %v6212_v43 = vld [vmem:[%s10317_s3 + $0x1e0] sm:$0xff] (!%p7281_p9) }
 0x360   : > { %5571 = vmatpush1.bf16.msra.mxu0 %v8712_v48  ;;  %6063 = vmatpush1.bf16.msra.mxu1 %v8715_v51  ;;  %v7396_v48 = vpack.c.bf16 (!%p7281_p9), %v6203_v46, %v6202_v45  ;;  %v6154_v51 = vld [vmem:[%s10317_s3 + $0x10] sm:$0xff] (!%p7281_p9)  ;;  %v6213_v45 = vld [vmem:[%s10317_s3 + $0x1e8] sm:$0xff] (!%p7281_p9)  ;;  %v6130_v46 = vsub.s32 (!%p7281_p9), 3, %v9211_v44 }
 0x361   : > { %5572 = vmatprep.subr.bf16.mxu0 %v8720_v54  ;;  %6064 = vmatprep.subr.bf16.mxu1 %v8723_v55  ;;  %v6155_v54 = vld [vmem:[%s10317_s3 + $0x18] sm:$0xff] (!%p7281_p9)  ;;  %v6186_v55 = vld [vmem:[%s10317_s3 + $0x110] sm:$0xff] (!%p7281_p9) }
 0x364   : > { %5573 = vmatpush1.bf16.msra.mxu0 %v8718_v56  ;;  %6065 = vmatpush1.bf16.msra.mxu1 %v8721_v39  ;;  %v7366_v56 = vpack.c.bf16 (!%p7281_p9), %v6155_v54, %v6154_v51  ;;  %v6187_v39 = vld [vmem:[%s10317_s3 + $0x118] sm:$0xff] (!%p7281_p9) }
 0x365   : > { %5574 = vmatprep.subr.bf16.mxu0 %v8726_v57  ;;  %6066 = vmatprep.subr.bf16.mxu1 %v8729_v58  ;;  %v6172_v57 = vld [vmem:[%s10317_s3 + $0xa0] sm:$0xff] (!%p7281_p9)  ;;  %v6173_v58 = vld [vmem:[%s10317_s3 + $0xa8] sm:$0xff] (!%p7281_p9) }
 0x368   : > { %5575 = vmatpush1.bf16.msra.mxu0 %v8724_v59  ;;  %6067 = vmatpush1.bf16.msra.mxu1 %v8727_v49  ;;  %v7398_v59 = vpack.c.bf16 (!%p7281_p9), %v6187_v39, %v6186_v55  ;;  %v7368_v49 = vpack.c.bf16 (!%p7281_p9), %v6173_v58, %v6172_v57  ;;  %v6165_v55 = vld [vmem:[%s10317_s3 + $0x68] sm:$0xff] (!%p7281_p9)  ;;  %v6114_v39 = vld [vmem:[#allocation8] sm:$0xf] (!%p7281_p9)  ;;  %v6182_v58 = vld [vmem:[%s10317_s3 + $0xf0] sm:$0xff] (!%p7281_p9) }
 0x369   : > { %5576 = vmatprep.subr.bf16.mxu0 %v8732_v60  ;;  %6068 = vmatprep.subr.bf16.mxu1 %v8735_v61  ;;  %v6204_v60 = vld [vmem:[%s10317_s3 + $0x1a0] sm:$0xff] (!%p7281_p9)  ;;  %v6205_v61 = vld [vmem:[%s10317_s3 + $0x1a8] sm:$0xff] (!%p7281_p9) }
 0x36a   : > { %v6197_v57 = vld [vmem:[%s10317_s3 + $0x168] sm:$0xff] (!%p7281_p9) }
 0x36c   : > { %5577 = vmatpush1.bf16.msra.mxu0 %v8730_v14  ;;  %6069 = vmatpush1.bf16.msra.mxu1 %v8733_v0  ;;  %v6156_v14 = vld [vmem:[%s10317_s3 + $0x20] sm:$0xff] (!%p7281_p9)  ;;  %v7400_v0 = vpack.c.bf16 (!%p7281_p9), %v6205_v61, %v6204_v60  ;;  %v6123_v60 = vrot.slane (!%p7281_p9), %v6114_v39, %v6122_v22 }
 0x36d   : > { %5578 = vmatprep.subr.bf16.mxu0 %v8738_v1  ;;  %6070 = vmatprep.subr.bf16.mxu1 %v8741_v36  ;;  %v6157_v1 = vld [vmem:[%s10317_s3 + $0x28] sm:$0xff] (!%p7281_p9)  ;;  %v6188_v36 = vld [vmem:[%s10317_s3 + $0x120] sm:$0xff] (!%p7281_p9) }
 0x370   : > { %5579 = vmatpush1.bf16.msra.mxu0 %v8736_v3  ;;  %6071 = vmatpush1.bf16.msra.mxu1 %v8739_v4  ;;  %v6189_v3 = vld [vmem:[%s10317_s3 + $0x128] sm:$0xff] (!%p7281_p9)  ;;  %v7370_v4 = vpack.c.bf16 (!%p7281_p9), %v6157_v1, %v6156_v14  ;;  %v6214_v14 = vld [vmem:[%s10317_s3 + $0x1f0] sm:$0xff] (!%p7281_p9)  ;;  %v6131_v1 = vrot.slane (!%p7281_p9), %v6114_v39, %v6130_v46 }
 0x371   : > { %5580 = vmatprep.subr.bf16.mxu0 %v8744_v52  ;;  %6072 = vmatprep.subr.bf16.mxu1 %v8747_v5  ;;  %v6174_v52 = vld [vmem:[%s10317_s3 + $0xb0] sm:$0xff] (!%p7281_p9)  ;;  %v6175_v5 = vld [vmem:[%s10317_s3 + $0xb8] sm:$0xff] (!%p7281_p9) }
 0x374   : > { %5581 = vmatpush1.bf16.msra.mxu0 %v8742_v6  ;;  %6073 = vmatpush1.bf16.msra.mxu1 %v8745_v7  ;;  %v6206_v6 = vld [vmem:[%s10317_s3 + $0x1b0] sm:$0xff] (!%p7281_p9)  ;;  %v7402_v7 = vpack.c.bf16 (!%p7281_p9), %v6189_v3, %v6188_v36 }
 0x375   : > { %5582 = vmatprep.subr.bf16.mxu0 %v8750_v62  ;;  %6074 = vmatprep.subr.bf16.mxu1 %v8753_v8  ;;  %v7372_v62 = vpack.c.bf16 (!%p7281_p9), %v6175_v5, %v6174_v52  ;;  %v6207_v8 = vld [vmem:[%s10317_s3 + $0x1b8] sm:$0xff] (!%p7281_p9)  ;;  %v6166_v5 = vld [vmem:[%s10317_s3 + $0x70] sm:$0xff] (!%p7281_p9) }
 0x378   : > { %5583 = vmatpush1.bf16.msra.mxu0 %v8748_v9  ;;  %6075 = vmatpush1.bf16.msra.mxu1 %v8751_v11  ;;  %v6158_v9 = vld [vmem:[%s10317_s3 + $0x30] sm:$0xff] (!%p7281_p9)  ;;  %v6159_v11 = vld [vmem:[%s10317_s3 + $0x38] sm:$0xff] (!%p7281_p9) }
 0x379   : > { %7361 = vmatprep.subr.bf16.mxu0 (!%p7281_p9), %v7360_v33  ;;  %7393 = vmatprep.subr.bf16.mxu1 (!%p7281_p9), %v7392_v37  ;;  %v6162_v33 = vld [vmem:[%s10317_s3 + $0x50] sm:$0xff] (!%p7281_p9)  ;;  %v6195_v37 = vld [vmem:[%s10317_s3 + $0x158] sm:$0xff] (!%p7281_p9) }
 0x37a   : > { %v7414_v51 = vpack.c.bf16 (!%p7281_p9), %v6195_v37, %v6194_v26 }
 0x37b   : > { %5585 = vmatmul.mubr.bf16.vlgmr.msra.gmra.mrb[0].mxu0 %v1234_v12  ;;  %6077 = vmatmul.mubr.bf16.vlgmr.msra.gmra.mrb[0].mxu1 %v1234_v12  ;;  %v7404_v12 = vpack.c.bf16 (!%p7281_p9), %v6207_v8, %v6206_v6  ;;  %v6167_v6 = vld [vmem:[%s10317_s3 + $0x78] sm:$0xff] (!%p7281_p9)  ;;  %v6198_v8 = vld [vmem:[%s10317_s3 + $0x170] sm:$0xff] (!%p7281_p9) }
 0x37c   : > { %7363 = vmatpush3.bf16.msra.mxu0 (!%p7281_p9), %v7362_v38  ;;  %7395 = vmatpush3.bf16.msra.mxu1 (!%p7281_p9), %v7394_v42  ;;  %v6180_v38 = vld [vmem:[%s10317_s3 + $0xe0] sm:$0xff] (!%p7281_p9)  ;;  %v6126_v42 = vsub.s32 (!%p7281_p9), 2, %v9211_v44  ;;  %v7416_v44 = vpack.c.bf16 (!%p7281_p9), %v6213_v45, %v6212_v43 }
 0x37d   : > { %7365 = vmatprep.subr.bf16.mxu0 (!%p7281_p9), %v7364_v47  ;;  %7397 = vmatprep.subr.bf16.mxu1 (!%p7281_p9), %v7396_v48  ;;  %v7382_v47 = vpack.c.bf16 (!%p7281_p9), %v6163_v34, %v6162_v33  ;;  %v6164_v48 = vld [vmem:[%s10317_s3 + $0x60] sm:$0xff] (!%p7281_p9)  ;;  %v7384_v54 = vpack.c.bf16 (!%p7281_p9), %v6181_v40, %v6180_v38 }
 0x37e   : > { %v6127_v61 = vrot.slane (!%p7281_p9), %v6114_v39, %v6126_v42  ;;  %v7386_v36 = vpack.c.bf16 (!%p7281_p9), %v6165_v55, %v6164_v48 }
 0x380   : > { %7367 = vmatpush3.bf16.msra.mxu0 (!%p7281_p9), %v7366_v56  ;;  %7399 = vmatpush3.bf16.msra.mxu1 (!%p7281_p9), %v7398_v59  ;;  %v6196_v56 = vld [vmem:[%s10317_s3 + $0x160] sm:$0xff] (!%p7281_p9)  ;;  %v6183_v59 = vld [vmem:[%s10317_s3 + $0xf8] sm:$0xff] (!%p7281_p9) }
 0x381   : > { %7369 = vmatprep.subr.bf16.mxu0 (!%p7281_p9), %v7368_v49  ;;  %7401 = vmatprep.subr.bf16.mxu1 (!%p7281_p9), %v7400_v0  ;;  %v6119_v49 = vrot.slane (!%p7281_p9), %v6114_v39, %v6118_v41  ;;  %v6215_v0 = vld [vmem:[%s10317_s3 + $0x1f8] sm:$0xff] (!%p7281_p9)  ;;  %v7388_v52 = vpack.c.bf16 (!%p7281_p9), %v6183_v59, %v6182_v58 }
 0x383   : > { %v6132_v3 = vcombine.low (!%p7281_p9), %v6119_v49, %v6123_v60 }
 0x384   : > { %7371 = vmatpush3.bf16.msra.mxu0 (!%p7281_p9), %v7370_v4  ;;  %7403 = vmatpush3.bf16.msra.mxu1 (!%p7281_p9), %v7402_v7  ;;  %v7418_v4 = vpack.c.bf16 (!%p7281_p9), %v6197_v57, %v6196_v56  ;;  %v6133_v7 = vcombine.low (!%p7281_p9), %v6127_v61, %v6131_v1 }
 0x385   : > { %7373 = vmatprep.subr.bf16.mxu0 (!%p7281_p9), %v7372_v62  ;;  %7405 = vmatprep.subr.bf16.mxu1 (!%p7281_p9), %v7404_v12  ;;  %v7420_v62 = vpack.c.bf16 (!%p7281_p9), %v6215_v0, %v6214_v14 }
 0x386   : > { %v6147_v12 = vrot.slane (!%p7281_p9), %v6133_v7, %v10068_v53 }
 0x44e   : > { %v5586_v50 = vpop.f32.mrb[0].mxu0  ;;  %v6078_v2 = vpop.f32.mrb[0].mxu1 }
 0x44f   : > { %v5588_v18 = vpop.f32.mrb[1].mxu0  ;;  %v6080_v10 = vpop.f32.mrb[1].mxu1 }
 0x450   : > { %v6089_v19 = vcombine.low %v5586_v50, %v5588_v18  ;;  %v6090_v20 = vcombine.low %v6078_v2, %v6080_v10  ;;  %v5590_v21 = vpop.f32.mrb[2].mxu0  ;;  %v6082_v23 = vpop.f32.mrb[2].mxu1  ;;  %v6177_v50 = vld [vmem:[%s10317_s3 + $0xc8] sm:$0xff] (!%p7281_p9)  ;;  %v6208_v2 = vld [vmem:[%s10317_s3 + $0x1c0] sm:$0xff] (!%p7281_p9)  ;;  %v7374_v10 = vpack.c.bf16 (!%p7281_p9), %v6159_v11, %v6158_v9  ;;  %v6199_v9 = vld [vmem:[%s10317_s3 + $0x178] sm:$0xff] (!%p7281_p9)  ;;  %v6140_v11 = vrot.slane (!%p7281_p9), %v6132_v3, %v10068_v53 }
 0x451   : > { %v5591_v24 = vpop.f32.mrb[3].mxu0  ;;  %v6083_v63 = vpop.f32.mrb[3].mxu1  ;;  %v6209_v18 = vld [vmem:[%s10317_s3 + $0x1c8] sm:$0xff] (!%p7281_p9)  ;;  %v6160_v21 = vld [vmem:[%s10317_s3 + $0x40] sm:$0xff] (!%p7281_p9) }
 0x452   : > { %v6097_v25 = vrot.slane %v6089_v19, %v10068_v53  ;;  %v6104_v27 = vrot.slane %v6090_v20, %v10068_v53  ;;  %6112 = sbr.rel (%p7281_p9) target bundleno = 1349 (0x545), region = 56  ;;  %v7406_v19 = vpack.c.bf16 (!%p7281_p9), %v6191_v15, %v6190_v13  ;;  %v7376_v20 = vpack.c.bf16 (!%p7281_p9), %v6177_v50, %v6176_v17  ;;  %v6161_v23 = vld [vmem:[%s10317_s3 + $0x48] sm:$0xff] (!%p7281_p9)  ;;  %v6192_v24 = vld [vmem:[%s10317_s3 + $0x140] sm:$0xff] (!%p7281_p9)  ;;  %7375 = vmatpush3.bf16.msra.mxu0 (!%p7281_p9), %v7374_v10 }
 0x453   : > { %v7408_v63 = vpack.c.bf16 (!%p7281_p9), %v6209_v18, %v6208_v2  ;;  %v7378_v31 = vpack.c.bf16 (!%p7281_p9), %v6161_v23, %v6160_v21  ;;  %v7390_v13 = vpack.c.bf16 (!%p7281_p9), %v6167_v6, %v6166_v5  ;;  %v7422_v17 = vpack.c.bf16 (!%p7281_p9), %v6199_v9, %v6198_v8 }
 0x454   : > { %v6105_v29 = vcombine.low %v6097_v25, %v6104_v27  ;;  %v6193_v25 = vld [vmem:[%s10317_s3 + $0x148] sm:$0xff] (!%p7281_p9)  ;;  %v6178_v27 = vld [vmem:[%s10317_s3 + $0xd0] sm:$0xff] (!%p7281_p9)  ;;  %7407 = vmatpush3.bf16.msra.mxu1 (!%p7281_p9), %v7406_v19  ;;  %7377 = vmatprep.subr.bf16.mxu0 (!%p7281_p9), %v7376_v20  ;;  %v6148_v50 = vcombine.low (!%p7281_p9), %v6140_v11, %v6147_v12 }
 0x455   : > { %v7410_v16 = vpack.c.bf16 (!%p7281_p9), %v6193_v25, %v6192_v24  ;;  %7409 = vmatprep.subr.bf16.mxu1 (!%p7281_p9), %v7408_v63 }
 0x456   : > { %v6107_v30 = vadd.f32 %v6105_v29, %v315_v28  ;;  %v6179_v28 = vld [vmem:[%s10317_s3 + $0xd8] sm:$0xff] (!%p7281_p9)  ;;  %v6210_v29 = vld [vmem:[%s10317_s3 + $0x1d0] sm:$0xff] (!%p7281_p9)  ;;  %7379 = vmatpush3.bf16.msra.mxu0 (!%p7281_p9), %v7378_v31 }
 0x457   : > { %v7380_v32 = vpack.c.bf16 (!%p7281_p9), %v6179_v28, %v6178_v27 }
 0x458   : > { %6108 = vst [vmem:[#allocation2] sm:$0xff] %v6107_v30  ;;  %v6211_v30 = vld [vmem:[%s10317_s3 + $0x1d8] sm:$0xff] (!%p7281_p9)  ;;  %7411 = vmatpush3.bf16.msra.mxu1 (!%p7281_p9), %v7410_v16 }
 0x459   : > { %v7412_v35 = vpack.c.bf16 %v6211_v30, %v6210_v29  ;;  %7381 = vmatprep.subr.bf16.mxu0 %v7380_v32 }
 0x45a   : > { %7383 = vmatpush3.bf16.msra.mxu0 %v7382_v47 }
 0x45b   : > { %7413 = vmatprep.subr.bf16.mxu1 %v7412_v35  ;;  %7385 = vmatprep.subr.bf16.mxu0 %v7384_v54 }
 0x45c   : > { %7415 = vmatpush3.bf16.msra.mxu1 %v7414_v51 }
 0x45d   : > { %7417 = vmatprep.subr.bf16.mxu1 %v7416_v44 }
 0x45e   : > { %7387 = vmatpush3.bf16.msra.mxu0 %v7386_v36 }
 0x45f   : > { %v6113_v15 = vld [vmem:[#allocation2] sm:$0xff]  ;;  %7389 = vmatprep.subr.bf16.mxu0 %v7388_v52 }
 0x460   : > { %7419 = vmatpush3.bf16.msra.mxu1 %v7418_v4  ;;  %v6150_v2 = vadd.f32 %v6148_v50, %v6113_v15 }
 0x461   : > { %7421 = vmatprep.subr.bf16.mxu1 %v7420_v62 }
 0x462   : > { %7391 = vmatpush3.bf16.msra.mxu0 %v7390_v13  ;;  %v6151_v18 = vmax.f32 %v6150_v2, 0.0 }
 0x464   : > { %7423 = vmatpush3.bf16.msra.mxu1 %v7422_v17  ;;  %v6224_v10 = vrot.slane %v6151_v18, %v10068_v53  ;;  %v6217_v19 = vcombine.high %v6151_v18, %v6151_v18 }
 0x466   : > { %v6232_v20 = vcombine.high %v6224_v10, %v6224_v10  ;;  %v6231_v21 = vrot.slane %v6217_v19, %v10068_v53 }
 0x468   : > { %6302 = vmatprep.mubr.f32.mxu0 %v6232_v20  ;;  %v6233_v23 = vcombine.high %v6231_v21, %v6231_v21 }
 0x469   : > { %6303 = vmatmul.mubr.f32.vlgmr.msra.gmra.mrb[0].mxu0 %v6224_v10 }
 0x46a   : > { %6372 = vmatprep.mubr.f32.mxu1 %v6233_v23 }
 0x46b   : > { %6373 = vmatmul.mubr.f32.vlgmr.msra.gmra.mrb[0].mxu1 %v6231_v21 }
 0x53c   : > { %v7322_v24 = vpop.f32.mrb[0].mxu0 }
 0x53d   : > { %v7323_v63 = vpop.f32.mrb[1].mxu0 }
 0x53e   : > { %v7357_v25 = vpop.f32.mrb[0].mxu1  ;;  %v7324_v27 = vadd.f32 %v7323_v63, %v7322_v24 }
 0x53f   : > { %v7358_v28 = vpop.f32.mrb[1].mxu1 }
 0x540   : > { %v7359_v29 = vadd.f32 %v7358_v28, %v7357_v25 }
 0x542   : > { %v6375_v30 = vadd.f32 %v7359_v29, %v7324_v27 }
 0x544   : > { %6379 = vst.msk [vmem:[#allocation9] sm:$0x3] %vm6378_vm0, %v6375_v30 }
 0x545 PF: > { %p7542_p11 = scmp.eq.s32.totalorder %s8997_s21, 2  ;;  %s8942_s10 = smov [#allocation9]  }
 0x546   : > { %s6389_s11 = sshll.u32 %s8942_s10, 4  ;;  %s6390_s11 = int_to_ptr.vmem [resolvable:$true] %s6389_s11 }
 0x547   : > { %s8844_s26 = scalar_lea.vmem %s6390_s11, 32  ;;  %p8851_p1 = scmp.lt.s32.totalorder %s6390_s11, %s6390_s11 }
 0x548   : > { %p8845_p13 = scmp.ne.s32.totalorder %s6390_s11, %s8844_s26  ;;  %p8852_p0 = scmp.lt.s32.totalorder %s8844_s26, %s8844_s26 }
 0x54a   : > { %p8846_p3 = pnand %p8845_p13, %p7542_p11  ;;  %p8853_p8 = por %p8852_p0, %p8851_p1 }
 0x54c   : > { %p8847_p4 = pneg %p8846_p3 }
 0x54e   : > { %p8854_p2 = pnand %p8853_p8, %p8847_p4 }
 0x550   : > { %8857 = shalt.err (!%p8854_p2)
}
 0x551   : > { %s8858_s23 = scalar_lea.hbm %s10318_s4, 32 }
 0x552   : > { %p8859_p12 = scmp.ne.s32.totalorder %s10318_s4, %s8858_s23  ;;  %p8864_p5 = scmp.lt.u32.totalorder %s8858_s23, %s10318_s4 }
 0x554   : > { %p8860_p7 = pnand %p8859_p12, %p7542_p11 }
 0x556   : > { %p8861_p10 = pneg %p8860_p7 }
 0x558   : > { %p8866_p6 = pnand %p8864_p5, %p8861_p10 }
 0x55a   : > { %8869 = shalt.err (!%p8866_p6)
}
 0x55b   : > { %7525 = dma.vmem_to_hbm [thread:$0]  (%p7542_p11), %s6390_s11, 32, %s10318_s4, [#allocation5]  }
 0x55c   : > { %8907 = dma.done.wait (%p7542_p11), [#allocation5], 32  }
 0x55d   : > { %8909 = vsyncadd (%p7542_p11), [#allocation5], 4294967264 }
 0x55e PF: > { %s21_s20 = sadd.s32 1, %s8932_s20   ;;  %s10335_s15 = smov %s8916_s16 }
 0x55f   : > { %p18_p9 = scmp.ge.s32.totalorder %s21_s20, 5   ;;  %s10336_s16 = smov %s8920_s17 }
 0x560   : > { %s10337_s17 = smov %s9081_s29  ;;  %s10338_s18 = smov %s8928_s19 }
 0x561   : > { %s10339_s19 = smov %s10341_s28  ;;  %20 = sbr.rel (!%p18_p9) target bundleno = 7 (0x7), region = 103 }
 0x568   :  { %6402 = vsyncpa [#allocation4], 1 }
 0x569   :  { %6404 = vsyncpa [#allocation4 + $0x1], 1 }
 0x56a   :  { %6405 = vsyncpa [#allocation7], 1 }
 0x56b   :  { %6407 = vsyncpa [#allocation7 + $0x1], 1 }
 0x56c   :  { %6408 = vsyncpa [#allocation5], 1 }
 0x56d   :  { %6410 = vsyncpa [#allocation5 + $0x1], 1 }

</bundles_post_ra>
